<compile_context>
chip_gen: v6e
topology: v6e:2x2x1
jax: 0.10.0
libtpu: 0.0.40
codegen_flags: <defaults>
</compile_context>

<pallas_src>
import jax
import jax.numpy as jnp
from jax import lax
from jax.experimental import pallas as pl
from jax.experimental.pallas import tpu as pltpu

_GUARD = 8          # zero guard rows above/below every flattened activation (keeps slices 8-aligned)
_BN_EPS = 1e-5


def _edge(kx):
    return "L" if kx == 0 else ("R" if kx == 2 else None)


# --------------------------------------------------------------------------
# fused residual-block kernel builder
# --------------------------------------------------------------------------
def _make_block_kernel(*, n_img, r_out, wo, cin, cout, taps1, taps2,
                       in_stride, mid_stride, has_proj, id_res_off):
    """Kernel layout (single grid step, everything resident in VMEM):
         im2col(x)            -> col1 (bf16)            [masked shifted-window copies]
         col1 @ W1cat + b     -> acc1 (f32)             [shortcut conv fused as extra N columns]
         BN1 / BN_sc + ReLU   -> a1 (bf16, padded-H layout scratch), res (f32)
         im2col(a1)           -> col2 (bf16)
         col2 @ W2 + b        -> acc2 (f32)
         BN2 + res + ReLU     -> out (f32, single HBM store)
    """
    M = n_img * r_out
    inv_m = 1.0 / float(M)

    def bn(acc, pv):
        mean = jnp.sum(acc, axis=0, keepdims=True) * inv_m
        cen = acc - mean
        var = jnp.sum(cen * cen, axis=0, keepdims=True) * inv_m
        scale = pv[1:2, :] * lax.rsqrt(var + _BN_EPS)
        return cen * scale + pv[2:3, :]

    def kernel(x_ref, w1_ref, p1_ref, w2_ref, p2_ref, o_ref,
               col1_ref, col2_ref, a1_ref):
        # ---- W-edge {0,1} masks (bf16), computed once and reused by every tap copy ----
        o_idx = lax.broadcasted_iota(jnp.int32, (r_out, 1), 0)
        if (wo & (wo - 1)) == 0:
            x_idx = jnp.bitwise_and(o_idx, wo - 1)
        else:
            x_idx = o_idx % wo
        mask_l = jnp.where(x_idx != 0, 1.0, 0.0).astype(jnp.bfloat16)
        mask_r = jnp.where(x_idx != wo - 1, 1.0, 0.0).astype(jnp.bfloat16)

        def build_cols(src_ref, col_ref, taps, c_blk, img_stride):
            # In-VMEM im2col: one masked bf16 copy per (image, tap).  All slice starts
            # are static Python ints, so Mosaic sees the exact (mis)alignment.
            for n in range(n_img):
                img_base = _GUARD + n * img_stride
                for t, (roff, coff, mk) in enumerate(taps):
                    win = src_ref[pl.ds(img_base + roff, r_out), pl.ds(coff, c_blk)]
                    if mk == "L":
                        win = win * mask_l
                    elif mk == "R":
                        win = win * mask_r
                    col_ref[pl.ds(n * r_out, r_out), pl.ds(t * c_blk, c_blk)] = win

        # -------- conv1 (3x3, stride s) + fused 1x1 projection shortcut (extra N columns) ------
        build_cols(x_ref, col1_ref, taps1, cin, in_stride)
        pv1 = p1_ref[...]
        acc1 = jnp.dot(col1_ref[...], w1_ref[...],
                       preferred_element_type=jnp.float32) + pv1[0:1, :]
        y1 = bn(acc1, pv1)                                   # per-column BN (bn1 | sc_bn)
        a1 = jnp.maximum(y1[:, :cout], 0.0).astype(jnp.bfloat16)
        if has_proj:
            res = y1[:, cout:]                               # shortcut conv+BN output (no ReLU)
        else:
            res = jnp.concatenate(
                [x_ref[pl.ds(_GUARD + n * in_stride + id_res_off, r_out), :]
                 for n in range(n_img)], axis=0).astype(jnp.float32)

        # -------- store a1 in zero-padded-H layout (zero only guard / pad rows) -----------------
        a1_ref[pl.ds(0, _GUARD + wo), :] = jnp.zeros((_GUARD + wo, cout), jnp.bfloat16)
        for n in range(n_img):
            base = _GUARD + n * mid_stride
            a1_ref[pl.ds(base + wo, r_out), :] = a1[n * r_out:(n + 1) * r_out, :]
            gap = 2 * wo if n + 1 < n_img else wo + _GUARD
            a1_ref[pl.ds(base + wo + r_out, gap), :] = jnp.zeros((gap, cout), jnp.bfloat16)

        # -------- conv2 (3x3, stride 1) + BN2 + residual add + ReLU, single HBM store -----------
        build_cols(a1_ref, col2_ref, taps2, cout, mid_stride)
        pv2 = p2_ref[...]
        acc2 = jnp.dot(col2_ref[...], w2_ref[...],
                       preferred_element_type=jnp.float32) + pv2[0:1, :]
        o_ref[...] = jnp.maximum(bn(acc2, pv2) + res, 0.0)

    return kernel


# --------------------------------------------------------------------------
# ResidualBlock forward: one pallas_call per block
# --------------------------------------------------------------------------
def residual_block_forward(x_nchw, params, *, stride=1):
    if stride not in (1, 2):
        raise NotImplementedError("stride must be 1 or 2")
    w1 = params["conv1_w"]
    x = jnp.transpose(x_nchw, (0, 2, 3, 1)).astype(jnp.float32)        # NCHW -> NHWC
    n, height, width, cin = x.shape
    cout = w1.shape[0]
    assert height % stride == 0 and width % stride == 0
    ho, wo = height // stride, width // stride
    r_out = ho * wo
    M = n * r_out
    has_proj = (stride != 1) or (cin != cout)

    # ---- flatten the input (H zero-pad; space-to-depth for stride 2), cast to bf16 once ----
    xp = jnp.pad(x, ((0, 0), (1, 1), (0, 0), (0, 0)))                  # zero-pad H by 1
    if stride == 1:
        xf = xp.reshape(n * (ho + 2) * wo, cin)
        in_stride = (ho + 2) * wo
        # tap t = ky*3+kx: (row offset, channel-block offset, W-edge mask)
        taps1 = tuple((ky * wo + kx - 1, 0, _edge(kx))
                      for ky in range(3) for kx in range(3))
    else:  # stride 2: space-to-depth repack -> every conv tap becomes a stride-1 shifted window
        xs = jnp.transpose(xp.reshape(n, ho + 1, 2, wo, 2, cin), (0, 1, 3, 2, 4, 5))
        xf = xs.reshape(n * (ho + 1) * wo, 4 * cin)
        in_stride = (ho + 1) * wo
        taps1 = []
        for ky in range(3):
            ty, py = (0, ky) if ky < 2 else (1, 0)
            for kx in range(3):
                tx, px = (-1, 1) if kx == 0 else (0, kx - 1)
                taps1.append((ty * wo + tx, (2 * py + px) * cin, "L" if kx == 0 else None))
        taps1 = tuple(taps1)
    xf = jnp.pad(xf.astype(jnp.bfloat16), ((_GUARD, _GUARD), (0, 0)))
    taps2 = tuple((ky * wo + kx - 1, 0, _edge(kx))
                  for ky in range(3) for kx in range(3))

    # ---- pack weights / per-channel (bias, gamma, beta) vectors ----
    def pack3x3(wt):   # torch (Cout, Cin, 3, 3) -> (9*Cin, Cout), tap order t = ky*3 + kx
        return jnp.concatenate([wt[:, :, ky, kx].T
                                for ky in range(3) for kx in range(3)], axis=0)

    w1p = pack3x3(w1)
    p1 = jnp.stack([params["conv1_b"], params["bn1_g"], params["bn1_b"]])
    if has_proj:
        # 1x1 shortcut conv samples exactly the (ky,kx)=(1,1) im2col block -> fold it into
        # conv1's weight as extra output columns (lane-dense N = 2*cout).
        wsc = jnp.zeros((9 * cin, cout), jnp.float32)
        wsc = wsc.at[4 * cin:5 * cin, :].set(params["sc_w"][:, :, 0, 0].T)
        w1p = jnp.concatenate([w1p, wsc], axis=1)
        p1 = jnp.concatenate(
            [p1, jnp.stack([params["sc_b"], params["sc_bn_g"], params["sc_bn_b"]])], axis=1)
    w2p = pack3x3(params["conv2_w"]).astype(jnp.bfloat16)
    w1p = w1p.astype(jnp.bfloat16)
    p2 = jnp.stack([params["conv2_b"], params["bn2_g"], params["bn2_b"]])

    mid_stride = (ho + 2) * wo
    a1_rows = 2 * _GUARD + n * mid_stride

    kernel = _make_block_kernel(
        n_img=n, r_out=r_out, wo=wo, cin=cin, cout=cout,
        taps1=taps1, taps2=taps2, in_stride=in_stride, mid_stride=mid_stride,
        has_proj=has_proj, id_res_off=wo)

    def fullspec(arr):
        return pl.BlockSpec(arr.shape, lambda i: (0, 0))

    # explicit VMEM budget (inputs/outputs x2 for BlockSpec buffering + scratches + margin)
    def nbytes(shape, itemsize):
        sz = 1
        for s in shape:
            sz *= int(s)
        return sz * itemsize

    vmem_needed = (2 * (nbytes(xf.shape, 2) + nbytes(w1p.shape, 2) + nbytes(p1.shape, 4)
                        + nbytes(w2p.shape, 2) + nbytes(p2.shape, 4) + nbytes((M, cout), 4))
                   + nbytes((M, 9 * cin), 2) + nbytes((M, 9 * cout), 2)
                   + nbytes((a1_rows, cout), 2) + (8 << 20))
    vmem_limit = int(min(max(vmem_needed, 32 << 20), 48 << 20))

    out_flat = pl.pallas_call(
        kernel,
        out_shape=jax.ShapeDtypeStruct((M, cout), jnp.float32),
        grid=(1,),
        in_specs=[fullspec(xf), fullspec(w1p), fullspec(p1), fullspec(w2p), fullspec(p2)],
        out_specs=pl.BlockSpec((M, cout), lambda i: (0, 0)),
        scratch_shapes=[pltpu.VMEM((M, 9 * cin), jnp.bfloat16),    # im2col for conv1
                        pltpu.VMEM((M, 9 * cout), jnp.bfloat16),   # im2col for conv2
                        pltpu.VMEM((a1_rows, cout), jnp.bfloat16)],  # padded conv1 activation
        compiler_params=pltpu.CompilerParams(
            dimension_semantics=("arbitrary",),
            vmem_limit_bytes=vmem_limit),
    )(xf, w1p, p1, w2p, p2)

    out = out_flat.reshape(n, ho, wo, cout)
    return jnp.transpose(out, (0, 3, 1, 2))                           # NHWC -> NCHW


# --------------------------------------------------------------------------
# pure-JAX reference (same semantics: conv+bias, training-mode BN, relu, shortcut)
# --------------------------------------------------------------------------
def _reference_block(x_nchw, p, *, stride):
    def conv(x, wt, b, s, pad):
        y = lax.conv_general_dilated(
            x, wt, (s, s), ((pad, pad), (pad, pad)),
            dimension_numbers=("NCHW", "OIHW", "NCHW"),
            precision=lax.Precision.HIGHEST)
        return y + b[None, :, None, None]

    def bn(x, g, b):
        m = jnp.mean(x, axis=(0, 2, 3), keepdims=True)
        v = jnp.mean((x - m) ** 2, axis=(0, 2, 3), keepdims=True)
        return (x - m) * lax.rsqrt(v + _BN_EPS) * g[None, :, None, None] + b[None, :, None, None]

    cin, cout = x_nchw.shape[1], p["conv1_w"].shape[0]
    h = jax.nn.relu(bn(conv(x_nchw, p["conv1_w"], p["conv1_b"], stride, 1),
                       p["bn1_g"], p["bn1_b"]))
    h = bn(conv(h, p["conv2_w"], p["conv2_b"], 1, 1), p["bn2_g"], p["bn2_b"])
    if stride != 1 or cin != cout:
        s = bn(conv(x_nchw, p["sc_w"], p["sc_b"], stride, 0), p["sc_bn_g"], p["sc_bn_b"])
    else:
        s = x_nchw
    return jax.nn.relu(h + s)


# --------------------------------------------------------------------------
# deterministic synthetic parameters (shapes follow the torch __init__)
# --------------------------------------------------------------------------
def init_params(key, cin, cout):
    ks = jax.random.split(key, 12)

    def cw(k, ci, co, ksz):
        return jax.random.normal(k, (co, ci, ksz, ksz), jnp.float32) * 0.1

    def vec(k, c, scale=0.1):
        return jax.random.normal(k, (c,), jnp.float32) * scale

    return {
        "conv1_w": cw(ks[0], cin, cout, 3), "conv1_b": vec(ks[1], cout),
        "bn1_g": 1.0 + vec(ks[2], cout), "bn1_b": vec(ks[3], cout),
        "conv2_w": cw(ks[4], cout, cout, 3), "conv2_b": vec(ks[5], cout),
        "bn2_g": 1.0 + vec(ks[6], cout), "bn2_b": vec(ks[7], cout),
        # projection shortcut params (used only when stride != 1 or cin != cout)
        "sc_w": cw(ks[8], cin, cout, 1), "sc_b": vec(ks[9], cout),
        "sc_bn_g": 1.0 + vec(ks[10], cout), "sc_bn_b": vec(ks[11], cout),
    }


if __name__ == "__main__":
    key = jax.random.PRNGKey(0)
    k_p1, k_x1, k_p2, k_x2 = jax.random.split(key, 4)

    fwd = jax.jit(residual_block_forward, static_argnames=("stride",))
    # tolerance covers bf16 matmul operands / bf16 activations vs the f32 HIGHEST reference
    TOL = 6e-2

    # Config 1: downsampling block with projection shortcut (stride=2, 32 -> 64 channels).
    params1 = init_params(k_p1, 32, 64)
    x1 = jax.random.normal(k_x1, (2, 32, 16, 16), jnp.float32)
    out1 = jax.block_until_ready(fwd(x1, params1, stride=2))
    ref1 = _reference_block(x1, params1, stride=2)
    assert out1.shape == (2, 64, 8, 8)
    assert bool(jnp.all(jnp.isfinite(out1)))
    assert float(jnp.max(jnp.abs(out1 - ref1))) < TOL

    # Config 2: identity-shortcut block (stride=1, 64 -> 64 channels).
    params2 = init_params(k_p2, 64, 64)
    x2 = jax.random.normal(k_x2, (2, 64, 16, 16), jnp.float32)
    out2 = jax.block_until_ready(fwd(x2, params2, stride=1))
    ref2 = _reference_block(x2, params2, stride=1)
    assert out2.shape == (2, 64, 16, 16)
    assert bool(jnp.all(jnp.isfinite(out2)))
    assert float(jnp.max(jnp.abs(out2 - ref2))) < TOL

    print("KERNEL_OK")
</pallas_src>

<mosaic_0001>
module attributes {stable_mosaic.version = 11 : i64} {
  func.func @kernel(%arg0: i32, %arg1: memref<160x128xbf16, #tpu.memory_space<vmem>>, %arg2: memref<288x128xbf16, #tpu.memory_space<vmem>>, %arg3: memref<3x128xf32, #tpu.memory_space<vmem>>, %arg4: memref<576x64xbf16, #tpu.memory_space<vmem>>, %arg5: memref<3x64xf32, #tpu.memory_space<vmem>>, %arg6: memref<128x64xf32, #tpu.memory_space<vmem>>, %arg7: memref<128x288xbf16, #tpu.memory_space<vmem>>, %arg8: memref<128x576xbf16, #tpu.memory_space<vmem>>, %arg9: memref<176x64xbf16, #tpu.memory_space<vmem>>) attributes {dimension_semantics = [#tpu.dimension_semantics<arbitrary>], iteration_bounds = array<i64: 1>, scalar_prefetch = 0 : i64, scratch_operands = 3 : i64, tpu.core_type = #tpu.core_type<tc>, window_params = [{pipeline_mode = #tpu.pipeline_mode<synchronous>, transform_indices = @transform_0, window_bounds = array<i64: 160, 128>}, {pipeline_mode = #tpu.pipeline_mode<synchronous>, transform_indices = @transform_1, window_bounds = array<i64: 288, 128>}, {pipeline_mode = #tpu.pipeline_mode<synchronous>, transform_indices = @transform_2, window_bounds = array<i64: 3, 128>}, {pipeline_mode = #tpu.pipeline_mode<synchronous>, transform_indices = @transform_3, window_bounds = array<i64: 576, 64>}, {pipeline_mode = #tpu.pipeline_mode<synchronous>, transform_indices = @transform_4, window_bounds = array<i64: 3, 64>}, {pipeline_mode = #tpu.pipeline_mode<synchronous>, transform_indices = @transform_5, window_bounds = array<i64: 128, 64>}]} {
    %0 = tpu.iota {dimensions = array<i32: 0>} : vector<64x1xi32>
    %c7_i32 = arith.constant 7 : i32
    %1 = vector.broadcast %c7_i32 : i32 to vector<64x1xi32>
    %2 = arith.andi %0, %1 : vector<64x1xi32>
    %c0_i32 = arith.constant 0 : i32
    %3 = vector.broadcast %c0_i32 : i32 to vector<64x1xi32>
    %4 = arith.cmpi ne, %2, %3 : vector<64x1xi32>
    %cst = arith.constant 1.000000e+00 : f32
    %cst_0 = arith.constant 0.000000e+00 : f32
    %5 = vector.broadcast %cst : f32 to vector<64x1xf32>
    %6 = vector.broadcast %cst_0 : f32 to vector<64x1xf32>
    %7 = arith.select %4, %5, %6 : vector<64x1xi1>, vector<64x1xf32>
    %8 = arith.truncf %7 : vector<64x1xf32> to vector<64x1xbf16>
    %c7_i32_1 = arith.constant 7 : i32
    %9 = vector.broadcast %c7_i32_1 : i32 to vector<64x1xi32>
    %10 = arith.cmpi ne, %2, %9 : vector<64x1xi32>
    %cst_2 = arith.constant 1.000000e+00 : f32
    %cst_3 = arith.constant 0.000000e+00 : f32
    %11 = vector.broadcast %cst_2 : f32 to vector<64x1xf32>
    %12 = vector.broadcast %cst_3 : f32 to vector<64x1xf32>
    %13 = arith.select %10, %11, %12 : vector<64x1xi1>, vector<64x1xf32>
    %14 = arith.truncf %13 : vector<64x1xf32> to vector<64x1xbf16>
    %c7 = arith.constant 7 : index
    %c32 = arith.constant 32 : index
    %15 = vector.load %arg1[%c7, %c32] : memref<160x128xbf16, #tpu.memory_space<vmem>>, vector<64x32xbf16>
    %16 = vector.broadcast %8 : vector<64x1xbf16> to vector<64x32xbf16>
    %17 = arith.mulf %15, %16 : vector<64x32xbf16>
    %c0 = arith.constant 0 : index
    %c0_4 = arith.constant 0 : index
    %18 = vector.load %arg7[%c0, %c0_4] : memref<128x288xbf16, #tpu.memory_space<vmem>>, vector<64x32xbf16>
    tpu.vector_store %arg7[%c0, %c0_4], %17 {strides = array<i32>} : memref<128x288xbf16, #tpu.memory_space<vmem>>, vector<64x32xbf16>,
    %c8 = arith.constant 8 : index
    %c0_5 = arith.constant 0 : index
    %19 = vector.load %arg1[%c8, %c0_5] : memref<160x128xbf16, #tpu.memory_space<vmem>>, vector<64x32xbf16>
    %c0_6 = arith.constant 0 : index
    %c32_7 = arith.constant 32 : index
    %20 = vector.load %arg7[%c0_6, %c32_7] : memref<128x288xbf16, #tpu.memory_space<vmem>>, vector<64x32xbf16>
    tpu.vector_store %arg7[%c0_6, %c32_7], %19 {strides = array<i32>} : memref<128x288xbf16, #tpu.memory_space<vmem>>, vector<64x32xbf16>,
    %c8_8 = arith.constant 8 : index
    %c32_9 = arith.constant 32 : index
    %21 = vector.load %arg1[%c8_8, %c32_9] : memref<160x128xbf16, #tpu.memory_space<vmem>>, vector<64x32xbf16>
    %c0_10 = arith.constant 0 : index
    %c64 = arith.constant 64 : index
    %22 = vector.load %arg7[%c0_10, %c64] : memref<128x288xbf16, #tpu.memory_space<vmem>>, vector<64x32xbf16>
    tpu.vector_store %arg7[%c0_10, %c64], %21 {strides = array<i32>} : memref<128x288xbf16, #tpu.memory_space<vmem>>, vector<64x32xbf16>,
    %c7_11 = arith.constant 7 : index
    %c96 = arith.constant 96 : index
    %23 = vector.load %arg1[%c7_11, %c96] : memref<160x128xbf16, #tpu.memory_space<vmem>>, vector<64x32xbf16>
    %24 = vector.broadcast %8 : vector<64x1xbf16> to vector<64x32xbf16>
    %25 = arith.mulf %23, %24 : vector<64x32xbf16>
    %c0_12 = arith.constant 0 : index
    %c96_13 = arith.constant 96 : index
    %26 = vector.load %arg7[%c0_12, %c96_13] : memref<128x288xbf16, #tpu.memory_space<vmem>>, vector<64x32xbf16>
    tpu.vector_store %arg7[%c0_12, %c96_13], %25 {strides = array<i32>} : memref<128x288xbf16, #tpu.memory_space<vmem>>, vector<64x32xbf16>,
    %c8_14 = arith.constant 8 : index
    %c64_15 = arith.constant 64 : index
    %27 = vector.load %arg1[%c8_14, %c64_15] : memref<160x128xbf16, #tpu.memory_space<vmem>>, vector<64x32xbf16>
    %c0_16 = arith.constant 0 : index
    %c128 = arith.constant 128 : index
    %28 = vector.load %arg7[%c0_16, %c128] : memref<128x288xbf16, #tpu.memory_space<vmem>>, vector<64x32xbf16>
    tpu.vector_store %arg7[%c0_16, %c128], %27 {strides = array<i32>} : memref<128x288xbf16, #tpu.memory_space<vmem>>, vector<64x32xbf16>,
    %c8_17 = arith.constant 8 : index
    %c96_18 = arith.constant 96 : index
    %29 = vector.load %arg1[%c8_17, %c96_18] : memref<160x128xbf16, #tpu.memory_space<vmem>>, vector<64x32xbf16>
    %c0_19 = arith.constant 0 : index
    %c160 = arith.constant 160 : index
    %30 = vector.load %arg7[%c0_19, %c160] : memref<128x288xbf16, #tpu.memory_space<vmem>>, vector<64x32xbf16>
    tpu.vector_store %arg7[%c0_19, %c160], %29 {strides = array<i32>} : memref<128x288xbf16, #tpu.memory_space<vmem>>, vector<64x32xbf16>,
    %c15 = arith.constant 15 : index
    %c32_20 = arith.constant 32 : index
    %31 = vector.load %arg1[%c15, %c32_20] : memref<160x128xbf16, #tpu.memory_space<vmem>>, vector<64x32xbf16>
    %32 = vector.broadcast %8 : vector<64x1xbf16> to vector<64x32xbf16>
    %33 = arith.mulf %31, %32 : vector<64x32xbf16>
    %c0_21 = arith.constant 0 : index
    %c192 = arith.constant 192 : index
    %34 = vector.load %arg7[%c0_21, %c192] : memref<128x288xbf16, #tpu.memory_space<vmem>>, vector<64x32xbf16>
    tpu.vector_store %arg7[%c0_21, %c192], %33 {strides = array<i32>} : memref<128x288xbf16, #tpu.memory_space<vmem>>, vector<64x32xbf16>,
    %c16 = arith.constant 16 : index
    %c0_22 = arith.constant 0 : index
    %35 = vector.load %arg1[%c16, %c0_22] : memref<160x128xbf16, #tpu.memory_space<vmem>>, vector<64x32xbf16>
    %c0_23 = arith.constant 0 : index
    %c224 = arith.constant 224 : index
    %36 = vector.load %arg7[%c0_23, %c224] : memref<128x288xbf16, #tpu.memory_space<vmem>>, vector<64x32xbf16>
    tpu.vector_store %arg7[%c0_23, %c224], %35 {strides = array<i32>} : memref<128x288xbf16, #tpu.memory_space<vmem>>, vector<64x32xbf16>,
    %c16_24 = arith.constant 16 : index
    %c32_25 = arith.constant 32 : index
    %37 = vector.load %arg1[%c16_24, %c32_25] : memref<160x128xbf16, #tpu.memory_space<vmem>>, vector<64x32xbf16>
    %c0_26 = arith.constant 0 : index
    %c256 = arith.constant 256 : index
    %38 = vector.load %arg7[%c0_26, %c256] : memref<128x288xbf16, #tpu.memory_space<vmem>>, vector<64x32xbf16>
    tpu.vector_store %arg7[%c0_26, %c256], %37 {strides = array<i32>} : memref<128x288xbf16, #tpu.memory_space<vmem>>, vector<64x32xbf16>,
    %c79 = arith.constant 79 : index
    %c32_27 = arith.constant 32 : index
    %39 = vector.load %arg1[%c79, %c32_27] : memref<160x128xbf16, #tpu.memory_space<vmem>>, vector<64x32xbf16>
    %40 = vector.broadcast %8 : vector<64x1xbf16> to vector<64x32xbf16>
    %41 = arith.mulf %39, %40 : vector<64x32xbf16>
    %c64_28 = arith.constant 64 : index
    %c0_29 = arith.constant 0 : index
    %42 = vector.load %arg7[%c64_28, %c0_29] : memref<128x288xbf16, #tpu.memory_space<vmem>>, vector<64x32xbf16>
    tpu.vector_store %arg7[%c64_28, %c0_29], %41 {strides = array<i32>} : memref<128x288xbf16, #tpu.memory_space<vmem>>, vector<64x32xbf16>,
    %c80 = arith.constant 80 : index
    %c0_30 = arith.constant 0 : index
    %43 = vector.load %arg1[%c80, %c0_30] : memref<160x128xbf16, #tpu.memory_space<vmem>>, vector<64x32xbf16>
    %c64_31 = arith.constant 64 : index
    %c32_32 = arith.constant 32 : index
    %44 = vector.load %arg7[%c64_31, %c32_32] : memref<128x288xbf16, #tpu.memory_space<vmem>>, vector<64x32xbf16>
    tpu.vector_store %arg7[%c64_31, %c32_32], %43 {strides = array<i32>} : memref<128x288xbf16, #tpu.memory_space<vmem>>, vector<64x32xbf16>,
    %c80_33 = arith.constant 80 : index
    %c32_34 = arith.constant 32 : index
    %45 = vector.load %arg1[%c80_33, %c32_34] : memref<160x128xbf16, #tpu.memory_space<vmem>>, vector<64x32xbf16>
    %c64_35 = arith.constant 64 : index
    %c64_36 = arith.constant 64 : index
    %46 = vector.load %arg7[%c64_35, %c64_36] : memref<128x288xbf16, #tpu.memory_space<vmem>>, vector<64x32xbf16>
    tpu.vector_store %arg7[%c64_35, %c64_36], %45 {strides = array<i32>} : memref<128x288xbf16, #tpu.memory_space<vmem>>, vector<64x32xbf16>,
    %c79_37 = arith.constant 79 : index
    %c96_38 = arith.constant 96 : index
    %47 = vector.load %arg1[%c79_37, %c96_38] : memref<160x128xbf16, #tpu.memory_space<vmem>>, vector<64x32xbf16>
    %48 = vector.broadcast %8 : vector<64x1xbf16> to vector<64x32xbf16>
    %49 = arith.mulf %47, %48 : vector<64x32xbf16>
    %c64_39 = arith.constant 64 : index
    %c96_40 = arith.constant 96 : index
    %50 = vector.load %arg7[%c64_39, %c96_40] : memref<128x288xbf16, #tpu.memory_space<vmem>>, vector<64x32xbf16>
    tpu.vector_store %arg7[%c64_39, %c96_40], %49 {strides = array<i32>} : memref<128x288xbf16, #tpu.memory_space<vmem>>, vector<64x32xbf16>,
    %c80_41 = arith.constant 80 : index
    %c64_42 = arith.constant 64 : index
    %51 = vector.load %arg1[%c80_41, %c64_42] : memref<160x128xbf16, #tpu.memory_space<vmem>>, vector<64x32xbf16>
    %c64_43 = arith.constant 64 : index
    %c128_44 = arith.constant 128 : index
    %52 = vector.load %arg7[%c64_43, %c128_44] : memref<128x288xbf16, #tpu.memory_space<vmem>>, vector<64x32xbf16>
    tpu.vector_store %arg7[%c64_43, %c128_44], %51 {strides = array<i32>} : memref<128x288xbf16, #tpu.memory_space<vmem>>, vector<64x32xbf16>,
    %c80_45 = arith.constant 80 : index
    %c96_46 = arith.constant 96 : index
    %53 = vector.load %arg1[%c80_45, %c96_46] : memref<160x128xbf16, #tpu.memory_space<vmem>>, vector<64x32xbf16>
    %c64_47 = arith.constant 64 : index
    %c160_48 = arith.constant 160 : index
    %54 = vector.load %arg7[%c64_47, %c160_48] : memref<128x288xbf16, #tpu.memory_space<vmem>>, vector<64x32xbf16>
    tpu.vector_store %arg7[%c64_47, %c160_48], %53 {strides = array<i32>} : memref<128x288xbf16, #tpu.memory_space<vmem>>, vector<64x32xbf16>,
    %c87 = arith.constant 87 : index
    %c32_49 = arith.constant 32 : index
    %55 = vector.load %arg1[%c87, %c32_49] : memref<160x128xbf16, #tpu.memory_space<vmem>>, vector<64x32xbf16>
    %56 = vector.broadcast %8 : vector<64x1xbf16> to vector<64x32xbf16>
    %57 = arith.mulf %55, %56 : vector<64x32xbf16>
    %c64_50 = arith.constant 64 : index
    %c192_51 = arith.constant 192 : index
    %58 = vector.load %arg7[%c64_50, %c192_51] : memref<128x288xbf16, #tpu.memory_space<vmem>>, vector<64x32xbf16>
    tpu.vector_store %arg7[%c64_50, %c192_51], %57 {strides = array<i32>} : memref<128x288xbf16, #tpu.memory_space<vmem>>, vector<64x32xbf16>,
    %c88 = arith.constant 88 : index
    %c0_52 = arith.constant 0 : index
    %59 = vector.load %arg1[%c88, %c0_52] : memref<160x128xbf16, #tpu.memory_space<vmem>>, vector<64x32xbf16>
    %c64_53 = arith.constant 64 : index
    %c224_54 = arith.constant 224 : index
    %60 = vector.load %arg7[%c64_53, %c224_54] : memref<128x288xbf16, #tpu.memory_space<vmem>>, vector<64x32xbf16>
    tpu.vector_store %arg7[%c64_53, %c224_54], %59 {strides = array<i32>} : memref<128x288xbf16, #tpu.memory_space<vmem>>, vector<64x32xbf16>,
    %c88_55 = arith.constant 88 : index
    %c32_56 = arith.constant 32 : index
    %61 = vector.load %arg1[%c88_55, %c32_56] : memref<160x128xbf16, #tpu.memory_space<vmem>>, vector<64x32xbf16>
    %c64_57 = arith.constant 64 : index
    %c256_58 = arith.constant 256 : index
    %62 = vector.load %arg7[%c64_57, %c256_58] : memref<128x288xbf16, #tpu.memory_space<vmem>>, vector<64x32xbf16>
    tpu.vector_store %arg7[%c64_57, %c256_58], %61 {strides = array<i32>} : memref<128x288xbf16, #tpu.memory_space<vmem>>, vector<64x32xbf16>,
    %c0_59 = arith.constant 0 : index
    %c0_60 = arith.constant 0 : index
    %63 = vector.load %arg3[%c0_59, %c0_60] : memref<3x128xf32, #tpu.memory_space<vmem>>, vector<3x128xf32>
    %c0_61 = arith.constant 0 : index
    %c0_62 = arith.constant 0 : index
    %64 = vector.load %arg7[%c0_61, %c0_62] : memref<128x288xbf16, #tpu.memory_space<vmem>>, vector<128x288xbf16>
    %c0_63 = arith.constant 0 : index
    %c0_64 = arith.constant 0 : index
    %65 = vector.load %arg2[%c0_63, %c0_64] : memref<288x128xbf16, #tpu.memory_space<vmem>>, vector<288x128xbf16>
    %cst_65 = arith.constant dense<0.000000e+00> : vector<128x128xf32>
    %66 = tpu.matmul %64, %65, %cst_65 {dimension_numbers = #tpu.dot_dimension_numbers<[1], [0], [0], [1], [0, 0, 1, 1], [], []>} : vector<128x288xbf16>, vector<288x128xbf16>, vector<128x128xf32> -> vector<128x128xf32>
    %67 = vector.extract_strided_slice %63 {offsets = [0, 0], sizes = [1, 128], strides = [1, 1]} : vector<3x128xf32> to vector<1x128xf32>
    %68 = vector.broadcast %67 : vector<1x128xf32> to vector<128x128xf32>
    %69 = arith.addf %66, %68 : vector<128x128xf32>
    %cst_66 = arith.constant dense<0.000000e+00> : vector<128xf32>
    %70 = vector.multi_reduction <add>, %69, %cst_66 [0] : vector<128x128xf32> to vector<128xf32>
    %71 = vector.shape_cast %70 : vector<128xf32> to vector<1x128xf32>
    %cst_67 = arith.constant 7.812500e-03 : f32
    %72 = vector.broadcast %cst_67 : f32 to vector<1x128xf32>
    %73 = arith.mulf %71, %72 : vector<1x128xf32>
    %74 = vector.broadcast %73 : vector<1x128xf32> to vector<128x128xf32>
    %75 = arith.subf %69, %74 : vector<128x128xf32>
    %76 = arith.mulf %75, %75 : vector<128x128xf32>
    %cst_68 = arith.constant dense<0.000000e+00> : vector<128xf32>
    %77 = vector.multi_reduction <add>, %76, %cst_68 [0] : vector<128x128xf32> to vector<128xf32>
    %78 = vector.shape_cast %77 : vector<128xf32> to vector<1x128xf32>
    %cst_69 = arith.constant 7.812500e-03 : f32
    %79 = vector.broadcast %cst_69 : f32 to vector<1x128xf32>
    %80 = arith.mulf %78, %79 : vector<1x128xf32>
    %81 = vector.extract_strided_slice %63 {offsets = [1, 0], sizes = [1, 128], strides = [1, 1]} : vector<3x128xf32> to vector<1x128xf32>
    %cst_70 = arith.constant 9.99999974E-6 : f32
    %82 = vector.broadcast %cst_70 : f32 to vector<1x128xf32>
    %83 = arith.addf %80, %82 : vector<1x128xf32>
    %84 = math.rsqrt %83 : vector<1x128xf32>
    %85 = arith.mulf %81, %84 : vector<1x128xf32>
    %86 = vector.broadcast %85 : vector<1x128xf32> to vector<128x128xf32>
    %87 = arith.mulf %75, %86 : vector<128x128xf32>
    %88 = vector.extract_strided_slice %63 {offsets = [2, 0], sizes = [1, 128], strides = [1, 1]} : vector<3x128xf32> to vector<1x128xf32>
    %89 = vector.broadcast %88 : vector<1x128xf32> to vector<128x128xf32>
    %90 = arith.addf %87, %89 : vector<128x128xf32>
    %91 = vector.extract_strided_slice %90 {offsets = [0, 0], sizes = [128, 64], strides = [1, 1]} : vector<128x128xf32> to vector<128x64xf32>
    %cst_71 = arith.constant 0.000000e+00 : f32
    %92 = vector.broadcast %cst_71 : f32 to vector<128x64xf32>
    %93 = arith.maximumf %91, %92 : vector<128x64xf32>
    %94 = arith.truncf %93 : vector<128x64xf32> to vector<128x64xbf16>
    %95 = vector.extract_strided_slice %90 {offsets = [0, 64], sizes = [128, 64], strides = [1, 1]} : vector<128x128xf32> to vector<128x64xf32>
    %cst_72 = arith.constant 0.000000e+00 : bf16
    %96 = vector.broadcast %cst_72 : bf16 to vector<16x64xbf16>
    %c0_73 = arith.constant 0 : index
    %c0_74 = arith.constant 0 : index
    %97 = vector.load %arg9[%c0_73, %c0_74] : memref<176x64xbf16, #tpu.memory_space<vmem>>, vector<16x64xbf16>
    tpu.vector_store %arg9[%c0_73, %c0_74], %96 {strides = array<i32>} : memref<176x64xbf16, #tpu.memory_space<vmem>>, vector<16x64xbf16>,
    %98 = vector.extract_strided_slice %94 {offsets = [0, 0], sizes = [64, 64], strides = [1, 1]} : vector<128x64xbf16> to vector<64x64xbf16>
    %c16_75 = arith.constant 16 : index
    %c0_76 = arith.constant 0 : index
    %99 = vector.load %arg9[%c16_75, %c0_76] : memref<176x64xbf16, #tpu.memory_space<vmem>>, vector<64x64xbf16>
    tpu.vector_store %arg9[%c16_75, %c0_76], %98 {strides = array<i32>} : memref<176x64xbf16, #tpu.memory_space<vmem>>, vector<64x64xbf16>,
    %cst_77 = arith.constant 0.000000e+00 : bf16
    %100 = vector.broadcast %cst_77 : bf16 to vector<16x64xbf16>
    %c80_78 = arith.constant 80 : index
    %c0_79 = arith.constant 0 : index
    %101 = vector.load %arg9[%c80_78, %c0_79] : memref<176x64xbf16, #tpu.memory_space<vmem>>, vector<16x64xbf16>
    tpu.vector_store %arg9[%c80_78, %c0_79], %100 {strides = array<i32>} : memref<176x64xbf16, #tpu.memory_space<vmem>>, vector<16x64xbf16>,
    %102 = vector.extract_strided_slice %94 {offsets = [64, 0], sizes = [64, 64], strides = [1, 1]} : vector<128x64xbf16> to vector<64x64xbf16>
    %c96_80 = arith.constant 96 : index
    %c0_81 = arith.constant 0 : index
    %103 = vector.load %arg9[%c96_80, %c0_81] : memref<176x64xbf16, #tpu.memory_space<vmem>>, vector<64x64xbf16>
    tpu.vector_store %arg9[%c96_80, %c0_81], %102 {strides = array<i32>} : memref<176x64xbf16, #tpu.memory_space<vmem>>, vector<64x64xbf16>,
    %cst_82 = arith.constant 0.000000e+00 : bf16
    %104 = vector.broadcast %cst_82 : bf16 to vector<16x64xbf16>
    %c160_83 = arith.constant 160 : index
    %c0_84 = arith.constant 0 : index
    %105 = vector.load %arg9[%c160_83, %c0_84] : memref<176x64xbf16, #tpu.memory_space<vmem>>, vector<16x64xbf16>
    tpu.vector_store %arg9[%c160_83, %c0_84], %104 {strides = array<i32>} : memref<176x64xbf16, #tpu.memory_space<vmem>>, vector<16x64xbf16>,
    %c7_85 = arith.constant 7 : index
    %c0_86 = arith.constant 0 : index
    %106 = vector.load %arg9[%c7_85, %c0_86] : memref<176x64xbf16, #tpu.memory_space<vmem>>, vector<64x64xbf16>
    %107 = vector.broadcast %8 : vector<64x1xbf16> to vector<64x64xbf16>
    %108 = arith.mulf %106, %107 : vector<64x64xbf16>
    %c0_87 = arith.constant 0 : index
    %c0_88 = arith.constant 0 : index
    %109 = vector.load %arg8[%c0_87, %c0_88] : memref<128x576xbf16, #tpu.memory_space<vmem>>, vector<64x64xbf16>
    tpu.vector_store %arg8[%c0_87, %c0_88], %108 {strides = array<i32>} : memref<128x576xbf16, #tpu.memory_space<vmem>>, vector<64x64xbf16>,
    %c8_89 = arith.constant 8 : index
    %c0_90 = arith.constant 0 : index
    %110 = vector.load %arg9[%c8_89, %c0_90] : memref<176x64xbf16, #tpu.memory_space<vmem>>, vector<64x64xbf16>
    %c0_91 = arith.constant 0 : index
    %c64_92 = arith.constant 64 : index
    %111 = vector.load %arg8[%c0_91, %c64_92] : memref<128x576xbf16, #tpu.memory_space<vmem>>, vector<64x64xbf16>
    tpu.vector_store %arg8[%c0_91, %c64_92], %110 {strides = array<i32>} : memref<128x576xbf16, #tpu.memory_space<vmem>>, vector<64x64xbf16>,
    %c9 = arith.constant 9 : index
    %c0_93 = arith.constant 0 : index
    %112 = vector.load %arg9[%c9, %c0_93] : memref<176x64xbf16, #tpu.memory_space<vmem>>, vector<64x64xbf16>
    %113 = vector.broadcast %14 : vector<64x1xbf16> to vector<64x64xbf16>
    %114 = arith.mulf %112, %113 : vector<64x64xbf16>
    %c0_94 = arith.constant 0 : index
    %c128_95 = arith.constant 128 : index
    %115 = vector.load %arg8[%c0_94, %c128_95] : memref<128x576xbf16, #tpu.memory_space<vmem>>, vector<64x64xbf16>
    tpu.vector_store %arg8[%c0_94, %c128_95], %114 {strides = array<i32>} : memref<128x576xbf16, #tpu.memory_space<vmem>>, vector<64x64xbf16>,
    %c15_96 = arith.constant 15 : index
    %c0_97 = arith.constant 0 : index
    %116 = vector.load %arg9[%c15_96, %c0_97] : memref<176x64xbf16, #tpu.memory_space<vmem>>, vector<64x64xbf16>
    %117 = vector.broadcast %8 : vector<64x1xbf16> to vector<64x64xbf16>
    %118 = arith.mulf %116, %117 : vector<64x64xbf16>
    %c0_98 = arith.constant 0 : index
    %c192_99 = arith.constant 192 : index
    %119 = vector.load %arg8[%c0_98, %c192_99] : memref<128x576xbf16, #tpu.memory_space<vmem>>, vector<64x64xbf16>
    tpu.vector_store %arg8[%c0_98, %c192_99], %118 {strides = array<i32>} : memref<128x576xbf16, #tpu.memory_space<vmem>>, vector<64x64xbf16>,
    %c16_100 = arith.constant 16 : index
    %c0_101 = arith.constant 0 : index
    %120 = vector.load %arg9[%c16_100, %c0_101] : memref<176x64xbf16, #tpu.memory_space<vmem>>, vector<64x64xbf16>
    %c0_102 = arith.constant 0 : index
    %c256_103 = arith.constant 256 : index
    %121 = vector.load %arg8[%c0_102, %c256_103] : memref<128x576xbf16, #tpu.memory_space<vmem>>, vector<64x64xbf16>
    tpu.vector_store %arg8[%c0_102, %c256_103], %120 {strides = array<i32>} : memref<128x576xbf16, #tpu.memory_space<vmem>>, vector<64x64xbf16>,
    %c17 = arith.constant 17 : index
    %c0_104 = arith.constant 0 : index
    %122 = vector.load %arg9[%c17, %c0_104] : memref<176x64xbf16, #tpu.memory_space<vmem>>, vector<64x64xbf16>
    %123 = vector.broadcast %14 : vector<64x1xbf16> to vector<64x64xbf16>
    %124 = arith.mulf %122, %123 : vector<64x64xbf16>
    %c0_105 = arith.constant 0 : index
    %c320 = arith.constant 320 : index
    %125 = vector.load %arg8[%c0_105, %c320] : memref<128x576xbf16, #tpu.memory_space<vmem>>, vector<64x64xbf16>
    tpu.vector_store %arg8[%c0_105, %c320], %124 {strides = array<i32>} : memref<128x576xbf16, #tpu.memory_space<vmem>>, vector<64x64xbf16>,
    %c23 = arith.constant 23 : index
    %c0_106 = arith.constant 0 : index
    %126 = vector.load %arg9[%c23, %c0_106] : memref<176x64xbf16, #tpu.memory_space<vmem>>, vector<64x64xbf16>
    %127 = vector.broadcast %8 : vector<64x1xbf16> to vector<64x64xbf16>
    %128 = arith.mulf %126, %127 : vector<64x64xbf16>
    %c0_107 = arith.constant 0 : index
    %c384 = arith.constant 384 : index
    %129 = vector.load %arg8[%c0_107, %c384] : memref<128x576xbf16, #tpu.memory_space<vmem>>, vector<64x64xbf16>
    tpu.vector_store %arg8[%c0_107, %c384], %128 {strides = array<i32>} : memref<128x576xbf16, #tpu.memory_space<vmem>>, vector<64x64xbf16>,
    %c24 = arith.constant 24 : index
    %c0_108 = arith.constant 0 : index
    %130 = vector.load %arg9[%c24, %c0_108] : memref<176x64xbf16, #tpu.memory_space<vmem>>, vector<64x64xbf16>
    %c0_109 = arith.constant 0 : index
    %c448 = arith.constant 448 : index
    %131 = vector.load %arg8[%c0_109, %c448] : memref<128x576xbf16, #tpu.memory_space<vmem>>, vector<64x64xbf16>
    tpu.vector_store %arg8[%c0_109, %c448], %130 {strides = array<i32>} : memref<128x576xbf16, #tpu.memory_space<vmem>>, vector<64x64xbf16>,
    %c25 = arith.constant 25 : index
    %c0_110 = arith.constant 0 : index
    %132 = vector.load %arg9[%c25, %c0_110] : memref<176x64xbf16, #tpu.memory_space<vmem>>, vector<64x64xbf16>
    %133 = vector.broadcast %14 : vector<64x1xbf16> to vector<64x64xbf16>
    %134 = arith.mulf %132, %133 : vector<64x64xbf16>
    %c0_111 = arith.constant 0 : index
    %c512 = arith.constant 512 : index
    %135 = vector.load %arg8[%c0_111, %c512] : memref<128x576xbf16, #tpu.memory_space<vmem>>, vector<64x64xbf16>
    tpu.vector_store %arg8[%c0_111, %c512], %134 {strides = array<i32>} : memref<128x576xbf16, #tpu.memory_space<vmem>>, vector<64x64xbf16>,
    %c87_112 = arith.constant 87 : index
    %c0_113 = arith.constant 0 : index
    %136 = vector.load %arg9[%c87_112, %c0_113] : memref<176x64xbf16, #tpu.memory_space<vmem>>, vector<64x64xbf16>
    %137 = vector.broadcast %8 : vector<64x1xbf16> to vector<64x64xbf16>
    %138 = arith.mulf %136, %137 : vector<64x64xbf16>
    %c64_114 = arith.constant 64 : index
    %c0_115 = arith.constant 0 : index
    %139 = vector.load %arg8[%c64_114, %c0_115] : memref<128x576xbf16, #tpu.memory_space<vmem>>, vector<64x64xbf16>
    tpu.vector_store %arg8[%c64_114, %c0_115], %138 {strides = array<i32>} : memref<128x576xbf16, #tpu.memory_space<vmem>>, vector<64x64xbf16>,
    %c88_116 = arith.constant 88 : index
    %c0_117 = arith.constant 0 : index
    %140 = vector.load %arg9[%c88_116, %c0_117] : memref<176x64xbf16, #tpu.memory_space<vmem>>, vector<64x64xbf16>
    %c64_118 = arith.constant 64 : index
    %c64_119 = arith.constant 64 : index
    %141 = vector.load %arg8[%c64_118, %c64_119] : memref<128x576xbf16, #tpu.memory_space<vmem>>, vector<64x64xbf16>
    tpu.vector_store %arg8[%c64_118, %c64_119], %140 {strides = array<i32>} : memref<128x576xbf16, #tpu.memory_space<vmem>>, vector<64x64xbf16>,
    %c89 = arith.constant 89 : index
    %c0_120 = arith.constant 0 : index
    %142 = vector.load %arg9[%c89, %c0_120] : memref<176x64xbf16, #tpu.memory_space<vmem>>, vector<64x64xbf16>
    %143 = vector.broadcast %14 : vector<64x1xbf16> to vector<64x64xbf16>
    %144 = arith.mulf %142, %143 : vector<64x64xbf16>
    %c64_121 = arith.constant 64 : index
    %c128_122 = arith.constant 128 : index
    %145 = vector.load %arg8[%c64_121, %c128_122] : memref<128x576xbf16, #tpu.memory_space<vmem>>, vector<64x64xbf16>
    tpu.vector_store %arg8[%c64_121, %c128_122], %144 {strides = array<i32>} : memref<128x576xbf16, #tpu.memory_space<vmem>>, vector<64x64xbf16>,
    %c95 = arith.constant 95 : index
    %c0_123 = arith.constant 0 : index
    %146 = vector.load %arg9[%c95, %c0_123] : memref<176x64xbf16, #tpu.memory_space<vmem>>, vector<64x64xbf16>
    %147 = vector.broadcast %8 : vector<64x1xbf16> to vector<64x64xbf16>
    %148 = arith.mulf %146, %147 : vector<64x64xbf16>
    %c64_124 = arith.constant 64 : index
    %c192_125 = arith.constant 192 : index
    %149 = vector.load %arg8[%c64_124, %c192_125] : memref<128x576xbf16, #tpu.memory_space<vmem>>, vector<64x64xbf16>
    tpu.vector_store %arg8[%c64_124, %c192_125], %148 {strides = array<i32>} : memref<128x576xbf16, #tpu.memory_space<vmem>>, vector<64x64xbf16>,
    %c96_126 = arith.constant 96 : index
    %c0_127 = arith.constant 0 : index
    %150 = vector.load %arg9[%c96_126, %c0_127] : memref<176x64xbf16, #tpu.memory_space<vmem>>, vector<64x64xbf16>
    %c64_128 = arith.constant 64 : index
    %c256_129 = arith.constant 256 : index
    %151 = vector.load %arg8[%c64_128, %c256_129] : memref<128x576xbf16, #tpu.memory_space<vmem>>, vector<64x64xbf16>
    tpu.vector_store %arg8[%c64_128, %c256_129], %150 {strides = array<i32>} : memref<128x576xbf16, #tpu.memory_space<vmem>>, vector<64x64xbf16>,
    %c97 = arith.constant 97 : index
    %c0_130 = arith.constant 0 : index
    %152 = vector.load %arg9[%c97, %c0_130] : memref<176x64xbf16, #tpu.memory_space<vmem>>, vector<64x64xbf16>
    %153 = vector.broadcast %14 : vector<64x1xbf16> to vector<64x64xbf16>
    %154 = arith.mulf %152, %153 : vector<64x64xbf16>
    %c64_131 = arith.constant 64 : index
    %c320_132 = arith.constant 320 : index
    %155 = vector.load %arg8[%c64_131, %c320_132] : memref<128x576xbf16, #tpu.memory_space<vmem>>, vector<64x64xbf16>
    tpu.vector_store %arg8[%c64_131, %c320_132], %154 {strides = array<i32>} : memref<128x576xbf16, #tpu.memory_space<vmem>>, vector<64x64xbf16>,
    %c103 = arith.constant 103 : index
    %c0_133 = arith.constant 0 : index
    %156 = vector.load %arg9[%c103, %c0_133] : memref<176x64xbf16, #tpu.memory_space<vmem>>, vector<64x64xbf16>
    %157 = vector.broadcast %8 : vector<64x1xbf16> to vector<64x64xbf16>
    %158 = arith.mulf %156, %157 : vector<64x64xbf16>
    %c64_134 = arith.constant 64 : index
    %c384_135 = arith.constant 384 : index
    %159 = vector.load %arg8[%c64_134, %c384_135] : memref<128x576xbf16, #tpu.memory_space<vmem>>, vector<64x64xbf16>
    tpu.vector_store %arg8[%c64_134, %c384_135], %158 {strides = array<i32>} : memref<128x576xbf16, #tpu.memory_space<vmem>>, vector<64x64xbf16>,
    %c104 = arith.constant 104 : index
    %c0_136 = arith.constant 0 : index
    %160 = vector.load %arg9[%c104, %c0_136] : memref<176x64xbf16, #tpu.memory_space<vmem>>, vector<64x64xbf16>
    %c64_137 = arith.constant 64 : index
    %c448_138 = arith.constant 448 : index
    %161 = vector.load %arg8[%c64_137, %c448_138] : memref<128x576xbf16, #tpu.memory_space<vmem>>, vector<64x64xbf16>
    tpu.vector_store %arg8[%c64_137, %c448_138], %160 {strides = array<i32>} : memref<128x576xbf16, #tpu.memory_space<vmem>>, vector<64x64xbf16>,
    %c105 = arith.constant 105 : index
    %c0_139 = arith.constant 0 : index
    %162 = vector.load %arg9[%c105, %c0_139] : memref<176x64xbf16, #tpu.memory_space<vmem>>, vector<64x64xbf16>
    %163 = vector.broadcast %14 : vector<64x1xbf16> to vector<64x64xbf16>
    %164 = arith.mulf %162, %163 : vector<64x64xbf16>
    %c64_140 = arith.constant 64 : index
    %c512_141 = arith.constant 512 : index
    %165 = vector.load %arg8[%c64_140, %c512_141] : memref<128x576xbf16, #tpu.memory_space<vmem>>, vector<64x64xbf16>
    tpu.vector_store %arg8[%c64_140, %c512_141], %164 {strides = array<i32>} : memref<128x576xbf16, #tpu.memory_space<vmem>>, vector<64x64xbf16>,
    %c0_142 = arith.constant 0 : index
    %c0_143 = arith.constant 0 : index
    %166 = vector.load %arg5[%c0_142, %c0_143] : memref<3x64xf32, #tpu.memory_space<vmem>>, vector<3x64xf32>
    %c0_144 = arith.constant 0 : index
    %c0_145 = arith.constant 0 : index
    %167 = vector.load %arg8[%c0_144, %c0_145] : memref<128x576xbf16, #tpu.memory_space<vmem>>, vector<128x576xbf16>
    %c0_146 = arith.constant 0 : index
    %c0_147 = arith.constant 0 : index
    %168 = vector.load %arg4[%c0_146, %c0_147] : memref<576x64xbf16, #tpu.memory_space<vmem>>, vector<576x64xbf16>
    %cst_148 = arith.constant dense<0.000000e+00> : vector<128x64xf32>
    %169 = tpu.matmul %167, %168, %cst_148 {dimension_numbers = #tpu.dot_dimension_numbers<[1], [0], [0], [1], [0, 0, 1, 1], [], []>} : vector<128x576xbf16>, vector<576x64xbf16>, vector<128x64xf32> -> vector<128x64xf32>
    %170 = vector.extract_strided_slice %166 {offsets = [0, 0], sizes = [1, 64], strides = [1, 1]} : vector<3x64xf32> to vector<1x64xf32>
    %171 = vector.broadcast %170 : vector<1x64xf32> to vector<128x64xf32>
    %172 = arith.addf %169, %171 : vector<128x64xf32>
    %cst_149 = arith.constant dense<0.000000e+00> : vector<64xf32>
    %173 = vector.multi_reduction <add>, %172, %cst_149 [0] : vector<128x64xf32> to vector<64xf32>
    %174 = vector.shape_cast %173 : vector<64xf32> to vector<1x64xf32>
    %cst_150 = arith.constant 7.812500e-03 : f32
    %175 = vector.broadcast %cst_150 : f32 to vector<1x64xf32>
    %176 = arith.mulf %174, %175 : vector<1x64xf32>
    %177 = vector.broadcast %176 : vector<1x64xf32> to vector<128x64xf32>
    %178 = arith.subf %172, %177 : vector<128x64xf32>
    %179 = arith.mulf %178, %178 : vector<128x64xf32>
    %cst_151 = arith.constant dense<0.000000e+00> : vector<64xf32>
    %180 = vector.multi_reduction <add>, %179, %cst_151 [0] : vector<128x64xf32> to vector<64xf32>
    %181 = vector.shape_cast %180 : vector<64xf32> to vector<1x64xf32>
    %cst_152 = arith.constant 7.812500e-03 : f32
    %182 = vector.broadcast %cst_152 : f32 to vector<1x64xf32>
    %183 = arith.mulf %181, %182 : vector<1x64xf32>
    %184 = vector.extract_strided_slice %166 {offsets = [1, 0], sizes = [1, 64], strides = [1, 1]} : vector<3x64xf32> to vector<1x64xf32>
    %cst_153 = arith.constant 9.99999974E-6 : f32
    %185 = vector.broadcast %cst_153 : f32 to vector<1x64xf32>
    %186 = arith.addf %183, %185 : vector<1x64xf32>
    %187 = math.rsqrt %186 : vector<1x64xf32>
    %188 = arith.mulf %184, %187 : vector<1x64xf32>
    %189 = vector.broadcast %188 : vector<1x64xf32> to vector<128x64xf32>
    %190 = arith.mulf %178, %189 : vector<128x64xf32>
    %191 = vector.extract_strided_slice %166 {offsets = [2, 0], sizes = [1, 64], strides = [1, 1]} : vector<3x64xf32> to vector<1x64xf32>
    %192 = vector.broadcast %191 : vector<1x64xf32> to vector<128x64xf32>
    %193 = arith.addf %190, %192 : vector<128x64xf32>
    %194 = arith.addf %193, %95 : vector<128x64xf32>
    %cst_154 = arith.constant 0.000000e+00 : f32
    %195 = vector.broadcast %cst_154 : f32 to vector<128x64xf32>
    %196 = arith.maximumf %194, %195 : vector<128x64xf32>
    %c0_155 = arith.constant 0 : index
    %c0_156 = arith.constant 0 : index
    %197 = vector.load %arg6[%c0_155, %c0_156] : memref<128x64xf32, #tpu.memory_space<vmem>>, vector<128x64xf32>
    tpu.vector_store %arg6[%c0_155, %c0_156], %196 {strides = array<i32>} : memref<128x64xf32, #tpu.memory_space<vmem>>, vector<128x64xf32>,
    return
  }
  func.func @transform_0(%arg0: i32) -> (i32, i32) {
    %c0_i32 = arith.constant 0 : i32
    %c0_i32_0 = arith.constant 0 : i32
    %c0_i32_1 = arith.constant 0 : i32
    return %c0_i32, %c0_i32_0 : i32, i32
  }
  func.func @transform_1(%arg0: i32) -> (i32, i32) {
    %c0_i32 = arith.constant 0 : i32
    %c0_i32_0 = arith.constant 0 : i32
    %c0_i32_1 = arith.constant 0 : i32
    return %c0_i32, %c0_i32_0 : i32, i32
  }
  func.func @transform_2(%arg0: i32) -> (i32, i32) {
    %c0_i32 = arith.constant 0 : i32
    %c0_i32_0 = arith.constant 0 : i32
    %c0_i32_1 = arith.constant 0 : i32
    return %c0_i32, %c0_i32_0 : i32, i32
  }
  func.func @transform_3(%arg0: i32) -> (i32, i32) {
    %c0_i32 = arith.constant 0 : i32
    %c0_i32_0 = arith.constant 0 : i32
    %c0_i32_1 = arith.constant 0 : i32
    return %c0_i32, %c0_i32_0 : i32, i32
  }
  func.func @transform_4(%arg0: i32) -> (i32, i32) {
    %c0_i32 = arith.constant 0 : i32
    %c0_i32_0 = arith.constant 0 : i32
    %c0_i32_1 = arith.constant 0 : i32
    return %c0_i32, %c0_i32_0 : i32, i32
  }
  func.func @transform_5(%arg0: i32) -> (i32, i32) {
    %c0_i32 = arith.constant 0 : i32
    %c0_i32_0 = arith.constant 0 : i32
    %c0_i32_1 = arith.constant 0 : i32
    return %c0_i32, %c0_i32_0 : i32, i32
  }
}

</mosaic_0001>

<bundles_post_ra>
// kernel: residual_block_forward.1
= control target key start
LH: loop header
LB: loop body
LE: loop exit
PB: predicated region body
PF: predicated region fallthrough
CT: control target
= control target key end

     0   :  { %v22_v1 = vlaneseq  ;;  %s5809_s20 = smov 64   ;;  %s5810_s25 = smov 32   ;;  %v5811_v15 = vmov 0.0   ;;  %v5812_v17 = vmov 839922192   ;;  %vm351_vm14 = vcmask 257024   ;;  %s8736_s0 = inlined_call_operand.vmem [shape: bf16[160,128], index: 0, kind: input, shape index: {}]   ;;  %s8737_s1 = inlined_call_operand.vmem [shape: bf16[288,128], index: 1, kind: input, shape index: {}]   ;;  %s8738_s2 = inlined_call_operand.vmem [shape: f32[3,128], index: 2, kind: input, shape index: {}]   ;;  %s8739_s3 = inlined_call_operand.vmem [shape: bf16[576,64], index: 3, kind: input, shape index: {}]   ;;  %s8740_s4 = inlined_call_operand.vmem [shape: f32[3,64], index: 4, kind: input, shape index: {}]   ;;  %s8741_s5 = inlined_call_operand.hbm [shape: f32[128,64], index: 5, kind: output, shape index: {}]  }
   0x1   :  { %v569_v0 = vld [vmem:[%s8736_s0 + $0x4] sm:$0xf]  ;;  %v570_v3 = vld [vmem:[%s8736_s0 + $0x8] sm:$0xf]  ;;  %v93_v18 = vunpack.c.l.s4 %v5812_v17  ;;  %v5813_v19 = vmov 1985246804  }
   0x2   :  { %585 = vrot.lane.b32.xlu1 %v569_v0, %s5809_s20  ;;  %v360_v2 = vld [vmem:[%s8736_s0 + $0x4] sm:$0xf]  ;;  %v5863_v5 = vshrl.u32 %v22_v1, 7  ;;  %v361_v10 = vld [vmem:[%s8736_s0 + $0x8] sm:$0xf]  ;;  %v100_v20 = vunpack.c.l.s4 %v5813_v19  ;;  %v5658_v21 = vld [vmem:[%s8737_s1 + $0x78] sm:$0xff]  }
   0x3   :  { %376 = vrot.lane.b32.xlu0 %v360_v2, %s5810_s25  ;;  %v617_v4 = vld [vmem:[%s8736_s0 + $0x4] sm:$0xf]  ;;  %v5659_v22 = vld [vmem:[%s8737_s1 + $0x38] sm:$0xff]   ;;  %v618_v23 = vld [vmem:[%s8736_s0 + $0x8] sm:$0xf]  ;;  %v94_v27 = vunpack.c.0.s8 %v93_v18  ;;  %5390 = vmatprep.subr.bf16.mxu0 %v5658_v21  ;;  %s5814_s19 = smov 96  }
   0x4   :  { %8785 = vst [vmem:[#allocation8_spill] sm:$0xff] %v5863_v5  ;;  %v5867_v6 = vadd.s32 8, %v5863_v5  ;;  %v5870_v7 = vadd.s32 16, %v5863_v5  ;;  %v5873_v8 = vadd.s32 24, %v5863_v5  ;;  %v8748_v9 = vand.u32 7, %v5863_v5  ;;  %v5660_v28 = vld [vmem:[%s8737_s1 + $0x70] sm:$0xff]   ;;  %5391 = vmatpush3.bf16.msra.mxu0 %v5659_v22 }
   0x5   :  { %v409_v11 = vld [vmem:[%s8736_s0 + $0x4] sm:$0xf]  ;;  %v791_v29 = vld [vmem:[%s8736_s0 + $0x8] sm:$0xf]  ;;  %v101_v32 = vunpack.c.0.s8 %v100_v20  ;;  %v5916_v33 = vsub.s32 %v94_v27, %v5863_v5  ;;  %v5919_v34 = vadd.s32 32, %v5863_v5  ;;  %v5922_v35 = vadd.s32 40, %v5863_v5  ;;  %5392 = vmatprep.subr.bf16.mxu0 %v5660_v28 }
   0x6   :  { %587 = vrot.lane.b32.xlu1 %v570_v3, %s5809_s20  ;;  %v8747_v12 = vand.u32 7, %v5867_v6  ;;  %v8745_v13 = vand.u32 7, %v5870_v7  ;;  %v8744_v14 = vand.u32 7, %v5873_v8  ;;  %vm39_vm0 = vcmp.ne.s32.totalorder %v8748_v9, 0  ;;  %v410_v37 = vld [vmem:[%s8736_s0 + $0x8] sm:$0xf] }
   0x7   :  { %633 = vrot.lane.b32.xlu0 %v617_v4, %s5809_s20  ;;  %v47_v16 = vsel %vm39_vm0, 1.0, %v5811_v15  ;;  %v5926_v36 = vsub.s32 %v101_v32, %v5863_v5  ;;  %v8743_v40 = vand.u32 7, %v5919_v34  ;;  %v8742_v41 = vand.u32 7, %v5922_v35  ;;  %v571_v42 = vld [vmem:[%s8736_s0 + $0xc] sm:$0xf]  ;;  %v5661_v62 = vld [vmem:[%s8737_s1 + $0x30] sm:$0xff]  }
   0x8   :  { %vm40_vm1 = vcmp.ne.s32.totalorder %v8747_v12, 0  ;;  %vm41_vm2 = vcmp.ne.s32.totalorder %v8745_v13, 0  ;;  %vm42_vm3 = vcmp.ne.s32.totalorder %v8744_v14, 0  ;;  %vm148_vm4 = vsmask.f32 3328  ;;  %v5662_v4 = vld [vmem:[%s8737_s1 + $0x68] sm:$0xff]   ;;  %5393 = vmatpush3.bf16.msra.mxu0 %v5661_v62 }
   0x9   :  { %v48_v24 = vsel %vm40_vm1, 1.0, %v5811_v15  ;;  %v49_v25 = vsel %vm41_vm2, 1.0, %v5811_v15  ;;  %v50_v26 = vsel %vm42_vm3, 1.0, %v5811_v15  ;;  %vm149_vm5 = vsmask.f32 7440  ;;  %5394 = vmatprep.subr.bf16.mxu0 %v5662_v4 }
   0xa   :  { %378 = vrot.lane.b32.xlu1 %v361_v10, %s5810_s25  ;;  %v55_v30 = vpack.c.bf16 %v48_v24, %v47_v16  ;;  %v56_v31 = vpack.c.bf16 %v50_v26, %v49_v25  ;;  %v79_v48 = vld [vmem:[%s8736_s0] sm:$0x8]  ;;  %vm43_vm6 = vcmp.ne.s32.totalorder %v8743_v40, 0  ;;  %v665_v51 = vld [vmem:[%s8736_s0 + $0x4] sm:$0x8]  ;;  %vm44_vm7 = vcmp.ne.s32.totalorder %v8742_v41, 0  ;;  %vm5977_vm8 = vmor %vm148_vm4, %vm149_vm5 }
   0xb   :  { %425 = vrot.lane.b32.xlu0 %v409_v11, %s5810_s25  ;;  %v51_v52 = vsel %vm43_vm6, 1.0, %v5811_v15  ;;  %v792_v53 = vld [vmem:[%s8736_s0 + $0xc] sm:$0xf]  ;;  %v52_v57 = vsel %vm44_vm7, 1.0, %v5811_v15  ;;  %v572_v63 = vld [vmem:[%s8736_s0 + $0x10] sm:$0xf] }
   0xc   :  { %v98_v38 = vrot.slane %v55_v30, %v5916_v33  ;;  %v112_v39 = vrot.slane %v56_v31, %v5916_v33  ;;  %v105_v43 = vrot.slane %v55_v30, %v5926_v36  ;;  %v119_v44 = vrot.slane %v56_v31, %v5926_v36  ;;  %v666_v16 = vld [vmem:[%s8736_s0 + $0x8] sm:$0xf]  ;;  %v667_v17 = vld [vmem:[%s8736_s0 + $0xc] sm:$0xf]  ;;  %v80_v22 = vld [vmem:[%s8736_s0 + $0x4] sm:$0xf] }
   0xd   :  { %v5960_v60 = vpack.c.bf16 %v52_v57, %v51_v52  ;;  %v81_v26 = vld [vmem:[%s8736_s0 + $0x8] sm:$0xf]  ;;  %vm248_vm9 = vsmask.f32 256  ;;  %vm249_vm10 = vsmask.f32 4368 }
   0xe   :  { %635 = vrot.lane.b32.xlu1 %v618_v23, %s5809_s20  ;;  %v152_v45 = vshll.u32 %v98_v38, 16  ;;  %v155_v46 = vshrl.u32 %v98_v38, 16  ;;  %v171_v47 = vshll.u32 %v112_v39, 16  ;;  %v161_v49 = vshll.u32 %v105_v43, 16  ;;  %v5663_v30 = vld [vmem:[%s8737_s1 + $0x28] sm:$0xff]   ;;  %vm6039_vm11 = vmor %vm248_vm9, %vm249_vm10 }
   0xf   :  { %807 = vrot.lane.b32.xlu0 %v791_v29, %s5814_s19  ;;  %v165_v50 = vshrl.u32 %v105_v43, 16  ;;  %v175_v61 = vshrl.u32 %v112_v39, 16  ;;  %v181_v3 = vshll.u32 %v119_v44, 16  ;;  %v5989_v18 = vrot.slane %v5960_v60, %v5916_v33  ;;  %5395 = vmatpush3.bf16.msra.mxu0 %v5663_v30  ;;  %v5669_v30 = vld [vmem:[%s8737_s1 + $0x10] sm:$0xff]  }
  0x10   :  { %v5957_v54 = vrot.slane %v152_v45, 5  ;;  %v157_v55 = vrot.slane %v155_v46, 4  ;;  %v173_v56 = vrot.slane %v171_v47, 5  ;;  %v163_v58 = vrot.slane %v161_v49, 5  ;;  %v5666_v49 = vld [vmem:[%s8737_s1 + $0x58] sm:$0xff]  }
  0x11   :  { %v167_v59 = vrot.slane %v165_v50, 4  ;;  %v177_v19 = vrot.slane %v175_v61, 4  ;;  %v185_v20 = vshrl.u32 %v119_v44, 16  ;;  %v183_v24 = vrot.slane %v181_v3, 5  ;;  %v5665_v44 = vld [vmem:[%s8737_s1 + $0x20] sm:$0xff]  }
  0x12   :  { %427 = vrot.lane.b32.xlu1 %v410_v37, %s5810_s25  ;;  %8786 = vst [vmem:[#allocation9_spill] sm:$0xff] %v5957_v54  ;;  %v158_v0 = vor.u32 %v157_v55, %v5957_v54  ;;  %v239_v1 = vmul.bf16 %v5957_v54, %v79_v48  ;;  %v674_v2 = vmul.bf16 %v665_v51, %v5957_v54  ;;  %v191_v29 = vshll.u32 %v5989_v18, 16  ;;  %v5664_v37 = vld [vmem:[%s8737_s1 + $0x60] sm:$0xff]  }
  0x13   :  { %589 = vrot.lane.b32.xlu0 %v571_v42, %s5809_s20  ;;  %v168_v11 = vor.u32 %v167_v59, %v163_v58  ;;  %v178_v27 = vor.u32 %v177_v19, %v173_v56  ;;  %v187_v28 = vrot.slane %v185_v20, 4  ;;  %5396 = vmatprep.subr.bf16.mxu0 %v5664_v37  ;;  %vm400_vm15 = vcmask 519424  }
  0x14   :  { %v159_v21 = vrot.slane %v158_v0, 4  ;;  %v252_v23 = vshrl.u32 %v239_v1, 16  ;;  %v6005_v32 = vshrl.u32 %v674_v2, 16  ;;  %v6028_v55 = vrot.slane %v191_v29, 5  ;;  %5397 = vmatpush3.bf16.msra.mxu0 %v5665_v44  ;;  %v5667_v1 = vld [vmem:[%s8737_s1 + $0x18] sm:$0xff]  }
  0x15   :  { %v169_v25 = vrot.slane %v168_v11, 4  ;;  %v179_v43 = vrot.slane %v178_v27, 4  ;;  %v188_v48 = vor.u32 %v187_v28, %v183_v24  ;;  %5398 = vmatprep.subr.bf16.mxu0 %v5666_v49  ;;  %v669_v49 = vld [vmem:[%s8736_s0 + $0x14] sm:$0xf] }
  0x16   :  { %809 = vrot.lane.b32.xlu1 %v792_v53, %s5814_s19  ;;  %v6003_v31 = vsel %vm5977_vm8, %v159_v21, %v163_v58  ;;  %v5212_v46 = vrot.slane %v252_v23, 11  ;;  %v82_v53 = vld [vmem:[%s8736_s0 + $0xc] sm:$0xf]  ;;  %v5214_v28 = vrot.slane %v6005_v32, 11  ;;  %v6075_v32 = vadd.s32 48, %v5863_v5 }
  0x17   :  { %8789 = vst [vmem:[#allocation10_spill] sm:$0xff] %v6003_v31  ;;  %v6013_v38 = vsel %vm5977_vm8, %v169_v25, %v173_v56  ;;  %v675_v39 = vmul.bf16 %v666_v16, %v6003_v31  ;;  %v240_v42 = vmul.bf16 %v6003_v31, %v80_v22  ;;  %v189_v0 = vrot.slane %v188_v48, 4  ;;  %v83_v16 = vld [vmem:[%s8736_s0 + $0x10] sm:$0xf]  ;;  %v5670_v48 = vld [vmem:[%s8737_s1 + $0x48] sm:$0xff]  }
  0x18   :  { %v676_v45 = vmul.bf16 %v667_v17, %v6013_v38  ;;  %v241_v47 = vmul.bf16 %v6013_v38, %v81_v26  ;;  %v5668_v26 = vld [vmem:[%s8737_s1 + $0x50] sm:$0xff]   ;;  %5399 = vmatpush3.bf16.msra.mxu0 %v5667_v1 }
  0x19   :  { %v689_v50 = vshrl.u32 %v675_v39, 16  ;;  %v257_v51 = vshrl.u32 %v240_v42, 16  ;;  %v260_v52 = vshll.u32 %v240_v42, 16  ;;  %v692_v11 = vshll.u32 %v675_v39, 16  ;;  %5400 = vmatprep.subr.bf16.mxu0 %v5668_v26 }
  0x1a   :  { %591 = vrot.lane.b32.xlu1 %v572_v63, %s5809_s20  ;;  %v698_v56 = vshrl.u32 %v676_v45, 16  ;;  %v701_v57 = vshll.u32 %v676_v45, 16  ;;  %v266_v58 = vshrl.u32 %v241_v47, 16  ;;  %v269_v59 = vshll.u32 %v241_v47, 16 }
  0x1b   :  { %v691_v61 = vrot.slane %v689_v50, 7  ;;  %v259_v62 = vrot.slane %v257_v51, 7  ;;  %v6032_v63 = vsel %vm5977_vm8, %v179_v43, %v183_v24  ;;  %v6056_v24 = vsel %vm5977_vm8, %v189_v0, %v6028_v55  ;;  %v668_v43 = vld [vmem:[%s8736_s0 + $0x10] sm:$0xf] }
  0x1c   :  { %v6043_v3 = vrot.slane %v698_v56, 7  ;;  %v6045_v4 = vrot.slane %v266_v58, 7  ;;  %v242_v17 = vmul.bf16 %v6032_v63, %v82_v53  ;;  %v243_v29 = vmul.bf16 %v6056_v24, %v83_v16  ;;  %5401 = vmatpush3.bf16.msra.mxu0 %v5669_v30  ;;  %v5671_v53 = vld [vmem:[%s8737_s1 + $0x8] sm:$0xff]  }
  0x1d   :  { %v696_v19 = vrot.slane %v691_v61, 4  ;;  %v262_v20 = vor.u32 %v260_v52, %v259_v62  ;;  %v264_v21 = vrot.slane %v259_v62, 4  ;;  %v694_v39 = vor.u32 %v692_v11, %v691_v61  ;;  %5402 = vmatprep.subr.bf16.mxu0 %v5670_v48 }
  0x1e   :  { %v703_v22 = vor.u32 %v701_v57, %v6043_v3  ;;  %v271_v23 = vor.u32 %v269_v59, %v6045_v4  ;;  %v275_v25 = vshrl.u32 %v242_v17, 16  ;;  %v284_v45 = vshrl.u32 %v243_v29, 16 }
  0x1f   :  { %v263_v27 = vsel %vm6039_vm11, %v5212_v46, %v262_v20  ;;  %v287_v46 = vshll.u32 %v243_v29, 16  ;;  %v278_v47 = vshll.u32 %v242_v17, 16  ;;  %v6089_v52 = vmul.bf16 %v668_v43, %v6032_v63  ;;  %v5672_v20 = vld [vmem:[%s8737_s1 + $0x40] sm:$0xff]   ;;  %v84_v43 = vld [vmem:[%s8736_s0 + $0x14] sm:$0xf] }
  0x20   :  { %v704_v37 = vsel %vm6039_vm11, %v696_v19, %v703_v22  ;;  %327 = vrot.lane.b32.xlu0 %v263_v27, %s5814_s19  ;;  %v277_v42 = vrot.slane %v275_v25, 7  ;;  %v272_v44 = vsel %vm6039_vm11, %v264_v21, %v271_v23  ;;  %v6086_v51 = vrot.slane %v284_v45, 7  ;;  %5403 = vmatpush3.bf16.msra.mxu0 %v5671_v53 }
  0x21   :  { %761 = vrot.lane.b32.xlu1 %v704_v37, %s5810_s25  ;;  %v695_v56 = vsel %vm6039_vm11, %v5214_v28, %v694_v39  ;;  %v6098_v57 = vadd.s32 56, %v5863_v5  ;;  %v37_v58 = vand.u32 7, %v6075_v32  ;;  %v133_v59 = vrot.slane %v5960_v60, %v5926_v36  ;;  %v363_v60 = vld [vmem:[%s8736_s0 + $0x10] sm:$0xf]  ;;  %5404 = vmatprep.subr.bf16.mxu0 %v5672_v20  ;;  %v5673_v28 = vld [vmem:[%s8737_s1] sm:$0xff]  }
  0x22   :  { %v282_v50 = vrot.slane %v277_v42, 4  ;;  %v289_v61 = vor.u32 %v287_v46, %v6086_v51  ;;  %v273_v62 = vrot.slane %v6045_v4, 4  ;;  %v280_v0 = vor.u32 %v278_v47, %v277_v42  ;;  %v362_v39 = vld [vmem:[%s8736_s0 + $0xc] sm:$0xf]  ;;  %v620_v42 = vld [vmem:[%s8736_s0 + $0x10] sm:$0xf] }
  0x23   :  { %v678_v1 = vmul.bf16 %v669_v49, %v6056_v24  ;;  %v38_v11 = vand.u32 7, %v6098_v57  ;;  %vm45_vm12 = vcmp.ne.s32.totalorder %v37_v58, 0  ;;  %v195_v16 = vshrl.u32 %v5989_v18, 16 }
  0x24   :  { %329 = vrot.lane.b32.xlu0 %v272_v44, %s5814_s19  ;;  %v201_v17 = vshll.u32 %v133_v59, 16  ;;  %v290_v19 = vsel %vm6039_vm11, %v282_v50, %v289_v61  ;;  %v53_v4 = vsel %vm45_vm12, 1.0, %v5811_v15  ;;  %v205_v22 = vshrl.u32 %v133_v59, 16  ;;  %5405 = vmatpush3.bf16.msra.mxu0 %v5673_v28 }
  0x25   :  { %333 = vrot.lane.b32.xlu1 %v290_v19, %s5814_s19  ;;  %vm46_vm13 = vcmp.ne.s32.totalorder %v38_v11, 0  ;;  %v197_v18 = vrot.slane %v195_v16, 4  ;;  %v281_v23 = vsel %vm6039_vm11, %v273_v62, %v280_v0  ;;  %v707_v25 = vshrl.u32 %v6089_v52, 16  ;;  %v85_v62 = vld [vmem:[%s8736_s0 + $0x18] sm:$0xf] }
  0x26   :  { %v203_v21 = vrot.slane %v201_v17, 5  ;;  %v716_v26 = vshrl.u32 %v678_v1, 16  ;;  %v54_v27 = vsel %vm46_vm13, 1.0, %v5811_v15  ;;  %v207_v37 = vrot.slane %v205_v22, 4 }
  0x27   :  { %v58_v29 = vpack.c.bf16 %v54_v27, %v53_v4  ;;  %v198_v30 = vor.u32 %v197_v18, %v6028_v55  ;;  %v709_v46 = vrot.slane %v707_v25, 7  ;;  %v719_v48 = vshll.u32 %v678_v1, 16  ;;  %v412_v1 = vld [vmem:[%s8736_s0 + $0x10] sm:$0xf] }
  0x28   :  { %759 = vrot.lane.b32.xlu0 %v695_v56, %s5810_s25  ;;  %v208_v45 = vor.u32 %v207_v37, %v203_v21  ;;  %v6143_v47 = vrot.slane %v716_v26, 7  ;;  %v619_v56 = vld [vmem:[%s8736_s0 + $0xc] sm:$0xf]  ;;  %v710_v61 = vshll.u32 %v6089_v52, 16  ;;  %v705_v20 = vrot.slane %v6043_v3, 4 }
  0x29   :  { %382 = vrot.lane.b32.xlu1 %v363_v60, %s5810_s25  ;;  %v140_v55 = vrot.slane %v58_v29, %v5916_v33  ;;  %v199_v44 = vrot.slane %v198_v30, 4  ;;  %v714_v16 = vrot.slane %v709_v46, 4  ;;  %v411_v52 = vld [vmem:[%s8736_s0 + $0xc] sm:$0xf]  ;;  %v794_v3 = vld [vmem:[%s8736_s0 + $0x14] sm:$0xf] }
  0x2a   :  { %v209_v50 = vrot.slane %v208_v45, 4  ;;  %v721_v17 = vor.u32 %v719_v48, %v6143_v47  ;;  %v712_v18 = vor.u32 %v710_v61, %v709_v46  ;;  %v793_v45 = vld [vmem:[%s8736_s0 + $0x10] sm:$0xf] }
  0x2b   :  { %v6147_v49 = vsel %vm5977_vm8, %v199_v44, %v203_v21  ;;  %v211_v53 = vshll.u32 %v140_v55, 16  ;;  %v147_v21 = vrot.slane %v58_v29, %v5926_v36  ;;  %v215_v27 = vshrl.u32 %v140_v55, 16 }
  0x2c   :  { %331 = vrot.lane.b32.xlu0 %v281_v23, %s5814_s19  ;;  %v244_v59 = vmul.bf16 %v6147_v49, %v84_v43  ;;  %v722_v22 = vsel %vm6039_vm11, %v714_v16, %v721_v17  ;;  %v713_v30 = vsel %vm6039_vm11, %v705_v20, %v712_v18  ;;  %v291_v44 = vrot.slane %v6086_v51, 4  ;;  %v86_v20 = vld [vmem:[%s8736_s0 + $0x1c] sm:$0xf] }
  0x2d   :  { %639 = vrot.lane.b32.xlu1 %v620_v42, %s5809_s20  ;;  %v213_v0 = vrot.slane %v211_v53, 5  ;;  %v221_v29 = vshll.u32 %v147_v21, 16  ;;  %v225_v43 = vshrl.u32 %v147_v21, 16  ;;  %v217_v55 = vrot.slane %v215_v27, 4  ;;  %v622_v27 = vld [vmem:[%s8736_s0 + $0x18] sm:$0xf] }
  0x2e   :  { %v293_v19 = vshrl.u32 %v244_v59, 16  ;;  %v296_v42 = vshll.u32 %v244_v59, 16  ;;  %v671_v59 = vld [vmem:[%s8736_s0 + $0x1c] sm:$0xf] }
  0x2f   :  { %v6165_v60 = vsel %vm5977_vm8, %v209_v50, %v213_v0  ;;  %v670_v50 = vld [vmem:[%s8736_s0 + $0x18] sm:$0xf]  ;;  %v223_v53 = vrot.slane %v221_v29, 5  ;;  %v218_v61 = vor.u32 %v217_v55, %v213_v0  ;;  %v573_v0 = vld [vmem:[%s8736_s0 + $0x14] sm:$0xf] }
  0x30   :  { %380 = vrot.lane.b32.xlu0 %v362_v39, %s5810_s25  ;;  %v245_v4 = vmul.bf16 %v6165_v60, %v85_v62  ;;  %v295_v23 = vrot.slane %v293_v19, 7  ;;  %v679_v51 = vmul.bf16 %v670_v50, %v6147_v49  ;;  %v680_v16 = vmul.bf16 %v671_v59, %v6165_v60 }
  0x31   :  { %431 = vrot.lane.b32.xlu1 %v412_v1, %s5810_s25  ;;  %v574_v1 = vld [vmem:[%s8736_s0 + $0x18] sm:$0xf]  ;;  %v219_v19 = vrot.slane %v218_v61, 4 }
  0x32   :  { %v302_v25 = vshrl.u32 %v245_v4, 16  ;;  %v305_v26 = vshll.u32 %v245_v4, 16  ;;  %v300_v37 = vrot.slane %v295_v23, 4  ;;  %v298_v48 = vor.u32 %v296_v42, %v295_v23  ;;  %v365_v4 = vld [vmem:[%s8736_s0 + $0x18] sm:$0xf] }
  0x33   :  { %v734_v18 = vshrl.u32 %v680_v16, 16  ;;  %v6228_v23 = vsel %vm5977_vm8, %v219_v19, %v223_v53  ;;  %v728_v42 = vshll.u32 %v679_v51, 16  ;;  %v795_v19 = vld [vmem:[%s8736_s0 + $0x18] sm:$0xf] }
  0x34   :  { %637 = vrot.lane.b32.xlu0 %v619_v56, %s5809_s20  ;;  %v6177_v28 = vrot.slane %v302_v25, 7  ;;  %v227_v56 = vrot.slane %v225_v43, 4  ;;  %v299_v62 = vsel %vm6039_vm11, %v291_v44, %v298_v48  ;;  %v246_v29 = vmul.bf16 %v6228_v23, %v86_v20  ;;  %v414_v43 = vld [vmem:[%s8736_s0 + $0x18] sm:$0xf]  ;;  %v672_v20 = vld [vmem:[%s8736_s0 + $0x20] sm:$0xf] }
  0x35   :  { %765 = vrot.lane.b32.xlu1 %v722_v22, %s5810_s25  ;;  %v87_v22 = vld [vmem:[%s8736_s0 + $0x20] sm:$0xf]  ;;  %v723_v48 = vrot.slane %v6143_v47, 4  ;;  %v796_v47 = vld [vmem:[%s8736_s0 + $0x1c] sm:$0xf] }
  0x36   :  { %v307_v39 = vor.u32 %v305_v26, %v6177_v28  ;;  %v228_v17 = vor.u32 %v227_v56, %v223_v53  ;;  %v364_v26 = vld [vmem:[%s8736_s0 + $0x14] sm:$0xf] }
  0x37   :  { %v413_v53 = vld [vmem:[%s8736_s0 + $0x14] sm:$0xf] }
  0x38   :  { %429 = vrot.lane.b32.xlu0 %v411_v52, %s5810_s25  ;;  %v308_v46 = vsel %vm6039_vm11, %v300_v37, %v307_v39  ;;  %v725_v52 = vshrl.u32 %v679_v51, 16  ;;  %v6221_v21 = vrot.slane %v228_v17, 4  ;;  %v621_v39 = vld [vmem:[%s8736_s0 + $0x14] sm:$0xf]  ;;  %v314_v17 = vshll.u32 %v246_v29, 16 }
  0x39   :  { %813 = vrot.lane.b32.xlu1 %v794_v3, %s5814_s19  ;;  %v737_v3 = vshll.u32 %v680_v16, 16 }
  0x3a   :  { %v727_v25 = vrot.slane %v725_v52, 7  ;;  %v247_v37 = vmul.bf16 %v6221_v21, %v87_v22  ;;  %v681_v22 = vmul.bf16 %v672_v20, %v6228_v23 }
  0x3c   :  { %763 = vrot.lane.b32.xlu0 %v713_v30, %s5810_s25  ;;  %v6238_v30 = vrot.slane %v734_v18, 7  ;;  %v732_v55 = vrot.slane %v727_v25, 4  ;;  %v730_v50 = vor.u32 %v728_v42, %v727_v25  ;;  %v323_v51 = vshll.u32 %v247_v37, 16  ;;  %v673_v18 = vld [vmem:[%s8736_s0 + $0x24] sm:$0xf] }
  0x3d   :  { %337 = vrot.lane.b32.xlu1 %v308_v46, %s5814_s19  ;;  %v320_v46 = vshrl.u32 %v247_v37, 16  ;;  %v889_v37 = vld [vmem:[%s8736_s0 + $0x2c] sm:$0xf] }
  0x3e   :  { %v739_v44 = vor.u32 %v737_v3, %v6238_v30  ;;  %v743_v3 = vshrl.u32 %v681_v22, 16 }
  0x3f   :  { %v322_v61 = vrot.slane %v320_v46, 7  ;;  %v624_v46 = vld [vmem:[%s8736_s0 + $0x20] sm:$0xf] }
  0x40   :  { %811 = vrot.lane.b32.xlu0 %v793_v45, %s5814_s19  ;;  %v311_v45 = vshrl.u32 %v246_v29, 16  ;;  %v740_v56 = vsel %vm6039_vm11, %v732_v55, %v739_v44  ;;  %v888_v29 = vld [vmem:[%s8736_s0 + $0x28] sm:$0xf]  ;;  %v898_v55 = vmul.bf16 %v889_v37, %v6013_v38  ;;  %v366_v44 = vld [vmem:[%s8736_s0 + $0x1c] sm:$0xf] }
  0x41   :  { %595 = vrot.lane.b32.xlu1 %v574_v1, %s5809_s20  ;;  %v325_v16 = vor.u32 %v323_v51, %v322_v61  ;;  %v797_v37 = vld [vmem:[%s8736_s0 + $0x20] sm:$0xf] }
  0x42   :  { %v313_v59 = vrot.slane %v311_v45, 7  ;;  %v745_v45 = vrot.slane %v743_v3, 7  ;;  %v920_v51 = vshrl.u32 %v898_v55, 16 }
  0x44   :  { %335 = vrot.lane.b32.xlu0 %v299_v62, %s5814_s19  ;;  %v731_v62 = vsel %vm6039_vm11, %v723_v48, %v730_v50  ;;  %v318_v1 = vrot.slane %v313_v59, 4  ;;  %v316_v52 = vor.u32 %v314_v17, %v313_v59  ;;  %v416_v59 = vld [vmem:[%s8736_s0 + $0x20] sm:$0xf] }
  0x45   :  { %386 = vrot.lane.b32.xlu1 %v365_v4, %s5810_s25  ;;  %v309_v4 = vrot.slane %v6177_v28, 4  ;;  %v576_v28 = vld [vmem:[%s8736_s0 + $0x20] sm:$0xf] }
  0x47   :  { %v317_v25 = vsel %vm6039_vm11, %v309_v4, %v316_v52  ;;  %v741_v4 = vrot.slane %v6238_v30, 4  ;;  %v6331_v52 = vrot.slane %v920_v51, 7  ;;  %v1219_v51 = vld [vmem:[%s8736_s0 + $0x28] sm:$0xf] }
  0x48   :  { %593 = vrot.lane.b32.xlu0 %v573_v0, %s5809_s20  ;;  %v326_v0 = vsel %vm6039_vm11, %v318_v1, %v325_v16  ;;  %v415_v16 = vld [vmem:[%s8736_s0 + $0x1c] sm:$0xf] }
  0x49   :  { %643 = vrot.lane.b32.xlu1 %v622_v27, %s5809_s20  ;;  %v575_v27 = vld [vmem:[%s8736_s0 + $0x1c] sm:$0xf] }
  0x4c   :  { %384 = vrot.lane.b32.xlu0 %v364_v26, %s5810_s25  ;;  %v682_v26 = vmul.bf16 %v673_v18, %v6221_v21 }
  0x4d   :  { %435 = vrot.lane.b32.xlu1 %v414_v43, %s5810_s25  ;;  %v897_v43 = vmul.bf16 %v888_v29, %v6003_v31 }
  0x4e   :  { %v752_v42 = vshrl.u32 %v682_v26, 16  ;;  %v755_v50 = vshll.u32 %v682_v26, 16 }
  0x4f   :  { %v911_v61 = vshrl.u32 %v897_v43, 16  ;;  %v914_v26 = vshll.u32 %v897_v43, 16 }
  0x50   :  { %641 = vrot.lane.b32.xlu0 %v621_v39, %s5809_s20  ;;  %v367_v39 = vld [vmem:[%s8736_s0 + $0x20] sm:$0xf]  ;;  %v754_v48 = vrot.slane %v752_v42, 7  ;;  %v1316_v42 = vld [vmem:[%s8736_s0 + $0x2c] sm:$0xf] }
  0x51   :  { %769 = vrot.lane.b32.xlu1 %v740_v56, %s5810_s25  ;;  %v623_v56 = vld [vmem:[%s8736_s0 + $0x1c] sm:$0xf]  ;;  %v913_v17 = vrot.slane %v911_v61, 7 }
  0x52   :  { %v757_v1 = vor.u32 %v755_v50, %v754_v48  ;;  %v1325_v48 = vmul.bf16 %v1316_v42, %v6003_v31  ;;  %v460_v42 = vld [vmem:[%s8736_s0 + $0x8] sm:$0xf] }
  0x54   :  { %433 = vrot.lane.b32.xlu0 %v413_v53, %s5810_s25  ;;  %v887_v53 = vld [vmem:[%s8736_s0 + $0x24] sm:$0x8] }
  0x55   :  { %817 = vrot.lane.b32.xlu1 %v796_v47, %s5814_s19  ;;  %v746_v47 = vshll.u32 %v681_v22, 16  ;;  %v798_v22 = vld [vmem:[%s8736_s0 + $0x24] sm:$0xf] }
  0x57   :  { %v748_v18 = vor.u32 %v746_v47, %v745_v45  ;;  %v1339_v47 = vshrl.u32 %v1325_v48, 16 }
  0x58   :  { %767 = vrot.lane.b32.xlu0 %v731_v62, %s5810_s25  ;;  %v750_v62 = vrot.slane %v745_v45, 4 }
  0x59   :  { %341 = vrot.lane.b32.xlu1 %v326_v0, %s5814_s19  ;;  %v896_v0 = vmul.bf16 %v887_v53, %v5957_v54  ;;  %v749_v30 = vsel %vm6039_vm11, %v741_v4, %v748_v18  ;;  %v1013_v4 = vld [vmem:[%s8736_s0 + $0x28] sm:$0xf]  ;;  %v1341_v18 = vrot.slane %v1339_v47, 7 }
  0x5a   :  { %v758_v20 = vsel %vm6039_vm11, %v750_v62, %v757_v1  ;;  %v1014_v62 = vld [vmem:[%s8736_s0 + $0x2c] sm:$0xf]  ;;  %v1315_v1 = vld [vmem:[%s8736_s0 + $0x28] sm:$0x8] }
  0x5c   :  { %815 = vrot.lane.b32.xlu0 %v795_v19, %s5814_s19  ;;  %v923_v19 = vshll.u32 %v898_v55, 16 }
  0x5d   :  { %599 = vrot.lane.b32.xlu1 %v576_v28, %s5809_s20  ;;  %v918_v28 = vrot.slane %v913_v17, 4 }
  0x5e   :  { %v925_v3 = vor.u32 %v923_v19, %v6331_v52 }
  0x60   :  { %339 = vrot.lane.b32.xlu0 %v317_v25, %s5814_s19  ;;  %v906_v25 = vshrl.u32 %v896_v0, 16  ;;  %v926_v55 = vsel %vm6039_vm11, %v918_v28, %v925_v3  ;;  %v1324_v0 = vmul.bf16 %v1315_v1, %v5957_v54  ;;  %v1267_v3 = vld [vmem:[%s8736_s0 + $0x28] sm:$0xf] }
  0x61   :  { %390 = vrot.lane.b32.xlu1 %v367_v39, %s5810_s25 }
  0x62   :  { %v5215_v39 = vrot.slane %v906_v25, 11 }
  0x64   :  { %597 = vrot.lane.b32.xlu0 %v575_v27, %s5809_s20 }
  0x65   :  { %647 = vrot.lane.b32.xlu1 %v624_v46, %s5809_s20  ;;  %v1317_v46 = vld [vmem:[%s8736_s0 + $0x30] sm:$0xf] }
  0x68   :  { %388 = vrot.lane.b32.xlu0 %v366_v44, %s5810_s25  ;;  %v916_v44 = vor.u32 %v914_v26, %v913_v17 }
  0x69   :  { %439 = vrot.lane.b32.xlu1 %v416_v59, %s5810_s25  ;;  %v1326_v59 = vmul.bf16 %v1317_v46, %v6013_v38 }
  0x6a   :  { %v917_v50 = vsel %vm6039_vm11, %v5215_v39, %v916_v44  ;;  %v1334_v39 = vshrl.u32 %v1324_v0, 16  ;;  %v1342_v44 = vshll.u32 %v1325_v48, 16 }
  0x6b   :  { %v1348_v17 = vshrl.u32 %v1326_v59, 16  ;;  %v1351_v28 = vshll.u32 %v1326_v59, 16 }
  0x6c   :  { %645 = vrot.lane.b32.xlu0 %v623_v56, %s5809_s20  ;;  %v1220_v56 = vld [vmem:[%s8736_s0 + $0x2c] sm:$0xf] }
  0x6d   :  { %773 = vrot.lane.b32.xlu1 %v758_v20, %s5810_s25  ;;  %v1268_v20 = vld [vmem:[%s8736_s0 + $0x2c] sm:$0xf]  ;;  %v6399_v25 = vrot.slane %v1348_v17, 7 }
  0x70   :  { %437 = vrot.lane.b32.xlu0 %v415_v16, %s5810_s25 }
  0x71   :  { %821 = vrot.lane.b32.xlu1 %v798_v22, %s5814_s19 }
  0x74   :  { %v586_v27 = vpop.permute.xlu1 %585  ;;  %771 = vrot.lane.b32.xlu0 %v749_v30, %s5810_s25  ;;  %v458_v30 = vld [vmem:[%s8736_s0] sm:$0x8] }
  0x75   :  { %609 = vst.msk [vmem:[#allocation2 + $0x4] sm:$0xf] %vm351_vm14, %v586_v27  ;;  %v6344_v29 = vpop.permute.xlu0 %376  ;;  %983 = vrot.lane.b32.xlu1 %v926_v55, %s5814_s19  ;;  %v459_v27 = vld [vmem:[%s8736_s0 + $0x4] sm:$0xf]  ;;  %v1346_v55 = vrot.slane %v1341_v18, 4  ;;  %v467_v59 = vmul.bf16 %v458_v30, %v5957_v54 }
  0x78   :  { %v588_v43 = vpop.permute.xlu1 %587  ;;  %819 = vrot.lane.b32.xlu0 %v797_v37, %s5814_s19  ;;  %v1062_v37 = vld [vmem:[%s8736_s0 + $0x2c] sm:$0xf] }
  0x79   :  { %610 = vst.msk [vmem:[#allocation2 + $0x10] sm:$0xf] %vm351_vm14, %v588_v43  ;;  %v634_v45 = vpop.permute.xlu0 %633  ;;  %1237 = vrot.lane.b32.xlu1 %v1220_v56, %s5809_s20  ;;  %v890_v43 = vld [vmem:[%s8736_s0 + $0x30] sm:$0xf]  ;;  %v468_v56 = vmul.bf16 %v459_v27, %v6003_v31 }
  0x7a   :  { %657 = vst.msk [vmem:[#allocation2 + $0x4] sm:$0xf] %vm400_vm15, %v634_v45  ;;  %v891_v45 = vld [vmem:[%s8736_s0 + $0x34] sm:$0xf]  ;;  %v6432_v48 = vmul.bf16 %v890_v43, %v6032_v63 }
  0x7c   :  { %v6366_v53 = vpop.permute.xlu1 %378  ;;  %981 = vrot.lane.b32.xlu0 %v917_v50, %s5814_s19  ;;  %v1353_v50 = vor.u32 %v1351_v28, %v6399_v25 }
  0x7d   :  { %v6372_v61 = vpop.permute.xlu0 %425  ;;  %1031 = vrot.lane.b32.xlu1 %v1014_v62, %s5810_s25  ;;  %v5217_v62 = vrot.slane %v1334_v39, 11 }
  0x80   :  { %v636_v16 = vpop.permute.xlu1 %635  ;;  %1235 = vrot.lane.b32.xlu0 %v1219_v51, %s5809_s20  ;;  %v469_v51 = vmul.bf16 %v460_v42, %v6013_v38 }
  0x81   :  { %658 = vst.msk [vmem:[#allocation2 + $0x10] sm:$0xf] %vm400_vm15, %v636_v16  ;;  %v6386_v19 = vpop.permute.xlu0 %807  ;;  %1285 = vrot.lane.b32.xlu1 %v1268_v20, %s5809_s20 }
  0x84   :  { %v6397_v22 = vpop.permute.xlu1 %427  ;;  %1029 = vrot.lane.b32.xlu0 %v1013_v4, %s5810_s25 }
  0x85   :  { %v590_v26 = vpop.permute.xlu0 %589  ;;  %1079 = vrot.lane.b32.xlu1 %v1062_v37, %s5810_s25 }
  0x86   :  { %611 = vst.msk [vmem:[#allocation2 + $0x1c] sm:$0xf] %vm351_vm14, %v590_v26 }
  0x88   :  { %v810_v46 = vpop.permute.xlu1 %809  ;;  %1283 = vrot.lane.b32.xlu0 %v1267_v3, %s5809_s20 }
  0x89   :  { %10 = vsyncpa [#allocation6], 0  ;;  %v1061_v47 = vld [vmem:[%s8736_s0 + $0x28] sm:$0xf]  ;;  %v1354_v16 = vsel %vm6039_vm11, %v1346_v55, %v1353_v50  ;;  %v1344_v17 = vor.u32 %v1342_v44, %v1341_v18  ;;  %v482_v0 = vshrl.u32 %v468_v56, 16  ;;  %v900_v4 = vmul.bf16 %v891_v45, %v6056_v24 }
  0x8a   :  { %v477_v20 = vshrl.u32 %v467_v59, 16  ;;  %v485_v28 = vshll.u32 %v468_v56, 16  ;;  %v491_v26 = vshrl.u32 %v469_v51, 16  ;;  %1411 = vrot.lane.b32.xlu1 %v1354_v16, %s5810_s25  ;;  %v840_v18 = vld [vmem:[%s8736_s0 + $0xc] sm:$0xf]  ;;  %v929_v3 = vshrl.u32 %v6432_v48, 16 }
  0x8b   :  { %v1345_v30 = vsel %vm6039_vm11, %v5217_v62, %v1344_v17  ;;  %v484_v27 = vrot.slane %v482_v0, 7  ;;  %v938_v37 = vshrl.u32 %v900_v4, 16  ;;  %v494_v55 = vshll.u32 %v469_v51, 16  ;;  %v5683_v44 = vld [vmem:[%s8737_s1 + $0x88] sm:$0xff]   ;;  %v1442_v50 = vld [vmem:[%s8736_s0 + $0x30] sm:$0xf] }
  0x8c   :  { %v592_v1 = vpop.permute.xlu1 %591  ;;  %1077 = vrot.lane.b32.xlu0 %v1061_v47, %s5810_s25  ;;  %v5213_v39 = vrot.slane %v477_v20, 11  ;;  %v6449_v43 = vrot.slane %v491_v26, 7  ;;  %v839_v45 = vld [vmem:[%s8736_s0 + $0x8] sm:$0xf]  ;;  %vm449_vm0 = vcmask 781824   ;;  %v931_v56 = vrot.slane %v929_v3, 7  ;;  %5604 = vmatprep.subr.bf16.mxu1 %v5683_v44 }
  0x8d   :  { %612 = vst.msk [vmem:[#allocation2 + $0x28] sm:$0xf] %vm351_vm14, %v592_v1  ;;  %v487_v42 = vor.u32 %v485_v28, %v484_v27  ;;  %v6462_v59 = vrot.slane %v938_v37, 7  ;;  %v941_v51 = vshll.u32 %v900_v4, 16  ;;  %vm560_vm1 = vcmask 1044224   ;;  %5605 = vmatpush3.bf16.msra.mxu1 %v5683_v44  ;;  %v5687_v20 = vld [vmem:[%s8737_s1 + $0x80] sm:$0xff]  }
  0x8e   :  { %857 = vrot.lane.b32.xlu1 %v840_v18, %s5814_s19  ;;  %v461_v47 = vld [vmem:[%s8736_s0 + $0xc] sm:$0xf]  ;;  %v462_v1 = vld [vmem:[%s8736_s0 + $0x10] sm:$0xf]  ;;  %v489_v0 = vrot.slane %v484_v27, 4  ;;  %v496_v4 = vor.u32 %v494_v55, %v6449_v43  ;;  %v932_v28 = vshll.u32 %v6432_v48, 16  ;;  %5606 = vmatprep.subr.bf16.mxu1 %v5687_v20 }
  0x8f   :  { %v488_v17 = vsel %vm6039_vm11, %v5213_v39, %v487_v42  ;;  %v1441_v26 = vld [vmem:[%s8736_s0 + $0x2c] sm:$0xf]  ;;  %v943_v27 = vor.u32 %v941_v51, %v6462_v59  ;;  %v470_v18 = vmul.bf16 %v461_v47, %v6032_v63  ;;  %v471_v48 = vmul.bf16 %v462_v1, %v6056_v24  ;;  %v841_v39 = vld [vmem:[%s8736_s0 + $0x10] sm:$0xf]  ;;  %v1222_v51 = vld [vmem:[%s8736_s0 + $0x34] sm:$0xf] }
  0x90   :  { %1409 = vrot.lane.b32.xlu0 %v1345_v30, %s5810_s25  ;;  %v842_v30 = vld [vmem:[%s8736_s0 + $0x14] sm:$0xf]  ;;  %v927_v3 = vrot.slane %v6331_v52, 4  ;;  %v934_v37 = vor.u32 %v932_v28, %v931_v56  ;;  %vm1838_vm2 = vcmask 261120   ;;  %vm2200_vm3 = vcmask 519168  }
  0x91   :  { %5607 = vmatpush3.bf16.msra.mxu1 %v5687_v20  ;;  %v500_v55 = vshrl.u32 %v470_v18, 16  ;;  %v509_v44 = vshrl.u32 %v471_v48, 16  ;;  %v1318_v52 = vld [vmem:[%s8736_s0 + $0x34] sm:$0xf]  ;;  %vm65_vm4 = vcmp.ne.s32.totalorder %v37_v58, 7  ;;  %vm66_vm5 = vcmp.ne.s32.totalorder %v38_v11, 7 }
  0x92   :  { %v328_v62 = vpop.permute.xlu0 %327  ;;  %1459 = vrot.lane.b32.xlu1 %v1442_v50, %s5814_s19  ;;  %v935_v50 = vsel %vm6039_vm11, %v927_v3, %v934_v37  ;;  %v1327_v1 = vmul.bf16 %v1318_v52, %v6032_v63  ;;  %v1016_v20 = vld [vmem:[%s8736_s0 + $0x34] sm:$0xf]  ;;  %v498_v3 = vrot.slane %v6449_v43, 4  ;;  %v8793_v32 = vand.u32 7, %v5867_v6 }
  0x93   :  { %v762_v16 = vpop.permute.xlu1 %761  ;;  %352 = vst.msk [vmem:[#allocation2] sm:$0xf] %vm351_vm14, %v328_v62  ;;  %v502_v62 = vrot.slane %v500_v55, 7  ;;  %v6529_v47 = vrot.slane %v509_v44, 7 }
  0x94   :  { %784 = vst.msk [vmem:[#allocation2 + $0x10] sm:$0xf] %vm449_vm0, %v762_v16  ;;  %855 = vrot.lane.b32.xlu0 %v839_v45, %s5814_s19  ;;  %vm60_vm7 = vcmp.ne.s32.totalorder %v8793_v32, 7 }
  0x95   :  { %401 = vst.msk [vmem:[#allocation2] sm:$0xf] %vm400_vm15, %v6344_v29  ;;  %v936_v29 = vrot.slane %v931_v56, 4  ;;  %v512_v56 = vshll.u32 %v471_v48, 16  ;;  %v507_v28 = vrot.slane %v502_v62, 4 }
  0x96   :  { %832 = vst.msk [vmem:[#allocation2 + $0x10] sm:$0xf] %vm560_vm1, %v810_v46  ;;  %v330_v46 = vpop.permute.xlu0 %329  ;;  %861 = vrot.lane.b32.xlu1 %v842_v30, %s5814_s19  ;;  %v1357_v30 = vshrl.u32 %v1327_v1, 16 }
  0x97   :  { %450 = vst.msk [vmem:[#allocation2] sm:$0xf] %vm449_vm0, %v6372_v61  ;;  %v497_v61 = vsel %vm6039_vm11, %v489_v0, %v496_v4  ;;  %v944_v42 = vsel %vm6039_vm11, %v936_v29, %v943_v27  ;;  %v334_v45 = vpop.permute.xlu1 %333  ;;  %v1221_v0 = vld [vmem:[%s8736_s0 + $0x30] sm:$0xf]  ;;  %v503_v4 = vshll.u32 %v470_v18, 16 }
  0x98   :  { %561 = vst.msk [vmem:[#allocation2] sm:$0xf] %vm560_vm1, %v488_v17  ;;  %1457 = vrot.lane.b32.xlu0 %v1441_v26, %s5814_s19  ;;  %v514_v26 = vor.u32 %v512_v56, %v6529_v47  ;;  %v1015_v18 = vld [vmem:[%s8736_s0 + $0x30] sm:$0xf]  ;;  %v1359_v55 = vrot.slane %v1357_v30, 7 }
  0x99   :  { %353 = vst.msk [vmem:[#allocation2 + $0xc] sm:$0xf] %vm351_vm14, %v330_v46  ;;  %355 = vst.msk [vmem:[#allocation2 + $0x24] sm:$0xf] %vm351_vm14, %v334_v45  ;;  %v505_v37 = vor.u32 %v503_v4, %v502_v62  ;;  %v1360_v62 = vshll.u32 %v1327_v1, 16 }
  0x9a   :  { %402 = vst.msk [vmem:[#allocation2 + $0xc] sm:$0xf] %vm400_vm15, %v6366_v53  ;;  %v760_v53 = vpop.permute.xlu0 %759  ;;  %987 = vrot.lane.b32.xlu1 %v944_v42, %s5814_s19  ;;  %v1270_v42 = vld [vmem:[%s8736_s0 + $0x34] sm:$0xf]  ;;  %v1364_v56 = vrot.slane %v1359_v55, 4 }
  0x9b   :  { %451 = vst.msk [vmem:[#allocation2 + $0xc] sm:$0xf] %vm449_vm0, %v6397_v22  ;;  %v1319_v22 = vld [vmem:[%s8736_s0 + $0x38] sm:$0xf]  ;;  %783 = vst.msk [vmem:[#allocation2 + $0x4] sm:$0xf] %vm449_vm0, %v760_v53  ;;  %v383_v17 = vpop.permute.xlu1 %382  ;;  %v506_v43 = vsel %vm6039_vm11, %v498_v3, %v505_v37 }
  0x9c   :  { %562 = vst.msk [vmem:[#allocation2 + $0xc] sm:$0xf] %vm560_vm1, %v497_v61  ;;  %831 = vst.msk [vmem:[#allocation2 + $0x4] sm:$0xf] %vm560_vm1, %v6386_v19  ;;  %859 = vrot.lane.b32.xlu0 %v841_v39, %s5814_s19  ;;  %v1328_v16 = vmul.bf16 %v1319_v22, %v6056_v24  ;;  %v515_v39 = vsel %vm6039_vm11, %v507_v28, %v514_v26  ;;  %v1269_v22 = vld [vmem:[%s8736_s0 + $0x30] sm:$0xf]  ;;  %v1362_v28 = vor.u32 %v1360_v62, %v1359_v55 }
  0x9d   :  { %404 = vst.msk [vmem:[#allocation2 + $0x24] sm:$0xf] %vm400_vm15, %v383_v17  ;;  %v892_v17 = vld [vmem:[%s8736_s0 + $0x38] sm:$0xf]  ;;  %v1063_v1 = vld [vmem:[%s8736_s0 + $0x30] sm:$0xf] }
  0x9e   :  { %v332_v19 = vpop.permute.xlu0 %331  ;;  %1241 = vrot.lane.b32.xlu1 %v1222_v51, %s5809_s20  ;;  %v1366_v29 = vshrl.u32 %v1328_v16, 16  ;;  %v1369_v53 = vshll.u32 %v1328_v16, 16 }
  0x9f   :  { %354 = vst.msk [vmem:[#allocation2 + $0x18] sm:$0xf] %vm351_vm14, %v332_v19  ;;  %v640_v48 = vpop.permute.xlu1 %639 }
  0xa0   :  { %985 = vrot.lane.b32.xlu0 %v935_v50, %s5814_s19  ;;  %660 = vst.msk [vmem:[#allocation2 + $0x28] sm:$0xf] %vm400_vm15, %v640_v48  ;;  %v6557_v44 = vrot.slane %v1366_v29, 7  ;;  %v1064_v50 = vld [vmem:[%s8736_s0 + $0x34] sm:$0xf]  ;;  %v901_v29 = vmul.bf16 %v892_v17, %v6147_v49 }
  0xa1   :  { %v463_v48 = vld [vmem:[%s8736_s0 + $0x14] sm:$0xf] }
  0xa2   :  { %v381_v27 = vpop.permute.xlu0 %380  ;;  %1035 = vrot.lane.b32.xlu1 %v1016_v20, %s5810_s25  ;;  %v1371_v51 = vor.u32 %v1369_v53, %v6557_v44  ;;  %v1355_v20 = vrot.slane %v6399_v25, 4  ;;  %v843_v53 = vld [vmem:[%s8736_s0 + $0x18] sm:$0xf]  ;;  %v950_v17 = vshll.u32 %v901_v29, 16 }
  0xa3   :  { %403 = vst.msk [vmem:[#allocation2 + $0x18] sm:$0xf] %vm400_vm15, %v381_v27  ;;  %v5674_v46 = vld [vmem:[#allocation2] ss:$12 sps:$4 sm:$0xff]   ;;  %v5676_v61 = vld [vmem:[#allocation2 + $0x4] ss:$12 sps:$4 sm:$0xff]   ;;  %v432_v52 = vpop.permute.xlu1 %431 }
  0xa4   :  { %1239 = vrot.lane.b32.xlu0 %v1221_v0, %s5809_s20  ;;  %1895 = vmatprep.mubr.bf16.mxu0 %v5676_v61  ;;  %453 = vst.msk [vmem:[#allocation2 + $0x24] sm:$0xf] %vm449_vm0, %v432_v52  ;;  %v893_v0 = vld [vmem:[%s8736_s0 + $0x3c] sm:$0xf]  ;;  %v1372_v4 = vsel %vm6039_vm11, %v1364_v56, %v1371_v51  ;;  %v1363_v25 = vsel %vm6039_vm11, %v1355_v20, %v1362_v28 }
  0xa5   :  { %1896 = vmatmul.mubr.bf16.vlgmr.msra.gmra.mxu0 %v5674_v46  ;;  %564 = vst.msk [vmem:[#allocation2 + $0x24] sm:$0xf] %vm560_vm1, %v515_v39  ;;  %v902_v27 = vmul.bf16 %v893_v0, %v6165_v60  ;;  %v464_v46 = vld [vmem:[%s8736_s0 + $0x18] sm:$0xf]  ;;  %v844_v61 = vld [vmem:[%s8736_s0 + $0x1c] sm:$0xf] }
  0xa6   :  { %v638_v45 = vpop.permute.xlu0 %637  ;;  %1289 = vrot.lane.b32.xlu1 %v1270_v42, %s5809_s20  ;;  %v473_v3 = vmul.bf16 %v464_v46, %v6165_v60  ;;  %v947_v42 = vshrl.u32 %v901_v29, 16 }
  0xa7   :  { %659 = vst.msk [vmem:[#allocation2 + $0x1c] sm:$0xf] %vm400_vm15, %v638_v45  ;;  %v766_v19 = vpop.permute.xlu1 %765  ;;  %v956_v55 = vshrl.u32 %v902_v27, 16  ;;  %v1444_v45 = vld [vmem:[%s8736_s0 + $0x38] sm:$0xf]  ;;  %v959_v62 = vshll.u32 %v902_v27, 16 }
  0xa8   :  { %1033 = vrot.lane.b32.xlu0 %v1015_v18, %s5810_s25  ;;  %786 = vst.msk [vmem:[#allocation2 + $0x28] sm:$0xf] %vm449_vm0, %v766_v19  ;;  %v472_v18 = vmul.bf16 %v463_v48, %v6147_v49  ;;  %v949_v56 = vrot.slane %v947_v42, 7  ;;  %v1443_v19 = vld [vmem:[%s8736_s0 + $0x34] sm:$0xf] }
  0xa9   :  { %v6619_v51 = vrot.slane %v956_v55, 7  ;;  %v846_v27 = vld [vmem:[%s8736_s0 + $0x24] sm:$0xf] }
  0xaa   :  { %v430_v16 = vpop.permute.xlu0 %429  ;;  %1083 = vrot.lane.b32.xlu1 %v1064_v50, %s5810_s25  ;;  %v518_v52 = vshrl.u32 %v472_v18, 16  ;;  %v954_v48 = vrot.slane %v949_v56, 4  ;;  %v521_v42 = vshll.u32 %v472_v18, 16 }
  0xab   :  { %452 = vst.msk [vmem:[#allocation2 + $0x18] sm:$0xf] %vm449_vm0, %v430_v16  ;;  %v814_v30 = vpop.permute.xlu1 %813  ;;  %v961_v46 = vor.u32 %v959_v62, %v6619_v51 }
  0xac   :  { %563 = vst.msk [vmem:[#allocation2 + $0x18] sm:$0xf] %vm560_vm1, %v506_v43  ;;  %1287 = vrot.lane.b32.xlu0 %v1269_v22, %s5809_s20  ;;  %834 = vst.msk [vmem:[#allocation2 + $0x28] sm:$0xf] %vm560_vm1, %v814_v30  ;;  %v527_v43 = vshrl.u32 %v473_v3, 16  ;;  %v520_v0 = vrot.slane %v518_v52, 7 }
  0xad   :  { %v1321_v52 = vld [vmem:[%s8736_s0 + $0x40] sm:$0xf] }
  0xae   :  { %v764_v26 = vpop.permute.xlu0 %763  ;;  %1415 = vrot.lane.b32.xlu1 %v1372_v4, %s5810_s25  ;;  %v530_v4 = vshll.u32 %v473_v3, 16  ;;  %v952_v3 = vor.u32 %v950_v17, %v949_v56  ;;  %v1330_v17 = vmul.bf16 %v1321_v52, %v6165_v60 }
  0xaf   :  { %785 = vst.msk [vmem:[#allocation2 + $0x1c] sm:$0xf] %vm449_vm0, %v764_v26  ;;  %v338_v39 = vpop.permute.xlu1 %337 }
  0xb0   :  { %1081 = vrot.lane.b32.xlu0 %v1063_v1, %s5810_s25  ;;  %357 = vst.msk [vmem:[#allocation2 + $0x3c] sm:$0xf] %vm351_vm14, %v338_v39  ;;  %v6628_v1 = vrot.slane %v527_v43, 7 }
  0xb2   :  { %v812_v37 = vpop.permute.xlu0 %811  ;;  %865 = vrot.lane.b32.xlu1 %v844_v61, %s5814_s19  ;;  %v845_v61 = vld [vmem:[%s8736_s0 + $0x20] sm:$0xf]  ;;  %v532_v39 = vor.u32 %v530_v4, %v6628_v1 }
  0xb3   :  { %833 = vst.msk [vmem:[#allocation2 + $0x1c] sm:$0xf] %vm560_vm1, %v812_v37  ;;  %v596_v50 = vpop.permute.xlu1 %595  ;;  %v1544_v16 = vld [vmem:[#allocation2 + $0x24] sm:$0xff]  ;;  %v525_v37 = vrot.slane %v520_v0, 4 }
  0xb4   :  { %1413 = vrot.lane.b32.xlu0 %v1363_v25, %s5810_s25  ;;  %614 = vst.msk [vmem:[#allocation2 + $0x40] sm:$0xf] %vm351_vm14, %v596_v50  ;;  %v945_v25 = vrot.slane %v6462_v59, 4  ;;  %v1320_v59 = vld [vmem:[%s8736_s0 + $0x3c] sm:$0xf]  ;;  %v523_v50 = vor.u32 %v521_v42, %v520_v0 }
  0xb5   :  { %v533_v43 = vsel %vm6039_vm11, %v525_v37, %v532_v39  ;;  %v1223_v0 = vld [vmem:[%s8736_s0 + $0x38] sm:$0xf]  ;;  %v465_v37 = vld [vmem:[%s8736_s0 + $0x1c] sm:$0xf]  ;;  %v466_v39 = vld [vmem:[%s8736_s0 + $0x20] sm:$0xf] }
  0xb6   :  { %v336_v22 = vpop.permute.xlu0 %335  ;;  %1463 = vrot.lane.b32.xlu1 %v1444_v45, %s5814_s19  ;;  %v962_v45 = vsel %vm6039_vm11, %v954_v48, %v961_v46  ;;  %v953_v18 = vsel %vm6039_vm11, %v945_v25, %v952_v3  ;;  %v1272_v48 = vld [vmem:[%s8736_s0 + $0x3c] sm:$0xf]  ;;  %v1387_v46 = vshll.u32 %v1330_v17, 16  ;;  %v1271_v42 = vld [vmem:[%s8736_s0 + $0x38] sm:$0xf] }
  0xb7   :  { %356 = vst.msk [vmem:[#allocation2 + $0x30] sm:$0xf] %vm351_vm14, %v336_v22  ;;  %v387_v30 = vpop.permute.xlu1 %386  ;;  %v516_v22 = vrot.slane %v6529_v47, 4 }
  0xb8   :  { %863 = vrot.lane.b32.xlu0 %v843_v53, %s5814_s19  ;;  %406 = vst.msk [vmem:[#allocation2 + $0x3c] sm:$0xf] %vm400_vm15, %v387_v30  ;;  %v1384_v30 = vshrl.u32 %v1330_v17, 16 }
  0xb9   :  { %v524_v47 = vsel %vm6039_vm11, %v516_v22, %v523_v50  ;;  %v894_v50 = vld [vmem:[%s8736_s0 + $0x40] sm:$0xf] }
  0xba   :  { %v594_v20 = vpop.permute.xlu0 %593  ;;  %v1542_v28 = vld [vmem:[#allocation2 + $0x18] sm:$0xff]  ;;  %869 = vrot.lane.b32.xlu1 %v846_v27, %s5814_s19  ;;  %v6689_v3 = vrot.slane %v1384_v30, 7 }
  0xbb   :  { %v5677_v26 = vld [vmem:[#allocation2 + $0x1c] ss:$12 sps:$4 sm:$0xff]   ;;  %613 = vst.msk [vmem:[#allocation2 + $0x34] sm:$0xf] %vm351_vm14, %v594_v20  ;;  %v5221_v29 = vcombine.low %v1542_v28, %v1544_v16  ;;  %v644_v53 = vpop.permute.xlu1 %643  ;;  %v1017_v27 = vld [vmem:[%s8736_s0 + $0x38] sm:$0xf] }
  0xbc   :  { %1461 = vrot.lane.b32.xlu0 %v1443_v19, %s5814_s19  ;;  %1903 = vmatprep.mubr.bf16.mxu0 %v5677_v26  ;;  %662 = vst.msk [vmem:[#allocation2 + $0x40] sm:$0xf] %vm400_vm15, %v644_v53  ;;  %v1224_v16 = vld [vmem:[%s8736_s0 + $0x3c] sm:$0xf]  ;;  %v1329_v19 = vmul.bf16 %v1320_v59, %v6147_v49  ;;  %v6705_v53 = vmul.bf16 %v465_v37, %v6228_v23 }
  0xbd   :  { %1904 = vmatmul.mubr.bf16.gmra.mxu0 %v5221_v29  ;;  %v1018_v28 = vld [vmem:[%s8736_s0 + $0x3c] sm:$0xf]  ;;  %v1389_v22 = vor.u32 %v1387_v46, %v6689_v3 }
  0xbe   :  { %v385_v55 = vpop.permute.xlu0 %384  ;;  %991 = vrot.lane.b32.xlu1 %v962_v45, %s5814_s19  ;;  %v1375_v26 = vshrl.u32 %v1329_v19, 16  ;;  %v475_v45 = vmul.bf16 %v466_v39, %v6221_v21  ;;  %v536_v17 = vshrl.u32 %v6705_v53, 16 }
  0xbf   :  { %405 = vst.msk [vmem:[#allocation2 + $0x30] sm:$0xf] %vm400_vm15, %v385_v55  ;;  %v436_v62 = vpop.permute.xlu1 %435  ;;  %v1378_v55 = vshll.u32 %v1329_v19, 16 }
  0xc0   :  { %867 = vrot.lane.b32.xlu0 %v845_v61, %s5814_s19  ;;  %455 = vst.msk [vmem:[#allocation2 + $0x3c] sm:$0xf] %vm449_vm0, %v436_v62  ;;  %v1377_v61 = vrot.slane %v1375_v26, 7  ;;  %v1065_v62 = vld [vmem:[%s8736_s0 + $0x38] sm:$0xf] }
  0xc1   :  { %566 = vst.msk [vmem:[#allocation2 + $0x3c] sm:$0xf] %vm560_vm1, %v533_v43 }
  0xc2   :  { %v642_v56 = vpop.permute.xlu0 %641  ;;  %1245 = vrot.lane.b32.xlu1 %v1224_v16, %s5809_s20  ;;  %v1382_v43 = vrot.slane %v1377_v61, 4  ;;  %v1373_v16 = vrot.slane %v6557_v44, 4  ;;  %v1380_v19 = vor.u32 %v1378_v55, %v1377_v61 }
  0xc3   :  { %661 = vst.msk [vmem:[#allocation2 + $0x34] sm:$0xf] %vm400_vm15, %v642_v56  ;;  %v770_v20 = vpop.permute.xlu1 %769  ;;  %v895_v56 = vld [vmem:[%s8736_s0 + $0x44] sm:$0xf] }
  0xc4   :  { %989 = vrot.lane.b32.xlu0 %v953_v18, %s5814_s19  ;;  %788 = vst.msk [vmem:[#allocation2 + $0x40] sm:$0xf] %vm449_vm0, %v770_v20  ;;  %v1066_v18 = vld [vmem:[%s8736_s0 + $0x3c] sm:$0xf]  ;;  %v1390_v20 = vsel %vm6039_vm11, %v1382_v43, %v1389_v22  ;;  %v904_v26 = vmul.bf16 %v895_v56, %v6221_v21  ;;  %v1381_v30 = vsel %vm6039_vm11, %v1373_v16, %v1380_v19  ;;  %v539_v43 = vshll.u32 %v6705_v53, 16 }
  0xc5   :  { %v1490_v56 = vld [vmem:[%s8736_s0 + $0x30] sm:$0xf]  ;;  %v1489_v53 = vld [vmem:[%s8736_s0 + $0x2c] sm:$0xf] }
  0xc6   :  { %v434_v4 = vpop.permute.xlu0 %433  ;;  %1039 = vrot.lane.b32.xlu1 %v1018_v28, %s5810_s25  ;;  %v903_v28 = vmul.bf16 %v894_v50, %v6228_v23  ;;  %v974_v55 = vshrl.u32 %v904_v26, 16  ;;  %v977_v19 = vshll.u32 %v904_v26, 16 }
  0xc7   :  { %454 = vst.msk [vmem:[#allocation2 + $0x30] sm:$0xf] %vm449_vm0, %v434_v4  ;;  %v818_v25 = vpop.permute.xlu1 %817 }
  0xc8   :  { %565 = vst.msk [vmem:[#allocation2 + $0x30] sm:$0xf] %vm560_vm1, %v524_v47  ;;  %1243 = vrot.lane.b32.xlu0 %v1223_v0, %s5809_s20  ;;  %836 = vst.msk [vmem:[#allocation2 + $0x40] sm:$0xf] %vm560_vm1, %v818_v25  ;;  %v545_v47 = vshrl.u32 %v475_v45, 16  ;;  %v976_v16 = vrot.slane %v974_v55, 7 }
  0xca   :  { %v768_v29 = vpop.permute.xlu0 %767  ;;  %1293 = vrot.lane.b32.xlu1 %v1272_v48, %s5809_s20  ;;  %v538_v48 = vrot.slane %v536_v17, 7  ;;  %v547_v46 = vrot.slane %v545_v47, 7  ;;  %v534_v47 = vrot.slane %v6628_v1, 4 }
  0xcb   :  { %787 = vst.msk [vmem:[#allocation2 + $0x34] sm:$0xf] %vm449_vm0, %v768_v29  ;;  %v342_v52 = vpop.permute.xlu1 %341  ;;  %v548_v29 = vshll.u32 %v475_v45, 16  ;;  %v1445_v45 = vld [vmem:[%s8736_s0 + $0x3c] sm:$0xf] }
  0xcc   :  { %1037 = vrot.lane.b32.xlu0 %v1017_v27, %s5810_s25  ;;  %359 = vst.msk [vmem:[#allocation2 + $0x54] sm:$0xf] %vm351_vm14, %v342_v52  ;;  %v1446_v27 = vld [vmem:[%s8736_s0 + $0x40] sm:$0xf]  ;;  %v543_v52 = vrot.slane %v538_v48, 4 }
  0xce   :  { %v816_v59 = vpop.permute.xlu0 %815  ;;  %1087 = vrot.lane.b32.xlu1 %v1066_v18, %s5810_s25  ;;  %v550_v18 = vor.u32 %v548_v29, %v547_v46 }
  0xcf   :  { %835 = vst.msk [vmem:[#allocation2 + $0x34] sm:$0xf] %vm560_vm1, %v816_v59  ;;  %v600_v4 = vpop.permute.xlu1 %599  ;;  %v1548_v44 = vld [vmem:[#allocation2 + $0x3c] sm:$0xff] }
  0xd0   :  { %1291 = vrot.lane.b32.xlu0 %v1271_v42, %s5809_s20  ;;  %616 = vst.msk [vmem:[#allocation2 + $0x58] sm:$0xf] %vm351_vm14, %v600_v4  ;;  %v965_v42 = vshrl.u32 %v903_v28, 16  ;;  %v551_v17 = vsel %vm6039_vm11, %v543_v52, %v550_v18  ;;  %v968_v4 = vshll.u32 %v903_v28, 16  ;;  %v1491_v28 = vld [vmem:[%s8736_s0 + $0x34] sm:$0xf] }
  0xd1   :  { %v1110_v18 = vld [vmem:[%s8736_s0 + $0x28] sm:$0xf] }
  0xd2   :  { %v340_v0 = vpop.permute.xlu0 %339  ;;  %1419 = vrot.lane.b32.xlu1 %v1390_v20, %s5810_s25 }
  0xd3   :  { %358 = vst.msk [vmem:[#allocation2 + $0x48] sm:$0xf] %vm351_vm14, %v340_v0  ;;  %v391_v39 = vpop.permute.xlu1 %390  ;;  %v541_v0 = vor.u32 %v539_v43, %v538_v48  ;;  %v963_v48 = vrot.slane %v6619_v51, 4  ;;  %v1111_v43 = vld [vmem:[%s8736_s0 + $0x2c] sm:$0xf] }
  0xd4   :  { %1085 = vrot.lane.b32.xlu0 %v1065_v62, %s5810_s25  ;;  %408 = vst.msk [vmem:[#allocation2 + $0x54] sm:$0xf] %vm400_vm15, %v391_v39  ;;  %v967_v62 = vrot.slane %v965_v42, 7  ;;  %v1323_v39 = vld [vmem:[%s8736_s0 + $0x48] sm:$0xf] }
  0xd5   :  { %v542_v1 = vsel %vm6039_vm11, %v534_v47, %v541_v0  ;;  %v1332_v52 = vmul.bf16 %v1323_v39, %v6221_v21  ;;  %v1019_v47 = vld [vmem:[%s8736_s0 + $0x40] sm:$0xf]  ;;  %v1274_v0 = vld [vmem:[%s8736_s0 + $0x44] sm:$0xf] }
  0xd6   :  { %v598_v25 = vpop.permute.xlu0 %597  ;;  %v1546_v61 = vld [vmem:[#allocation2 + $0x30] sm:$0xff]  ;;  %1467 = vrot.lane.b32.xlu1 %v1446_v27, %s5814_s19  ;;  %v979_v27 = vor.u32 %v977_v19, %v976_v16  ;;  %v970_v46 = vor.u32 %v968_v4, %v967_v62  ;;  %v1020_v19 = vld [vmem:[%s8736_s0 + $0x44] sm:$0xf] }
  0xd7   :  { %v5679_v37 = vld [vmem:[#allocation2 + $0x34] ss:$12 sps:$4 sm:$0xff]   ;;  %615 = vst.msk [vmem:[#allocation2 + $0x4c] sm:$0xf] %vm351_vm14, %v598_v25  ;;  %v5224_v59 = vcombine.low %v1546_v61, %v1548_v44  ;;  %v648_v50 = vpop.permute.xlu1 %647  ;;  %v1492_v44 = vld [vmem:[%s8736_s0 + $0x38] sm:$0xf] }
  0xd8   :  { %1417 = vrot.lane.b32.xlu0 %v1381_v30, %s5810_s25  ;;  %1911 = vmatprep.mubr.bf16.mxu0 %v5679_v37  ;;  %664 = vst.msk [vmem:[#allocation2 + $0x58] sm:$0xf] %vm400_vm15, %v648_v50  ;;  %v972_v30 = vrot.slane %v967_v62, 4  ;;  %v1322_v37 = vld [vmem:[%s8736_s0 + $0x44] sm:$0xf]  ;;  %v971_v51 = vsel %vm6039_vm11, %v963_v48, %v970_v46  ;;  %v6809_v50 = vmul.bf16 %v1110_v18, %v6003_v31 }
  0xd9   :  { %1912 = vmatmul.mubr.bf16.gmra.mxu0 %v5224_v59  ;;  %v1226_v59 = vld [vmem:[%s8736_s0 + $0x44] sm:$0xf] }
  0xda   :  { %v389_v22 = vpop.permute.xlu0 %388  ;;  %1507 = vrot.lane.b32.xlu1 %v1490_v56, %s5814_s19  ;;  %v980_v61 = vsel %vm6039_vm11, %v972_v30, %v979_v27  ;;  %v1120_v56 = vmul.bf16 %v1111_v43, %v6013_v38  ;;  %v1133_v4 = vshrl.u32 %v6809_v50, 16 }
  0xdb   :  { %407 = vst.msk [vmem:[#allocation2 + $0x48] sm:$0xf] %vm400_vm15, %v389_v22  ;;  %v440_v26 = vpop.permute.xlu1 %439  ;;  %v1225_v22 = vld [vmem:[%s8736_s0 + $0x40] sm:$0xf] }
  0xdc   :  { %1465 = vrot.lane.b32.xlu0 %v1445_v45, %s5814_s19  ;;  %457 = vst.msk [vmem:[#allocation2 + $0x54] sm:$0xf] %vm449_vm0, %v440_v26  ;;  %v1331_v45 = vmul.bf16 %v1322_v37, %v6228_v23  ;;  %v1145_v37 = vshll.u32 %v1120_v56, 16 }
  0xdd   :  { %568 = vst.msk [vmem:[#allocation2 + $0x54] sm:$0xf] %vm560_vm1, %v551_v17  ;;  %v1402_v17 = vshrl.u32 %v1332_v52, 16 }
  0xde   :  { %v646_v20 = vpop.permute.xlu0 %645  ;;  %1511 = vrot.lane.b32.xlu1 %v1492_v44, %s5814_s19  ;;  %v1396_v46 = vshll.u32 %v1331_v45, 16 }
  0xdf   :  { %663 = vst.msk [vmem:[#allocation2 + $0x4c] sm:$0xf] %vm400_vm15, %v646_v20  ;;  %v774_v25 = vpop.permute.xlu1 %773  ;;  %v1142_v20 = vshrl.u32 %v1120_v56, 16  ;;  %v1404_v27 = vrot.slane %v1402_v17, 7  ;;  %v1136_v17 = vshll.u32 %v6809_v50, 16 }
  0xe0   :  { %1505 = vrot.lane.b32.xlu0 %v1489_v53, %s5814_s19  ;;  %790 = vst.msk [vmem:[#allocation2 + $0x58] sm:$0xf] %vm449_vm0, %v774_v25  ;;  %v1393_v53 = vshrl.u32 %v1331_v45, 16  ;;  %v1135_v25 = vrot.slane %v1133_v4, 7  ;;  %v1068_v45 = vld [vmem:[%s8736_s0 + $0x44] sm:$0xf] }
  0xe2   :  { %v438_v29 = vpop.permute.xlu0 %437  ;;  %995 = vrot.lane.b32.xlu1 %v980_v61, %s5814_s19  ;;  %v1395_v30 = vrot.slane %v1393_v53, 7  ;;  %v6836_v61 = vrot.slane %v1142_v20, 7 }
  0xe3   :  { %456 = vst.msk [vmem:[#allocation2 + $0x48] sm:$0xf] %vm449_vm0, %v438_v29  ;;  %v822_v55 = vpop.permute.xlu1 %821  ;;  %v1273_v29 = vld [vmem:[%s8736_s0 + $0x40] sm:$0xf] }
  0xe4   :  { %567 = vst.msk [vmem:[#allocation2 + $0x48] sm:$0xf] %vm560_vm1, %v542_v1  ;;  %1509 = vrot.lane.b32.xlu0 %v1491_v28, %s5814_s19  ;;  %838 = vst.msk [vmem:[#allocation2 + $0x58] sm:$0xf] %vm560_vm1, %v822_v55  ;;  %v1405_v1 = vshll.u32 %v1332_v52, 16  ;;  %v1400_v52 = vrot.slane %v1395_v30, 4  ;;  %v1398_v56 = vor.u32 %v1396_v46, %v1395_v30 }
  0xe5   :  { %v1109_v28 = vld [vmem:[%s8736_s0 + $0x24] sm:$0x8] }
  0xe6   :  { %v772_v42 = vpop.permute.xlu0 %771  ;;  %1249 = vrot.lane.b32.xlu1 %v1226_v59, %s5809_s20  ;;  %v1118_v39 = vmul.bf16 %v1109_v28, %v5957_v54  ;;  %v1407_v18 = vor.u32 %v1405_v1, %v1404_v27  ;;  %v1448_v27 = vld [vmem:[%s8736_s0 + $0x48] sm:$0xf]  ;;  %v1447_v28 = vld [vmem:[%s8736_s0 + $0x44] sm:$0xf] }
  0xe7   :  { %789 = vst.msk [vmem:[#allocation2 + $0x4c] sm:$0xf] %vm449_vm0, %v772_v42  ;;  %v984_v16 = vpop.permute.xlu1 %983 }
  0xe8   :  { %993 = vrot.lane.b32.xlu0 %v971_v51, %s5814_s19  ;;  %1006 = vst.msk [vmem:[#allocation2 + $0x6c] sm:$0xf] %vm351_vm14, %v984_v16  ;;  %v1140_v16 = vrot.slane %v1135_v25, 4  ;;  %v1128_v53 = vshrl.u32 %v1118_v39, 16  ;;  %v1408_v4 = vsel %vm6039_vm11, %v1400_v52, %v1407_v18  ;;  %v1112_v18 = vld [vmem:[%s8736_s0 + $0x30] sm:$0xf] }
  0xea   :  { %v820_v62 = vpop.permute.xlu0 %819  ;;  %1043 = vrot.lane.b32.xlu1 %v1020_v19, %s5810_s25  ;;  %v1147_v19 = vor.u32 %v1145_v37, %v6836_v61  ;;  %v5216_v50 = vrot.slane %v1128_v53, 11 }
  0xeb   :  { %837 = vst.msk [vmem:[#allocation2 + $0x4c] sm:$0xf] %vm560_vm1, %v820_v62  ;;  %v1238_v44 = vpop.permute.xlu1 %1237  ;;  %v1552_v48 = vld [vmem:[#allocation2 + $0x54] sm:$0xff]  ;;  %v1067_v62 = vld [vmem:[%s8736_s0 + $0x40] sm:$0xf] }
  0xec   :  { %1247 = vrot.lane.b32.xlu0 %v1225_v22, %s5809_s20  ;;  %1260 = vst.msk [vmem:[#allocation2 + $0x70] sm:$0xf] %vm351_vm14, %v1238_v44  ;;  %v1391_v22 = vrot.slane %v6689_v3, 4  ;;  %v1148_v20 = vsel %vm6039_vm11, %v1140_v16, %v1147_v19 }
  0xee   :  { %v982_v26 = vpop.permute.xlu0 %981  ;;  %1297 = vrot.lane.b32.xlu1 %v1274_v0, %s5809_s20  ;;  %v1399_v3 = vsel %vm6039_vm11, %v1391_v22, %v1398_v56  ;;  %v1121_v22 = vmul.bf16 %v1112_v18, %v6032_v63 }
  0xef   :  { %1005 = vst.msk [vmem:[#allocation2 + $0x60] sm:$0xf] %vm351_vm14, %v982_v26  ;;  %v1032_v59 = vpop.permute.xlu1 %1031  ;;  %v1138_v26 = vor.u32 %v1136_v17, %v1135_v25  ;;  %v1493_v25 = vld [vmem:[%s8736_s0 + $0x3c] sm:$0xf] }
  0xf0   :  { %1041 = vrot.lane.b32.xlu0 %v1019_v47, %s5810_s25  ;;  %1054 = vst.msk [vmem:[#allocation2 + $0x6c] sm:$0xf] %vm400_vm15, %v1032_v59  ;;  %v1151_v17 = vshrl.u32 %v1121_v22, 16 }
  0xf1   :  { %v1139_v1 = vsel %vm6039_vm11, %v5216_v50, %v1138_v26 }
  0xf2   :  { %v1236_v51 = vpop.permute.xlu0 %1235  ;;  %v1550_v42 = vld [vmem:[#allocation2 + $0x48] sm:$0xff]  ;;  %1091 = vrot.lane.b32.xlu1 %v1068_v45, %s5810_s25  ;;  %v1153_v26 = vrot.slane %v1151_v17, 7 }
  0xf3   :  { %v5681_v55 = vld [vmem:[#allocation2 + $0x4c] ss:$12 sps:$4 sm:$0xff]   ;;  %1259 = vst.msk [vmem:[#allocation2 + $0x64] sm:$0xf] %vm351_vm14, %v1236_v51  ;;  %v5227_v43 = vcombine.low %v1550_v42, %v1552_v48  ;;  %v1286_v0 = vpop.permute.xlu1 %1285  ;;  %v1496_v51 = vld [vmem:[%s8736_s0 + $0x48] sm:$0xf] }
  0xf4   :  { %1295 = vrot.lane.b32.xlu0 %v1273_v29, %s5809_s20  ;;  %1919 = vmatprep.mubr.bf16.mxu0 %v5681_v55  ;;  %1308 = vst.msk [vmem:[#allocation2 + $0x70] sm:$0xf] %vm400_vm15, %v1286_v0  ;;  %v1494_v29 = vld [vmem:[%s8736_s0 + $0x40] sm:$0xf]  ;;  %v1495_v42 = vld [vmem:[%s8736_s0 + $0x44] sm:$0xf] }
  0xf5   :  { %1920 = vmatmul.mubr.bf16.gmra.mxu0 %v5227_v43  ;;  %v1113_v43 = vld [vmem:[%s8736_s0 + $0x34] sm:$0xf] }
  0xf6   :  { %v1030_v47 = vpop.permute.xlu0 %1029  ;;  %1423 = vrot.lane.b32.xlu1 %v1408_v4, %s5810_s25  ;;  %v1122_v56 = vmul.bf16 %v1113_v43, %v6056_v24 }
  0xf7   :  { %1053 = vst.msk [vmem:[#allocation2 + $0x60] sm:$0xf] %vm400_vm15, %v1030_v47  ;;  %v1080_v30 = vpop.permute.xlu1 %1079 }
  0xf8   :  { %1089 = vrot.lane.b32.xlu0 %v1067_v62, %s5810_s25  ;;  %1102 = vst.msk [vmem:[#allocation2 + $0x6c] sm:$0xf] %vm449_vm0, %v1080_v30  ;;  %v1160_v47 = vshrl.u32 %v1122_v56, 16  ;;  %v1163_v30 = vshll.u32 %v1122_v56, 16 }
  0xf9   :  { %1212 = vst.msk [vmem:[#allocation2 + $0x6c] sm:$0xf] %vm560_vm1, %v1148_v20 }
  0xfa   :  { %v1284_v44 = vpop.permute.xlu0 %1283  ;;  %1471 = vrot.lane.b32.xlu1 %v1448_v27, %s5814_s19 }
  0xfb   :  { %1307 = vst.msk [vmem:[#allocation2 + $0x64] sm:$0xf] %vm400_vm15, %v1284_v44  ;;  %v6914_v44 = vrot.slane %v1160_v47, 7 }
  0xfc   :  { %1421 = vrot.lane.b32.xlu0 %v1399_v3, %s5810_s25  ;;  %v1412_v46 = vpop.permute.xlu1 %1411 }
  0xfd   :  { %1434 = vst.msk [vmem:[#allocation2 + $0x70] sm:$0xf] %vm449_vm0, %v1412_v46  ;;  %v1165_v46 = vor.u32 %v1163_v30, %v6914_v44 }
  0xfe   :  { %v1078_v48 = vpop.permute.xlu0 %1077  ;;  %1515 = vrot.lane.b32.xlu1 %v1494_v29, %s5814_s19  ;;  %v1154_v29 = vshll.u32 %v1121_v22, 16 }
  0xff   :  { %1101 = vst.msk [vmem:[#allocation2 + $0x60] sm:$0xf] %vm449_vm0, %v1078_v48  ;;  %v1158_v48 = vrot.slane %v1153_v26, 4 }
 0x100   :  { %1211 = vst.msk [vmem:[#allocation2 + $0x60] sm:$0xf] %vm560_vm1, %v1139_v1  ;;  %1469 = vrot.lane.b32.xlu0 %v1447_v28, %s5814_s19  ;;  %v858_v39 = vpop.permute.xlu1 %857 }
 0x101   :  { %880 = vst.msk [vmem:[#allocation2 + $0x14] sm:$0xf] %vm351_vm14, %v858_v39  ;;  %v1166_v39 = vsel %vm6039_vm11, %v1158_v48, %v1165_v46 }
 0x102   :  { %v1410_v37 = vpop.permute.xlu0 %1409  ;;  %1519 = vrot.lane.b32.xlu1 %v1496_v51, %s5814_s19  ;;  %v1149_v51 = vrot.slane %v6836_v61, 4 }
 0x103   :  { %1433 = vst.msk [vmem:[#allocation2 + $0x64] sm:$0xf] %vm449_vm0, %v1410_v37 }
 0x104   :  { %1513 = vrot.lane.b32.xlu0 %v1493_v25, %s5814_s19  ;;  %v1460_v59 = vpop.permute.xlu1 %1459 }
 0x105   :  { %1482 = vst.msk [vmem:[#allocation2 + $0x70] sm:$0xf] %vm560_vm1, %v1460_v59 }
 0x106   :  { %v856_v55 = vpop.permute.xlu0 %855 }
 0x107   :  { %879 = vst.msk [vmem:[#allocation2 + $0x8] sm:$0xf] %vm351_vm14, %v856_v55 }
 0x108   :  { %1517 = vrot.lane.b32.xlu0 %v1495_v42, %s5814_s19  ;;  %v862_v52 = vpop.permute.xlu1 %861  ;;  %v1156_v42 = vor.u32 %v1154_v29, %v1153_v26 }
 0x109   :  { %882 = vst.msk [vmem:[#allocation2 + $0x2c] sm:$0xf] %vm351_vm14, %v862_v52 }
 0x10a   :  { %v1458_v45 = vpop.permute.xlu0 %1457 }
 0x10b   :  { %1481 = vst.msk [vmem:[#allocation2 + $0x64] sm:$0xf] %vm560_vm1, %v1458_v45  ;;  %v1157_v45 = vsel %vm6039_vm11, %v1149_v51, %v1156_v42 }
 0x10c   :  { %v988_v19 = vpop.permute.xlu1 %987  ;;  %v1556_v53 = vld [vmem:[#allocation2 + $0x6c] sm:$0xff] }
 0x10d   :  { %1008 = vst.msk [vmem:[#allocation2 + $0x84] sm:$0xf] %vm351_vm14, %v988_v19  ;;  %v1114_v19 = vld [vmem:[%s8736_s0 + $0x38] sm:$0xf] }
 0x10e   :  { %v860_v62 = vpop.permute.xlu0 %859  ;;  %v5684_v16 = vld [vmem:[#allocation2 + $0x8] ss:$12 sps:$4 sm:$0xff]  }
 0x10f   :  { %881 = vst.msk [vmem:[#allocation2 + $0x20] sm:$0xf] %vm351_vm14, %v860_v62  ;;  %5608 = vmatprep.mubr.msk.bf16.mxu1 %vm1838_vm2, %v5684_v16 }
 0x110   :  { %v1242_v20 = vpop.permute.xlu1 %1241 }
 0x111   :  { %1262 = vst.msk [vmem:[#allocation2 + $0x88] sm:$0xf] %vm351_vm14, %v1242_v20 }
 0x112   :  { %v986_v0 = vpop.permute.xlu0 %985  ;;  %v1554_v4 = vld [vmem:[#allocation2 + $0x60] sm:$0xff] }
 0x113   :  { %v5685_v3 = vld [vmem:[#allocation2 + $0x64] ss:$12 sps:$4 sm:$0xff]   ;;  %1007 = vst.msk [vmem:[#allocation2 + $0x78] sm:$0xf] %vm351_vm14, %v986_v0  ;;  %v5230_v50 = vcombine.low %v1554_v4, %v1556_v53  ;;  %v1115_v53 = vld [vmem:[%s8736_s0 + $0x3c] sm:$0xf]  ;;  %v1123_v0 = vmul.bf16 %v1114_v19, %v6147_v49 }
 0x114   :  { %1927 = vmatprep.mubr.bf16.mxu0 %v5685_v3  ;;  %v1036_v28 = vpop.permute.xlu1 %1035  ;;  %v1124_v4 = vmul.bf16 %v1115_v53, %v6165_v60 }
 0x115   :  { %1928 = vmatmul.mubr.bf16.gmra.mxu0 %v5230_v50  ;;  %1056 = vst.msk [vmem:[#allocation2 + $0x84] sm:$0xf] %vm400_vm15, %v1036_v28  ;;  %v1172_v42 = vshll.u32 %v1123_v0, 16 }
 0x116   :  { %v1240_v27 = vpop.permute.xlu0 %1239  ;;  %v5688_v1 = vld [vmem:[#allocation2 + $0x20] ss:$12 sps:$4 sm:$0xff]   ;;  %v1181_v46 = vshll.u32 %v1124_v4, 16 }
 0x117   :  { %1261 = vst.msk [vmem:[#allocation2 + $0x7c] sm:$0xf] %vm351_vm14, %v1240_v27  ;;  %5609 = vmatmul.mubr.msk.bf16.vlgmr.msra.gmra.mxu1 %vm1838_vm2, %v5688_v1  ;;  %v1169_v27 = vshrl.u32 %v1123_v0, 16  ;;  %v1178_v1 = vshrl.u32 %v1124_v4, 16 }
 0x118   :  { %v1290_v37 = vpop.permute.xlu1 %1289 }
 0x119   :  { %1310 = vst.msk [vmem:[#allocation2 + $0x88] sm:$0xf] %vm400_vm15, %v1290_v37  ;;  %v1171_v37 = vrot.slane %v1169_v27, 7 }
 0x11a   :  { %v1034_v25 = vpop.permute.xlu0 %1033 }
 0x11b   :  { %1055 = vst.msk [vmem:[#allocation2 + $0x78] sm:$0xf] %vm400_vm15, %v1034_v25 }
 0x11c   :  { %v1084_v59 = vpop.permute.xlu1 %1083 }
 0x11d   :  { %1104 = vst.msk [vmem:[#allocation2 + $0x84] sm:$0xf] %vm449_vm0, %v1084_v59  ;;  %v1176_v59 = vrot.slane %v1171_v37, 4 }
 0x11e   :  { %v1288_v55 = vpop.permute.xlu0 %1287  ;;  %1214 = vst.msk [vmem:[#allocation2 + $0x84] sm:$0xf] %vm560_vm1, %v1166_v39  ;;  %v6952_v39 = vrot.slane %v1178_v1, 7 }
 0x11f   :  { %1309 = vst.msk [vmem:[#allocation2 + $0x7c] sm:$0xf] %vm400_vm15, %v1288_v55 }
 0x120   :  { %v1416_v18 = vpop.permute.xlu1 %1415 }
 0x121   :  { %1436 = vst.msk [vmem:[#allocation2 + $0x88] sm:$0xf] %vm449_vm0, %v1416_v18  ;;  %v1167_v18 = vrot.slane %v6914_v44, 4 }
 0x122   :  { %v1082_v52 = vpop.permute.xlu0 %1081 }
 0x123   :  { %1103 = vst.msk [vmem:[#allocation2 + $0x78] sm:$0xf] %vm449_vm0, %v1082_v52 }
 0x124   :  { %1213 = vst.msk [vmem:[#allocation2 + $0x78] sm:$0xf] %vm560_vm1, %v1157_v45  ;;  %v866_v43 = vpop.permute.xlu1 %865  ;;  %v1183_v45 = vor.u32 %v1181_v46, %v6952_v39 }
 0x125   :  { %884 = vst.msk [vmem:[#allocation2 + $0x44] sm:$0xf] %vm351_vm14, %v866_v43 }
 0x126   :  { %v1414_v61 = vpop.permute.xlu0 %1413 }
 0x127   :  { %1435 = vst.msk [vmem:[#allocation2 + $0x7c] sm:$0xf] %vm449_vm0, %v1414_v61  ;;  %v1174_v61 = vor.u32 %v1172_v42, %v1171_v37 }
 0x128   :  { %v1464_v56 = vpop.permute.xlu1 %1463 }
 0x129   :  { %1484 = vst.msk [vmem:[#allocation2 + $0x88] sm:$0xf] %vm560_vm1, %v1464_v56 }
 0x12a   :  { %v864_v22 = vpop.permute.xlu0 %863 }
 0x12b   :  { %883 = vst.msk [vmem:[#allocation2 + $0x38] sm:$0xf] %vm351_vm14, %v864_v22  ;;  %v1184_v22 = vsel %vm6039_vm11, %v1176_v59, %v1183_v45 }
 0x12c   :  { %v870_v16 = vpop.permute.xlu1 %869 }
 0x12d   :  { %886 = vst.msk [vmem:[#allocation2 + $0x5c] sm:$0xf] %vm351_vm14, %v870_v16 }
 0x12e   :  { %v1462_v62 = vpop.permute.xlu0 %1461 }
 0x12f   :  { %1483 = vst.msk [vmem:[#allocation2 + $0x7c] sm:$0xf] %vm560_vm1, %v1462_v62  ;;  %v1175_v62 = vsel %vm6039_vm11, %v1167_v18, %v1174_v61 }
 0x130   :  { %v992_v3 = vpop.permute.xlu1 %991  ;;  %v1560_v20 = vld [vmem:[#allocation2 + $0x84] sm:$0xff] }
 0x131   :  { %1010 = vst.msk [vmem:[#allocation2 + $0x9c] sm:$0xf] %vm351_vm14, %v992_v3  ;;  %v1116_v3 = vld [vmem:[%s8736_s0 + $0x40] sm:$0xf] }
 0x132   :  { %v868_v17 = vpop.permute.xlu0 %867  ;;  %v5689_v47 = vld [vmem:[#allocation2 + $0x38] ss:$12 sps:$4 sm:$0xff]   ;;  %v1125_v1 = vmul.bf16 %v1116_v3, %v6228_v23 }
 0x133   :  { %885 = vst.msk [vmem:[#allocation2 + $0x50] sm:$0xf] %vm351_vm14, %v868_v17  ;;  %5612 = vmatprep.mubr.msk.bf16.mxu1 %vm1838_vm2, %v5689_v47 }
 0x134   :  { %v1246_v28 = vpop.permute.xlu1 %1245  ;;  %v1187_v37 = vshrl.u32 %v1125_v1, 16 }
 0x135   :  { %1264 = vst.msk [vmem:[#allocation2 + $0xa0] sm:$0xf] %vm351_vm14, %v1246_v28 }
 0x136   :  { %v990_v50 = vpop.permute.xlu0 %989  ;;  %v1558_v26 = vld [vmem:[#allocation2 + $0x78] sm:$0xff] }
 0x137   :  { %v5690_v30 = vld [vmem:[#allocation2 + $0x7c] ss:$12 sps:$4 sm:$0xff]   ;;  %1009 = vst.msk [vmem:[#allocation2 + $0x90] sm:$0xf] %vm351_vm14, %v990_v50  ;;  %v5233_v48 = vcombine.low %v1558_v26, %v1560_v20  ;;  %v1117_v20 = vld [vmem:[%s8736_s0 + $0x44] sm:$0xf] }
 0x138   :  { %1935 = vmatprep.mubr.bf16.mxu0 %v5690_v30  ;;  %v1040_v51 = vpop.permute.xlu1 %1039  ;;  %v1126_v28 = vmul.bf16 %v1117_v20, %v6221_v21 }
 0x139   :  { %1936 = vmatmul.mubr.bf16.gmra.mxu0 %v5233_v48  ;;  %1058 = vst.msk [vmem:[#allocation2 + $0x9c] sm:$0xf] %vm400_vm15, %v1040_v51 }
 0x13a   :  { %v1244_v29 = vpop.permute.xlu0 %1243  ;;  %v5692_v25 = vld [vmem:[#allocation2 + $0x50] ss:$12 sps:$4 sm:$0xff]   ;;  %v1196_v51 = vshrl.u32 %v1126_v28, 16 }
 0x13b   :  { %1263 = vst.msk [vmem:[#allocation2 + $0x94] sm:$0xf] %vm351_vm14, %v1244_v29  ;;  %5613 = vmatmul.mubr.msk.bf16.gmra.mxu1 %vm1838_vm2, %v5692_v25 }
 0x13c   :  { %v1294_v52 = vpop.permute.xlu1 %1293  ;;  %v1198_v18 = vrot.slane %v1196_v51, 7 }
 0x13d   :  { %1312 = vst.msk [vmem:[#allocation2 + $0xa0] sm:$0xf] %vm400_vm15, %v1294_v52  ;;  %v1189_v52 = vrot.slane %v1187_v37, 7 }
 0x13e   :  { %v1038_v55 = vpop.permute.xlu0 %1037 }
 0x13f   :  { %1057 = vst.msk [vmem:[#allocation2 + $0x90] sm:$0xf] %vm400_vm15, %v1038_v55  ;;  %v1199_v55 = vshll.u32 %v1126_v28, 16 }
 0x140   :  { %v1088_v56 = vpop.permute.xlu1 %1087 }
 0x141   :  { %1106 = vst.msk [vmem:[#allocation2 + $0x9c] sm:$0xf] %vm449_vm0, %v1088_v56  ;;  %v1194_v56 = vrot.slane %v1189_v52, 4 }
 0x142   :  { %v1292_v43 = vpop.permute.xlu0 %1291  ;;  %1216 = vst.msk [vmem:[#allocation2 + $0x9c] sm:$0xf] %vm560_vm1, %v1184_v22 }
 0x143   :  { %1311 = vst.msk [vmem:[#allocation2 + $0x94] sm:$0xf] %vm400_vm15, %v1292_v43  ;;  %v1190_v43 = vshll.u32 %v1125_v1, 16 }
 0x144   :  { %v1420_v19 = vpop.permute.xlu1 %1419 }
 0x145   :  { %1438 = vst.msk [vmem:[#allocation2 + $0xa0] sm:$0xf] %vm449_vm0, %v1420_v19  ;;  %v1185_v19 = vrot.slane %v6952_v39, 4 }
 0x146   :  { %v1086_v16 = vpop.permute.xlu0 %1085 }
 0x147   :  { %1105 = vst.msk [vmem:[#allocation2 + $0x90] sm:$0xf] %vm449_vm0, %v1086_v16 }
 0x148   :  { %1215 = vst.msk [vmem:[#allocation2 + $0x90] sm:$0xf] %vm560_vm1, %v1175_v62  ;;  %v1468_v53 = vpop.permute.xlu1 %1467  ;;  %v1201_v62 = vor.u32 %v1199_v55, %v1198_v18 }
 0x149   :  { %1486 = vst.msk [vmem:[#allocation2 + $0xa0] sm:$0xf] %vm560_vm1, %v1468_v53 }
 0x14a   :  { %v1418_v44 = vpop.permute.xlu0 %1417 }
 0x14b   :  { %1437 = vst.msk [vmem:[#allocation2 + $0x94] sm:$0xf] %vm449_vm0, %v1418_v44  ;;  %v1192_v44 = vor.u32 %v1190_v43, %v1189_v52 }
 0x14c   :  { %v1508_v47 = vpop.permute.xlu1 %1507 }
 0x14d   :  { %1530 = vst.msk [vmem:[#allocation2 + $0x74] sm:$0xf] %vm351_vm14, %v1508_v47 }
 0x14e   :  { %v1466_v17 = vpop.permute.xlu0 %1465 }
 0x14f   :  { %1485 = vst.msk [vmem:[#allocation2 + $0x94] sm:$0xf] %vm560_vm1, %v1466_v17  ;;  %v1202_v17 = vsel %vm6039_vm11, %v1194_v56, %v1201_v62 }
 0x150   :  { %v1512_v4 = vpop.permute.xlu1 %1511  ;;  %v1564_v50 = vld [vmem:[#allocation2 + $0x9c] sm:$0xff] }
 0x151   :  { %1532 = vst.msk [vmem:[#allocation2 + $0x8c] sm:$0xf] %vm351_vm14, %v1512_v4 }
 0x152   :  { %v1506_v0 = vpop.permute.xlu0 %1505 }
 0x153   :  { %1529 = vst.msk [vmem:[#allocation2 + $0x68] sm:$0xf] %vm351_vm14, %v1506_v0  ;;  %v1193_v0 = vsel %vm6039_vm11, %v1185_v19, %v1192_v44 }
 0x154   :  { %v996_v48 = vpop.permute.xlu1 %995 }
 0x155   :  { %1012 = vst.msk [vmem:[#allocation2 + $0xb4] sm:$0xf] %vm351_vm14, %v996_v48 }
 0x156   :  { %v1510_v26 = vpop.permute.xlu0 %1509  ;;  %v1562_v30 = vld [vmem:[#allocation2 + $0x90] sm:$0xff] }
 0x157   :  { %v5693_v27 = vld [vmem:[#allocation2 + $0x94] ss:$12 sps:$4 sm:$0xff]   ;;  %1531 = vst.msk [vmem:[#allocation2 + $0x80] sm:$0xf] %vm351_vm14, %v1510_v26  ;;  %v5236_v46 = vcombine.low %v1562_v30, %v1564_v50 }
 0x158   :  { %1943 = vmatprep.mubr.bf16.mxu0 %v5693_v27  ;;  %v1250_v42 = vpop.permute.xlu1 %1249 }
 0x159   :  { %1944 = vmatmul.mubr.bf16.gmra.mxu0 %v5236_v46  ;;  %1266 = vst.msk [vmem:[#allocation2 + $0xb8] sm:$0xf] %vm351_vm14, %v1250_v42 }
 0x15a   :  { %v994_v29 = vpop.permute.xlu0 %993  ;;  %v5695_v25 = vld [vmem:[#allocation2 + $0x68] ss:$12 sps:$4 sm:$0xff]  }
 0x15b   :  { %1011 = vst.msk [vmem:[#allocation2 + $0xa8] sm:$0xf] %vm351_vm14, %v994_v29  ;;  %5616 = vmatprep.mubr.msk.bf16.mxu1 %vm1838_vm2, %v5695_v25 }
 0x15c   :  { %v1044_v61 = vpop.permute.xlu1 %1043 }
 0x15d   :  { %1060 = vst.msk [vmem:[#allocation2 + $0xb4] sm:$0xf] %vm400_vm15, %v1044_v61 }
 0x15e   :  { %v1248_v59 = vpop.permute.xlu0 %1247  ;;  %v5696_v45 = vld [vmem:[#allocation2 + $0x80] ss:$12 sps:$4 sm:$0xff]  }
 0x15f   :  { %1265 = vst.msk [vmem:[#allocation2 + $0xac] sm:$0xf] %vm351_vm14, %v1248_v59  ;;  %5617 = vmatmul.mubr.msk.bf16.gmra.mxu1 %vm1838_vm2, %v5696_v45 }
 0x160   :  { %v1298_v16 = vpop.permute.xlu1 %1297 }
 0x161   :  { %1314 = vst.msk [vmem:[#allocation2 + $0xb8] sm:$0xf] %vm400_vm15, %v1298_v16 }
 0x162   :  { %v1042_v22 = vpop.permute.xlu0 %1041 }
 0x163   :  { %1059 = vst.msk [vmem:[#allocation2 + $0xa8] sm:$0xf] %vm400_vm15, %v1042_v22 }
 0x164   :  { %v1092_v47 = vpop.permute.xlu1 %1091 }
 0x165   :  { %1108 = vst.msk [vmem:[#allocation2 + $0xb4] sm:$0xf] %vm449_vm0, %v1092_v47  ;;  %v5406_v25 = vpop.f32.mrf.mxu0 }
 0x166   :  { %v1296_v53 = vpop.permute.xlu0 %1295  ;;  %1218 = vst.msk [vmem:[#allocation2 + $0xb4] sm:$0xf] %vm560_vm1, %v1202_v17 }
 0x167   :  { %1313 = vst.msk [vmem:[#allocation2 + $0xac] sm:$0xf] %vm400_vm15, %v1296_v53  ;;  %v5407_v37 = vpop.f32.mrf.mxu0 }
 0x168   :  { %v1424_v3 = vpop.permute.xlu1 %1423 }
 0x169   :  { %1440 = vst.msk [vmem:[#allocation2 + $0xb8] sm:$0xf] %vm449_vm0, %v1424_v3  ;;  %v5409_v51 = vpop.f32.mrf.mxu0  ;;  %v8746_v3 = vsub.s32 0, %v5863_v5 }
 0x16a   :  { %v1090_v4 = vpop.permute.xlu0 %1089 }
 0x16b   :  { %1107 = vst.msk [vmem:[#allocation2 + $0xa8] sm:$0xf] %vm449_vm0, %v1090_v4  ;;  %v5410_v42 = vpop.f32.mrf.mxu0 }
 0x16c   :  { %1217 = vst.msk [vmem:[#allocation2 + $0xa8] sm:$0xf] %vm560_vm1, %v1193_v0  ;;  %v1472_v20 = vpop.permute.xlu1 %1471 }
 0x16d   :  { %1488 = vst.msk [vmem:[#allocation2 + $0xb8] sm:$0xf] %vm560_vm1, %v1472_v20 }
 0x16e   :  { %v1422_v39 = vpop.permute.xlu0 %1421 }
 0x16f   :  { %1439 = vst.msk [vmem:[#allocation2 + $0xac] sm:$0xf] %vm449_vm0, %v1422_v39  ;;  %v7019_v39 = vld [vmem:[%s8738_s2] sm:$0x7] }
 0x170   :  { %v1516_v26 = vpop.permute.xlu1 %1515 }
 0x171   :  { %1534 = vst.msk [vmem:[#allocation2 + $0xa4] sm:$0xf] %vm351_vm14, %v1516_v26 }
 0x172   :  { %v1470_v50 = vpop.permute.xlu0 %1469 }
 0x173   :  { %1487 = vst.msk [vmem:[#allocation2 + $0xac] sm:$0xf] %vm560_vm1, %v1470_v50  ;;  %v5699_v48 = vld [vmem:[#allocation2 + $0xa8] ss:$12 sps:$4 sm:$0xff]   ;;  %v5411_v50 = vadd.f32 %v5410_v42, %v5409_v51 }
 0x174   :  { %v1520_v27 = vpop.permute.xlu1 %1519 }
 0x175   :  { %1536 = vst.msk [vmem:[#allocation2 + $0xbc] sm:$0xf] %vm351_vm14, %v1520_v27  ;;  %v5408_v27 = vadd.f32 %v5407_v37, %v5406_v25 }
 0x176   :  { %v1514_v30 = vpop.permute.xlu0 %1513 }
 0x177   :  { %1533 = vst.msk [vmem:[#allocation2 + $0x98] sm:$0xf] %vm351_vm14, %v1514_v30 }
 0x17a   :  { %v1518_v1 = vpop.permute.xlu0 %1517  ;;  %v5697_v28 = vld [vmem:[#allocation2 + $0xac] ss:$12 sps:$4 sm:$0xff]  }
 0x17b   :  { %1535 = vst.msk [vmem:[#allocation2 + $0xb0] sm:$0xf] %vm351_vm14, %v1518_v1  ;;  %1951 = vmatprep.mubr.bf16.mxu0 %v5697_v28  ;;  %v7024_v1 = vrot.slane %v7019_v39, %v8746_v3  ;;  %vm2429_vm14 = vcmask 1043968  }
 0x17c   :  { %1952 = vmatmul.mubr.bf16.gmra.mxu0 %v5699_v48 }
 0x17d   :  { %v5412_v55 = vpop.f32.mrf.mxu0  ;;  %v1901_v48 = vadd.f32 %v5411_v50, %v7024_v1  ;;  %v1898_v41 = vadd.f32 %v5408_v27, %v7024_v1 }
 0x17e   :  { %v5700_v46 = vld [vmem:[#allocation2 + $0x98] ss:$12 sps:$4 sm:$0xff]  }
 0x17f   :  { %5620 = vmatprep.mubr.msk.bf16.mxu1 %vm1838_vm2, %v5700_v46  ;;  %v5413_v59 = vpop.f32.mrf.mxu0 }
 0x181   :  { %v5415_v45 = vpop.f32.mrf.mxu0 }
 0x182   :  { %v5701_v29 = vld [vmem:[#allocation2 + $0xb0] ss:$12 sps:$4 sm:$0xff]  }
 0x183   :  { %5621 = vmatmul.mubr.msk.bf16.gmra.mxu1 %vm1838_vm2, %v5701_v29  ;;  %v5416_v52 = vpop.f32.mrf.mxu0  ;;  %v5414_v29 = vadd.f32 %v5413_v59, %v5412_v55 }
 0x184   :  { %v5417_v42 = vadd.f32 %v5416_v52, %v5415_v45 }
 0x185   :  { %v1906_v37 = vadd.f32 %v5414_v29, %v7024_v1 }
 0x186   :  { %v1909_v59 = vadd.f32 %v5417_v42, %v7024_v1 }
 0x199   :  { %v5418_v18 = vpop.f32.mrf.mxu0 }
 0x19b   :  { %v5419_v61 = vpop.f32.mrf.mxu0 }
 0x19c   :  { %v5420_v25 = vadd.f32 %v5419_v61, %v5418_v18 }
 0x19d   :  { %v5421_v43 = vpop.f32.mrf.mxu0 }
 0x19f   :  { %v5422_v22 = vpop.f32.mrf.mxu0 }
 0x1a0   :  { %v5423_v9 = vadd.f32 %v5422_v22, %v5421_v43 }
 0x1a2   :  { %v1917_v18 = vadd.f32 %v5423_v9, %v7024_v1 }
 0x1b5   :  { %v5424_v56 = vpop.f32.mrf.mxu0 }
 0x1b7   :  { %v5425_v62 = vpop.f32.mrf.mxu0 }
 0x1b8   :  { %v5426_v43 = vadd.f32 %v5425_v62, %v5424_v56 }
 0x1b9   :  { %v5427_v16 = vpop.f32.mrf.mxu0 }
 0x1bb   :  { %v5428_v19 = vpop.f32.mrf.mxu0 }
 0x1d5   :  { %v5430_v53 = vpop.f32.mrf.mxu0 }
 0x1d7   :  { %v5610_v44 = vpop.f32.mrf.mxu1  ;;  %v5431_v47 = vpop.f32.mrf.mxu0 }
 0x1d8   :  { %v7035_v50 = vadd.f32 %v5610_v44, %v1906_v37 }
 0x1d9   :  { %v1994_v17 = vpop.f32.mrf.mxu1  ;;  %v5433_v4 = vpop.f32.mrf.mxu0 }
 0x1da   :  { %v7030_v13 = vadd.f32 %v1994_v17, %v1898_v41  ;;  %v1914_v41 = vadd.f32 %v5420_v25, %v7024_v1 }
 0x1db   :  { %v5611_v0 = vpop.f32.mrf.mxu1  ;;  %v5434_v26 = vpop.f32.mrf.mxu0 }
 0x1dc   :  { %v7040_v45 = vadd.f32 %v5611_v0, %v1909_v59  ;;  %v5429_v0 = vadd.f32 %v5428_v19, %v5427_v16  ;;  %v5435_v25 = vadd.f32 %v5434_v26, %v5433_v4 }
 0x1dd   :  { %v1997_v20 = vpop.f32.mrf.mxu1 }
 0x1de   :  { %v7028_v40 = vadd.f32 %v1997_v20, %v1901_v48  ;;  %v5815_v48 = vmov 0   ;;  %v1933_v4 = vadd.f32 %v5435_v25, %v7024_v1 }
 0x1df   :  { %2202 = vst.msk [vmem:[#allocation4 + $0x4] sm:$0xf] %vm2200_vm3, %v5815_v48  ;;  %2278 = vst.msk [vmem:[#allocation4 + $0x54] sm:$0xf] %vm2200_vm3, %v5815_v48 }
 0x1e0   :  { %v2057_v3 = vadd.f32 %v7028_v40, %v7030_v13  ;;  %2201 = vst.msk [vmem:[#allocation4] sm:$0xf] %vm2200_vm3, %v5815_v48  ;;  %2239 = vst.msk [vmem:[#allocation4 + $0x28] sm:$0xf] %vm2200_vm3, %v5815_v48 }
 0x1e1   :  { %2240 = vst.msk [vmem:[#allocation4 + $0x2c] sm:$0xf] %vm2200_vm3, %v5815_v48  ;;  %2277 = vst.msk [vmem:[#allocation4 + $0x50] sm:$0xf] %vm2200_vm3, %v5815_v48 }
 0x1e2   :  { %v2058_v20 = vadd.f32 %v2057_v3, %v7035_v50  ;;  %v5432_v3 = vadd.f32 %v5431_v47, %v5430_v53 }
 0x1e4   :  { %v2059_v22 = vadd.f32 %v2058_v20, %v7040_v45  ;;  %v1925_v20 = vadd.f32 %v5429_v0, %v7024_v1 }
 0x1e6   :  { %v2389_v59 = vld [vmem:[#allocation4 + $0x4] sm:$0xf] }
 0x1e7   :  { %2405 = vrot.lane.b32.xlu0 %v2389_v59, %s5809_s20 }
 0x1e8   :  { %v3358_v19 = vld [vmem:[#allocation4 + $0x2c] sm:$0xf] }
 0x1eb   :  { %3374 = vrot.lane.b32.xlu0 %v3358_v19, %s5809_s20 }
 0x1f9   :  { %v5436_v28 = vpop.f32.mrf.mxu0 }
 0x1fb   :  { %v5614_v30 = vpop.f32.mrf.mxu1  ;;  %v5437_v14 = vpop.f32.mrf.mxu0 }
 0x1fc   :  { %v5438_v26 = vadd.f32 %v5437_v14, %v5436_v28 }
 0x1fd   :  { %v2010_v46 = vpop.f32.mrf.mxu1  ;;  %v5439_v12 = vpop.f32.mrf.mxu0 }
 0x1fe   :  { %v7042_v52 = vadd.f32 %v2010_v46, %v1914_v41  ;;  %v1922_v46 = vadd.f32 %v5426_v43, %v7024_v1 }
 0x1ff   :  { %v5615_v51 = vpop.f32.mrf.mxu1  ;;  %v5440_v17 = vpop.f32.mrf.mxu0 }
 0x200   :  { %v2060_v56 = vadd.f32 %v2059_v22, %v7042_v52  ;;  %v7057_v37 = vadd.f32 %v5614_v30, %v1922_v46  ;;  %v7063_v53 = vadd.f32 %v5615_v51, %v1925_v20  ;;  %v1938_v51 = vadd.f32 %v5438_v26, %v7024_v1 }
 0x201   :  { %v2013_v55 = vpop.f32.mrf.mxu1 }
 0x202   :  { %v7046_v44 = vadd.f32 %v2013_v55, %v1917_v18  ;;  %v1930_v18 = vadd.f32 %v5432_v3, %v7024_v1  ;;  %v5441_v3 = vadd.f32 %v5440_v17, %v5439_v12 }
 0x204   :  { %v2061_v29 = vadd.f32 %v2060_v56, %v7046_v44  ;;  %v1941_v14 = vadd.f32 %v5441_v3, %v7024_v1 }
 0x206   :  { %v2062_v41 = vadd.f32 %v2061_v29, %v7057_v37 }
 0x208   :  { %v2063_v30 = vadd.f32 %v2062_v41, %v7063_v53 }
 0x219   :  { %v5442_v61 = vpop.f32.mrf.mxu0 }
 0x21b   :  { %v5443_v62 = vpop.f32.mrf.mxu0 }
 0x21c   :  { %v5444_v46 = vadd.f32 %v5443_v62, %v5442_v61 }
 0x21d   :  { %v5445_v55 = vpop.f32.mrf.mxu0 }
 0x21f   :  { %v5618_v27 = vpop.f32.mrf.mxu1  ;;  %v5446_v47 = vpop.f32.mrf.mxu0 }
 0x220   :  { %v2035_v59 = vadd.f32 %v5618_v27, %v1938_v51  ;;  %v5447_v20 = vadd.f32 %v5446_v47, %v5445_v55 }
 0x221   :  { %v2026_v9 = vpop.f32.mrf.mxu1 }
 0x222   :  { %v7065_v43 = vadd.f32 %v2026_v9, %v1930_v18  ;;  %v1949_v26 = vadd.f32 %v5447_v20, %v7024_v1 }
 0x223   :  { %v5619_v42 = vpop.f32.mrf.mxu1 }
 0x224   :  { %v2064_v56 = vadd.f32 %v2063_v30, %v7065_v43 }
 0x225   :  { %v2029_v16 = vpop.f32.mrf.mxu1 }
 0x226   :  { %v7069_v22 = vadd.f32 %v2029_v16, %v1933_v4  ;;  %v1946_v16 = vadd.f32 %v5444_v46, %v7024_v1  ;;  %v2038_v4 = vadd.f32 %v5619_v42, %v1941_v14 }
 0x228   :  { %v2065_v9 = vadd.f32 %v2064_v56, %v7069_v22 }
 0x22a   :  { %v2066_v41 = vadd.f32 %v2065_v9, %v2035_v59 }
 0x22c   :  { %v2067_v62 = vadd.f32 %v2066_v41, %v2038_v4 }
 0x23c   :  { %v5448_v48 = vpop.f32.mrf.mxu0 }
 0x23e   :  { %v5449_v0 = vpop.f32.mrf.mxu0 }
 0x23f   :  { %v5450_v18 = vadd.f32 %v5449_v0, %v5448_v48 }
 0x240   :  { %v5451_v29 = vpop.f32.mrf.mxu0 }
 0x241   :  { %v1954_v61 = vadd.f32 %v5450_v18, %v7024_v1 }
 0x242   :  { %v5452_v28 = vpop.f32.mrf.mxu0 }
 0x243   :  { %v5622_v25 = vpop.f32.mrf.mxu1  ;;  %v5453_v30 = vadd.f32 %v5452_v28, %v5451_v29 }
 0x244   :  { %v2051_v55 = vadd.f32 %v5622_v25, %v1954_v61 }
 0x245   :  { %v2042_v19 = vpop.f32.mrf.mxu1  ;;  %v1957_v3 = vadd.f32 %v5453_v30, %v7024_v1 }
 0x246   :  { %v2043_v12 = vadd.f32 %v2042_v19, %v1946_v16 }
 0x247   :  { %v5623_v17 = vpop.f32.mrf.mxu1 }
 0x248   :  { %v2068_v56 = vadd.f32 %v2067_v62, %v2043_v12  ;;  %v2054_v48 = vadd.f32 %v5623_v17, %v1957_v3 }
 0x249   :  { %v2045_v27 = vpop.f32.mrf.mxu1 }
 0x24a   :  { %v2046_v51 = vadd.f32 %v2045_v27, %v1949_v26 }
 0x24c   :  { %v2069_v47 = vadd.f32 %v2068_v56, %v2046_v51 }
 0x24e   :  { %v2070_v0 = vadd.f32 %v2069_v47, %v2051_v55 }
 0x250   :  { %v2071_v46 = vadd.f32 %v2070_v0, %v2054_v48 }
 0x252   :  { %v2072_v9 = vrot.slane %v2071_v46, 4 }
 0x254   :  { %v2073_v42 = vadd.f32 %v2072_v9, %v2071_v46 }
 0x256   :  { %v2074_v29 = vrot.slane %v2073_v42, 2 }
 0x258   :  { %v2075_v14 = vadd.f32 %v2074_v29, %v2073_v42 }
 0x25a   :  { %v2076_v28 = vrot.slane %v2075_v14, 1 }
 0x25c   :  { %v2077_v16 = vadd.f32 %v2076_v28, %v2075_v14 }
 0x25e   :  { %v2078_v18 = vmul.f32 0.0078125, %v2077_v16 }
 0x260   :  { %v7081_v41 = vsub.f32 %v7030_v13, %v2078_v18  ;;  %v7084_v20 = vsub.f32 %v7028_v40, %v2078_v18  ;;  %v7087_v1 = vsub.f32 %v7035_v50, %v2078_v18  ;;  %v7094_v30 = vsub.f32 %v7040_v45, %v2078_v18 }
 0x261   :  { %v7097_v17 = vsub.f32 %v7042_v52, %v2078_v18  ;;  %v7102_v61 = vsub.f32 %v7046_v44, %v2078_v18  ;;  %v7107_v26 = vsub.f32 %v7057_v37, %v2078_v18  ;;  %v7112_v52 = vsub.f32 %v7063_v53, %v2078_v18 }
 0x262   :  { %v2095_v25 = vmul.f32 %v7081_v41, %v7081_v41  ;;  %v2096_v19 = vmul.f32 %v7084_v20, %v7084_v20  ;;  %v2097_v13 = vmul.f32 %v7087_v1, %v7087_v1  ;;  %v2098_v50 = vmul.f32 %v7094_v30, %v7094_v30 }
 0x263   :  { %v2099_v45 = vmul.f32 %v7097_v17, %v7097_v17  ;;  %v2100_v56 = vmul.f32 %v7102_v61, %v7102_v61  ;;  %v7117_v44 = vsub.f32 %v7065_v43, %v2078_v18  ;;  %v2101_v47 = vmul.f32 %v7107_v26, %v7107_v26 }
 0x264   :  { %v2111_v40 = vadd.f32 %v2096_v19, %v2095_v25  ;;  %v7122_v37 = vsub.f32 %v7069_v22, %v2078_v18  ;;  %v2102_v46 = vmul.f32 %v7112_v52, %v7112_v52  ;;  %v7126_v53 = vsub.f32 %v2035_v59, %v2078_v18 }
 0x265   :  { %v2103_v42 = vmul.f32 %v7117_v44, %v7117_v44  ;;  %v7130_v14 = vsub.f32 %v2038_v4, %v2078_v18  ;;  %v7134_v16 = vsub.f32 %v2043_v12, %v2078_v18  ;;  %v7138_v19 = vsub.f32 %v2046_v51, %v2078_v18 }
 0x266   :  { %v2112_v62 = vadd.f32 %v2111_v40, %v2097_v13  ;;  %v2104_v43 = vmul.f32 %v7122_v37, %v7122_v37  ;;  %v2105_v22 = vmul.f32 %v7126_v53, %v7126_v53  ;;  %v7142_v40 = vsub.f32 %v2051_v55, %v2078_v18 }
 0x267   :  { %v2106_v59 = vmul.f32 %v7130_v14, %v7130_v14  ;;  %v2107_v4 = vmul.f32 %v7134_v16, %v7134_v16  ;;  %v2108_v12 = vmul.f32 %v7138_v19, %v7138_v19 }
 0x268   :  { %v2113_v27 = vadd.f32 %v2112_v62, %v2098_v50  ;;  %v7146_v62 = vsub.f32 %v2054_v48, %v2078_v18  ;;  %v2109_v51 = vmul.f32 %v7142_v40, %v7142_v40  ;;  %v73_v18 = vsel %vm65_vm4, 1.0, %v5811_v15 }
 0x26a   :  { %v2114_v3 = vadd.f32 %v2113_v27, %v2099_v45  ;;  %v2110_v55 = vmul.f32 %v7146_v62, %v7146_v62 }
 0x26c   :  { %v2115_v0 = vadd.f32 %v2114_v3, %v2100_v56  ;;  %v74_v3 = vsel %vm66_vm5, 1.0, %v5811_v15 }
 0x26e   :  { %v2116_v9 = vadd.f32 %v2115_v0, %v2101_v47  ;;  %v78_v0 = vpack.c.bf16 %v74_v3, %v73_v18  ;;  %v2696_v18 = vld [vmem:[#allocation4 + $0x4] sm:$0x8] }
 0x26f   :  { %v2705_v32 = vmul.bf16 %v2696_v18, %v5957_v54 }
 0x270   :  { %v2117_v29 = vadd.f32 %v2116_v9, %v2102_v46  ;;  %v7165_v57 = vrot.slane %v78_v0, %v5916_v33  ;;  %v2506_v58 = vrot.slane %v78_v0, %v5926_v36 }
 0x272   :  { %v2118_v28 = vadd.f32 %v2117_v29, %v2103_v42  ;;  %v8792_v42 = vand.u32 7, %v5863_v5  ;;  %v8794_v29 = vand.u32 7, %v5870_v7 }
 0x274   :  { %v2119_v25 = vadd.f32 %v2118_v28, %v2104_v43  ;;  %vm59_vm6 = vcmp.ne.s32.totalorder %v8792_v42, 7  ;;  %vm61_vm9 = vcmp.ne.s32.totalorder %v8794_v29, 7  ;;  %v8795_v43 = vand.u32 7, %v5873_v8 }
 0x275   :  { %v69_v6 = vsel %vm61_vm9, 1.0, %v5811_v15  ;;  %v8797_v8 = vand.u32 7, %v5922_v35 }
 0x276   :  { %v2120_v13 = vadd.f32 %v2119_v25, %v2105_v22  ;;  %vm62_vm10 = vcmp.ne.s32.totalorder %v8795_v43, 7  ;;  %v67_v22 = vsel %vm59_vm6, 1.0, %v5811_v15  ;;  %v68_v25 = vsel %vm60_vm7, 1.0, %v5811_v15 }
 0x277   :  { %vm64_vm13 = vcmp.ne.s32.totalorder %v8797_v8, 7 }
 0x278   :  { %v2121_v50 = vadd.f32 %v2120_v13, %v2106_v59  ;;  %v70_v59 = vsel %vm62_vm10, 1.0, %v5811_v15  ;;  %v2561_v13 = vshrl.u32 %v7165_v57, 16 }
 0x279   :  { %v76_v7 = vpack.c.bf16 %v70_v59, %v69_v6  ;;  %v8749_v6 = vsub.s32 2, %v5863_v5  ;;  %v7200_v59 = vshrl.u32 %v2705_v32, 16 }
 0x27a   :  { %v2122_v45 = vadd.f32 %v2121_v50, %v2107_v4  ;;  %v2570_v4 = vshrl.u32 %v2506_v58, 16 }
 0x27b   :  { %v2471_v35 = vrot.slane %v76_v7, %v5916_v33 }
 0x27c   :  { %v2123_v27 = vadd.f32 %v2122_v45, %v2108_v12  ;;  %v75_v12 = vpack.c.bf16 %v68_v25, %v67_v22  ;;  %v3137_v25 = vld [vmem:[#allocation4 + $0x28] sm:$0xf] }
 0x27d   :  { %v2525_v22 = vshrl.u32 %v2471_v35, 16  ;;  %v2528_v18 = vshll.u32 %v2471_v35, 16 }
 0x27e   :  { %v2124_v56 = vadd.f32 %v2123_v27, %v2109_v51  ;;  %v8796_v51 = vand.u32 7, %v5919_v34  ;;  %v7181_v27 = vrot.slane %v2561_v13, 7  ;;  %v2457_v3 = vrot.slane %v75_v12, %v5916_v33 }
 0x27f   :  { %v72_v34 = vsel %vm64_vm13, 1.0, %v5811_v15 }
 0x280   :  { %v2125_v48 = vadd.f32 %v2124_v56, %v2110_v55  ;;  %vm63_vm12 = vcmp.ne.s32.totalorder %v8796_v51, 7  ;;  %v7183_v55 = vrot.slane %v2570_v4, 7  ;;  %v2573_v56 = vshll.u32 %v2506_v58, 16 }
 0x281   :  { %v71_v0 = vsel %vm63_vm12, 1.0, %v5811_v15  ;;  %v2478_v58 = vrot.slane %v76_v7, %v5926_v36 }
 0x282   :  { %v2126_v47 = vrot.slane %v2125_v48, 4  ;;  %v2575_v42 = vor.u32 %v2573_v56, %v7183_v55  ;;  %v77_v29 = vpack.c.bf16 %v72_v34, %v71_v0  ;;  %v8750_v0 = vsub.s32 1, %v5863_v5  ;;  %v2280_v34 = vld [vmem:[#allocation4 + $0x4] sm:$0xf] }
 0x283   :  { %v2534_v13 = vshrl.u32 %v2478_v58, 16 }
 0x284   :  { %v2127_v46 = vadd.f32 %v2126_v47, %v2125_v48  ;;  %v2464_v47 = vrot.slane %v75_v12, %v5926_v36  ;;  %v7205_v12 = vrot.slane %v77_v29, %v5916_v33  ;;  %v7221_v33 = vrot.slane %v7019_v39, %v8749_v6 }
 0x286   :  { %v2128_v9 = vrot.slane %v2127_v46, 2  ;;  %v2519_v8 = vshll.u32 %v2464_v47, 16 }
 0x288   :  { %v2129_v11 = vadd.f32 %v2128_v9, %v2127_v46  ;;  %v3524_v46 = vld [vmem:[#allocation4 + $0x2c] sm:$0x8]  ;;  %v2568_v9 = vrot.slane %v7181_v27, 4 }
 0x289   :  { %v3533_v43 = vmul.bf16 %v3524_v46, %v5957_v54  ;;  %v3249_v46 = vld [vmem:[#allocation4 + $0x2c] sm:$0xf] }
 0x28a   :  { %v2130_v28 = vrot.slane %v2129_v11, 1  ;;  %v7197_v15 = vsel %vm6039_vm11, %v2568_v9, %v2575_v42  ;;  %v2543_v9 = vshrl.u32 %v7205_v12, 16  ;;  %v7270_v6 = vmul.bf16 %v3249_v46, %v6003_v31 }
 0x28b   :  { %8798 = vst [vmem:[#allocation11_spill] sm:$0xff] %v7197_v15  ;;  %v7210_v7 = vshrl.u32 %v3533_v43, 16  ;;  %v3146_v56 = vmul.bf16 %v3137_v25, %v7197_v15  ;;  %v3965_v25 = vld [vmem:[#allocation4 + $0x50] sm:$0xf] }
 0x28c   :  { %v2131_v50 = vadd.f32 %v2130_v28, %v2129_v11  ;;  %v2508_v11 = vshrl.u32 %v2457_v3, 16  ;;  %v2516_v28 = vshrl.u32 %v2464_v47, 16  ;;  %v7249_v32 = vrot.slane %v2543_v9, 7 }
 0x28d   :  { %v7266_v9 = vrot.slane %v7183_v55, 4 }
 0x28e   :  { %v2132_v45 = vmul.f32 0.0078125, %v2131_v50  ;;  %v7202_v4 = vrot.slane %v2508_v11, 7  ;;  %v2511_v50 = vshll.u32 %v2457_v3, 16  ;;  %v7212_v51 = vrot.slane %v2516_v28, 7 }
 0x28f   :  { %v7223_v3 = vrot.slane %v2534_v13, 7  ;;  %v7241_v13 = vmul.bf16 %v2280_v34, %v6003_v31  ;;  %8799 = vst [vmem:[#allocation12_spill] sm:$0xff] %v7266_v9 }
 0x290   :  { %v2133_v48 = vadd.f32 1e-05, %v2132_v45  ;;  %v7208_v45 = vrot.slane %v77_v29, %v5926_v36  ;;  %v2537_v36 = vshll.u32 %v2478_v58, 16  ;;  %v7227_v47 = vor.u32 %v2511_v50, %v7202_v4 }
 0x291   :  { %v7234_v11 = vor.u32 %v2519_v8, %v7212_v51  ;;  %v3218_v29 = vshll.u32 %v3146_v56, 16 }
 0x292   :  { %5782 = vrsqrt.f32 %v2133_v48  ;;  %v7215_v48 = vrot.slane %v2525_v22, 7  ;;  %v2552_v35 = vshrl.u32 %v7208_v45, 16  ;;  %v3222_v22 = vshrl.u32 %v3146_v56, 16 }
 0x293   :  { %v7246_v42 = vor.u32 %v2537_v36, %v7223_v3  ;;  %v7261_v36 = vmul.bf16 %v3965_v25, %v7197_v15 }
 0x294   :  { %v7238_v28 = vor.u32 %v2528_v18, %v7215_v48  ;;  %v7252_v58 = vrot.slane %v2552_v35, 7  ;;  %v7263_v8 = vrot.slane %v3222_v22, 4 }
 0x29f   :  { %v5783_v43 = vpop.eup %5782 }
 0x2a0   :  { %v2135_v50 = vmul.f32 %v5783_v43, %v7019_v39  ;;  %v7258_v43 = vrot.slane %v3218_v29, 5 }
 0x2a2   :  { %v2139_v34 = vrot.slane %v2135_v50, %v8750_v0 }
 0x2a4   :  { %v2140_v56 = vmul.f32 %v2139_v34, %v7081_v41  ;;  %v2141_v50 = vmul.f32 %v2139_v34, %v7084_v20  ;;  %v2142_v29 = vmul.f32 %v2139_v34, %v7087_v1  ;;  %v2143_v0 = vmul.f32 %v2139_v34, %v7094_v30 }
 0x2a5   :  { %v2144_v25 = vmul.f32 %v2139_v34, %v7097_v17  ;;  %v2145_v22 = vmul.f32 %v2139_v34, %v7102_v61  ;;  %v2146_v55 = vmul.f32 %v2139_v34, %v7107_v26  ;;  %v2147_v39 = vmul.f32 %v2139_v34, %v7112_v52 }
 0x2a6   :  { %v2148_v18 = vmul.f32 %v2139_v34, %v7117_v44  ;;  %v2149_v46 = vmul.f32 %v2139_v34, %v7122_v37  ;;  %v2150_v41 = vmul.f32 %v2139_v34, %v7126_v53  ;;  %v2151_v20 = vmul.f32 %v2139_v34, %v7130_v14 }
 0x2a7   :  { %v2152_v1 = vmul.f32 %v2139_v34, %v7134_v16  ;;  %v2153_v30 = vmul.f32 %v2139_v34, %v7138_v19  ;;  %v2154_v17 = vmul.f32 %v2139_v34, %v7142_v40  ;;  %v2155_v61 = vmul.f32 %v2139_v34, %v7146_v62 }
 0x2a8   :  { %v7289_v26 = vadd.f32 %v7221_v33, %v2140_v56  ;;  %v7292_v52 = vadd.f32 %v7221_v33, %v2141_v50  ;;  %v7295_v44 = vadd.f32 %v7221_v33, %v2142_v29  ;;  %v7298_v37 = vadd.f32 %v7221_v33, %v2143_v0 }
 0x2a9   :  { %v7301_v53 = vadd.f32 %v7221_v33, %v2144_v25  ;;  %v7304_v14 = vadd.f32 %v7221_v33, %v2145_v22  ;;  %v7307_v16 = vadd.f32 %v7221_v33, %v2146_v55  ;;  %v7310_v19 = vadd.f32 %v7221_v33, %v2147_v39 }
 0x2aa   :  { %8800 = vst [vmem:[#allocation13_spill] sm:$0xff] %v7289_v26  ;;  %8801 = vst [vmem:[#allocation14_spill] sm:$0xff] %v7292_v52  ;;  %v7313_v40 = vadd.f32 %v7221_v33, %v2148_v18  ;;  %v7316_v62 = vadd.f32 %v7221_v33, %v2149_v46  ;;  %v7319_v0 = vadd.f32 %v7221_v33, %v2150_v41  ;;  %v2179_v29 = vmax.f32 %v7298_v37, 0.0 }
 0x2ab   :  { %8802 = vst [vmem:[#allocation15_spill] sm:$0xff] %v7295_v44  ;;  %8803 = vst [vmem:[#allocation16_spill] sm:$0xff] %v7298_v37  ;;  %v7322_v56 = vadd.f32 %v7221_v33, %v2151_v20  ;;  %v7325_v34 = vadd.f32 %v7221_v33, %v2152_v1  ;;  %v7328_v50 = vadd.f32 %v7221_v33, %v2153_v30  ;;  %v2180_v25 = vmax.f32 %v7301_v53, 0.0 }
 0x2ac   :  { %8804 = vst [vmem:[#allocation17_spill] sm:$0xff] %v7301_v53  ;;  %8805 = vst [vmem:[#allocation18_spill] sm:$0xff] %v7304_v14  ;;  %v7331_v39 = vadd.f32 %v7221_v33, %v2154_v17  ;;  %v7334_v18 = vadd.f32 %v7221_v33, %v2155_v61  ;;  %v2181_v22 = vmax.f32 %v7304_v14, 0.0  ;;  %v2182_v55 = vmax.f32 %v7307_v16, 0.0 }
 0x2ad   :  { %8806 = vst [vmem:[#allocation19_spill] sm:$0xff] %v7307_v16  ;;  %8807 = vst [vmem:[#allocation20_spill] sm:$0xff] %v7310_v19  ;;  %v2183_v46 = vmax.f32 %v7310_v19, 0.0  ;;  %v2184_v41 = vmax.f32 %v7313_v40, 0.0  ;;  %v2185_v20 = vmax.f32 %v7316_v62, 0.0  ;;  %v2186_v1 = vmax.f32 %v7319_v0, 0.0 }
 0x2ae   :  { %8808 = vst [vmem:[#allocation21_spill] sm:$0xff] %v7313_v40  ;;  %8809 = vst [vmem:[#allocation22_spill] sm:$0xff] %v7316_v62  ;;  %v2187_v30 = vmax.f32 %v7322_v56, 0.0  ;;  %v2188_v33 = vmax.f32 %v7325_v34, 0.0  ;;  %v2189_v17 = vmax.f32 %v7328_v50, 0.0  ;;  %v2190_v61 = vmax.f32 %v7331_v39, 0.0 }
 0x2af   :  { %8810 = vst [vmem:[#allocation23_spill] sm:$0xff] %v7319_v0  ;;  %8811 = vst [vmem:[#allocation24_spill] sm:$0xff] %v7322_v56  ;;  %v2191_v35 = vmax.f32 %v7334_v18, 0.0  ;;  %v5377_v5 = vpack.c.bf16 %v2179_v29, %v2179_v29  ;;  %v5378_v14 = vpack.c.bf16 %v2180_v25, %v2180_v25  ;;  %v5379_v37 = vpack.c.bf16 %v2181_v22, %v2181_v22  ;;  %v2279_v62 = vld [vmem:[#allocation4] sm:$0x8] }
 0x2b0   :  { %8812 = vst [vmem:[#allocation25_spill] sm:$0xff] %v7325_v34  ;;  %8813 = vst [vmem:[#allocation26_spill] sm:$0xff] %v7328_v50  ;;  %v5380_v19 = vpack.c.bf16 %v2182_v55, %v2182_v55  ;;  %v5381_v16 = vpack.c.bf16 %v2183_v46, %v2183_v46  ;;  %v5382_v40 = vpack.c.bf16 %v2184_v41, %v2184_v41  ;;  %v2176_v22 = vmax.f32 %v7289_v26, 0.0  ;;  %v2846_v55 = vld [vmem:[#allocation4 + $0x28] sm:$0x1] }
 0x2b1   :  { %8814 = vst [vmem:[#allocation27_spill] sm:$0xff] %v7331_v39  ;;  %8815 = vst [vmem:[#allocation28_spill] sm:$0xff] %v7334_v18  ;;  %v5383_v53 = vpack.c.bf16 %v2185_v20, %v2185_v20  ;;  %v5384_v0 = vpack.c.bf16 %v2186_v1, %v2186_v1  ;;  %v5385_v56 = vpack.c.bf16 %v2187_v30, %v2187_v30  ;;  %v2550_v1 = vrot.slane %v7249_v32, 4 }
 0x2b2   :  { %2236 = vst.msk [vmem:[#allocation4 + $0x1c] sm:$0xf] %vm2200_vm3, %v5379_v37  ;;  %v5386_v15 = vpack.c.bf16 %v2188_v33, %v2188_v33  ;;  %v5387_v34 = vpack.c.bf16 %v2189_v17, %v2189_v17  ;;  %2234 = vst.msk [vmem:[#allocation4 + $0x14] sm:$0xf] %vm2200_vm3, %v5377_v5  ;;  %v5388_v29 = vpack.c.bf16 %v2190_v61, %v2190_v61  ;;  %v2177_v37 = vmax.f32 %v7292_v52, 0.0 }
 0x2b3   :  { %2235 = vst.msk [vmem:[#allocation4 + $0x18] sm:$0xf] %vm2200_vm3, %v5378_v14  ;;  %2237 = vst.msk [vmem:[#allocation4 + $0x20] sm:$0xf] %vm2200_vm3, %v5380_v19  ;;  %v5389_v25 = vpack.c.bf16 %v2191_v35, %v2191_v35  ;;  %v2178_v5 = vmax.f32 %v7295_v44, 0.0  ;;  %v2288_v35 = vmul.bf16 %v2279_v62, %v5957_v54  ;;  %v8816_v14 = vshrl.u32 %v7241_v13, 16 }
 0x2b4   :  { %2238 = vst.msk [vmem:[#allocation4 + $0x24] sm:$0xf] %vm2200_vm3, %v5381_v16  ;;  %2269 = vst.msk [vmem:[#allocation4 + $0x30] sm:$0xf] %vm2200_vm3, %v5382_v40  ;;  %v2306_v16 = vshll.u32 %v7241_v13, 16  ;;  %v5375_v40 = vpack.c.bf16 %v2177_v37, %v2177_v37  ;;  %v2855_v62 = vmul.bf16 %v2846_v55, %v7266_v9  ;;  %v8817_v13 = vshll.u32 %v7205_v12, 16 }
 0x2b5   :  { %2270 = vst.msk [vmem:[#allocation4 + $0x34] sm:$0xf] %vm2200_vm3, %v5383_v53  ;;  %2271 = vst.msk [vmem:[#allocation4 + $0x38] sm:$0xf] %vm2200_vm3, %v5384_v0  ;;  %v7366_v53 = vrot.slane %v8816_v14, 7  ;;  %v5374_v0 = vpack.c.bf16 %v2176_v22, %v2176_v22  ;;  %v2298_v46 = vshrl.u32 %v2288_v35, 16 }
 0x2b6   :  { %2272 = vst.msk [vmem:[#allocation4 + $0x3c] sm:$0xf] %vm2200_vm3, %v5385_v56  ;;  %2273 = vst.msk [vmem:[#allocation4 + $0x40] sm:$0xf] %vm2200_vm3, %v5386_v15  ;;  %v3674_v19 = vld [vmem:[#allocation4 + $0x50] sm:$0x1]  ;;  %v2548_v20 = vor.u32 %v8817_v13, %v7249_v32 }
 0x2b7   :  { %2274 = vst.msk [vmem:[#allocation4 + $0x44] sm:$0xf] %vm2200_vm3, %v5387_v34  ;;  %2275 = vst.msk [vmem:[#allocation4 + $0x48] sm:$0xf] %vm2200_vm3, %v5388_v29  ;;  %v4046_v15 = vshll.u32 %v7261_v36, 16  ;;  %v4050_v56 = vshrl.u32 %v7261_v36, 16  ;;  %v5376_v34 = vpack.c.bf16 %v2178_v5, %v2178_v5  ;;  %v2308_v41 = vor.u32 %v2306_v16, %v7366_v53 }
 0x2b8   :  { %2276 = vst.msk [vmem:[#allocation4 + $0x4c] sm:$0xf] %vm2200_vm3, %v5389_v25  ;;  %2232 = vst.msk [vmem:[#allocation4 + $0xc] sm:$0xf] %vm2200_vm3, %v5375_v40  ;;  %v3272_v30 = vshrl.u32 %v7270_v6, 16  ;;  %v3683_v36 = vmul.bf16 %v3674_v19, %v7266_v9  ;;  %v8818_v33 = vshll.u32 %v7208_v45, 16  ;;  %v3225_v29 = vor.u32 %v7263_v8, %v7258_v43 }
 0x2b9   :  { %2231 = vst.msk [vmem:[#allocation4 + $0x8] sm:$0xf] %vm2200_vm3, %v5374_v0  ;;  %2233 = vst.msk [vmem:[#allocation4 + $0x10] sm:$0xf] %vm2200_vm3, %v5376_v34  ;;  %v2559_v61 = vrot.slane %v7252_v58, 4  ;;  %v5284_v25 = vrot.slane %v2298_v46, 11 }
 0x2ba   :  { %v2557_v17 = vor.u32 %v8818_v33, %v7252_v58  ;;  %v3248_v12 = vld [vmem:[#allocation4 + $0x28] sm:$0x8]  ;;  %v8819_v32 = vshll.u32 %v7165_v57, 16  ;;  %v7393_v22 = vrot.slane %v4046_v15, 5  ;;  %v7395_v55 = vrot.slane %v4050_v56, 4 }
 0x2bb   :  { %v8821_v45 = vrot.slane %v7202_v4, 4  ;;  %v8822_v8 = vrot.slane %v7212_v51, 4  ;;  %v7411_v57 = vshll.u32 %v2855_v62, 16  ;;  %v7415_v35 = vld [vmem:[#allocation4 + $0x54] sm:$0x1]  ;;  %v2309_v4 = vsel %vm6039_vm11, %v5284_v25, %v2308_v41 }
 0x2bc   :  { %v2566_v37 = vor.u32 %v8819_v32, %v7181_v27  ;;  %8820 = vst [vmem:[#allocation29_spill] sm:$0xff] %v7395_v55  ;;  %v7413_v27 = vld [vmem:[#allocation4 + $0x2c] sm:$0x1]  ;;  %8824 = vst [vmem:[#allocation31_spill] sm:$0xff] %v7415_v35  ;;  %v3257_v14 = vmul.bf16 %v3248_v12, %v5957_v54  ;;  %v7421_v16 = vrot.slane %v3272_v30, 7  ;;  %v3275_v51 = vshll.u32 %v7270_v6, 16 }
 0x2bd   :  { %v7402_v58 = vsel %vm6039_vm11, %v8821_v45, %v7234_v11  ;;  %v7409_v5 = vsel %vm6039_vm11, %v8822_v8, %v7238_v28  ;;  %8823 = vst [vmem:[#allocation30_spill] sm:$0xff] %v7413_v27  ;;  %2381 = vst.msk [vmem:[#allocation3] sm:$0xf] %vm2200_vm3, %v2309_v4  ;;  %v2406_v11 = vpop.permute.xlu0 %2405  ;;  %v7424_v28 = vshll.u32 %v3683_v36, 16  ;;  %v8827_v19 = vrot.slane %v7215_v48, 4 }
 0x2be   :  { %8825 = vst [vmem:[#allocation32_spill] sm:$0xff] %v7421_v16  ;;  %v8828_v0 = vrot.slane %v7223_v3, 4  ;;  %v7441_v56 = vsel %vm6039_vm11, %v2550_v1, %v2557_v17  ;;  %v7443_v6 = vrot.slane %v3225_v29, 4  ;;  %2430 = vst.msk [vmem:[#allocation3] sm:$0xf] %vm2429_vm14, %v2406_v11  ;;  %v7465_v29 = vor.u32 %v3275_v51, %v7421_v16 }
 0x2bf   :  { %8826 = vst [vmem:[#allocation33_spill] sm:$0xff] %v7424_v28  ;;  %v7431_v40 = vsel %vm6039_vm11, %v8827_v19, %v7246_v42  ;;  %v2700_v34 = vld [vmem:[#allocation4 + $0x14] sm:$0xf]  ;;  %v2701_v48 = vld [vmem:[#allocation4 + $0x18] sm:$0xf]  ;;  %v7448_v42 = vsel %vm6039_vm11, %v2559_v61, %v2566_v37  ;;  %v7462_v61 = vshrl.u32 %v3257_v14, 16 }
 0x2c0   :  { %v7437_v15 = vsel %vm6039_vm11, %v8828_v0, %v2548_v20  ;;  %8829 = vst [vmem:[#allocation34_spill] sm:$0xff] %v7443_v6  ;;  %v2438_v41 = vld [vmem:[#allocation4 + $0x4] sm:$0xf]  ;;  %v2391_v13 = vld [vmem:[#allocation4 + $0xc] sm:$0xf]  ;;  %v2709_v1 = vmul.bf16 %v2700_v34, %v6056_v24  ;;  %v2710_v30 = vmul.bf16 %v2701_v48, %v6147_v49  ;;  %v8832_v9 = vrot.slane %v7210_v7, 11 }
 0x2c1   :  { %v2390_v20 = vld [vmem:[#allocation4 + $0x8] sm:$0xf]  ;;  %2409 = vrot.lane.b32.xlu0 %v2391_v13, %s5809_s20  ;;  %v2393_v32 = vld [vmem:[#allocation4 + $0x14] sm:$0xf]  ;;  %v2698_v45 = vld [vmem:[#allocation4 + $0xc] sm:$0xf]  ;;  %v7471_v19 = vmul.bf16 %v7227_v47, %v2438_v41 }
 0x2c2   :  { %2407 = vrot.lane.b32.xlu1 %v2390_v20, %s5809_s20  ;;  %v2697_v17 = vld [vmem:[#allocation4 + $0x8] sm:$0xf]  ;;  %v2699_v8 = vld [vmem:[#allocation4 + $0x10] sm:$0xf]  ;;  %v2747_v4 = vshrl.u32 %v2709_v1, 16  ;;  %v2756_v11 = vshrl.u32 %v2710_v30, 16  ;;  %v2707_v14 = vmul.bf16 %v2698_v45, %v6013_v38 }
 0x2c3   :  { %v2706_v37 = vmul.bf16 %v2697_v17, %v6003_v31  ;;  %8830 = vst [vmem:[#allocation35_spill] sm:$0xff] %v7471_v19  ;;  %v2392_v0 = vld [vmem:[#allocation4 + $0x10] sm:$0xf]  ;;  %v2708_v51 = vmul.bf16 %v2699_v8, %v6032_v63  ;;  %v2759_v34 = vshll.u32 %v2710_v30, 16  ;;  %v2702_v48 = vld [vmem:[#allocation4 + $0x1c] sm:$0xf] }
 0x2c4   :  { %v2750_v13 = vshll.u32 %v2709_v1, 16  ;;  %v2749_v46 = vrot.slane %v2747_v4, 7  ;;  %v7475_v62 = vrot.slane %v2756_v11, 7  ;;  %v2703_v17 = vld [vmem:[#allocation4 + $0x20] sm:$0xf]  ;;  %v2729_v41 = vshrl.u32 %v2707_v14, 16 }
 0x2c5   :  { %v2720_v20 = vshrl.u32 %v2706_v37, 16  ;;  %v2723_v3 = vshll.u32 %v2706_v37, 16  ;;  %2413 = vrot.lane.b32.xlu0 %v2393_v32, %s5809_s20  ;;  %v2738_v12 = vshrl.u32 %v2708_v51, 16  ;;  %v2741_v25 = vshll.u32 %v2708_v51, 16  ;;  %v2395_v8 = vld [vmem:[#allocation4 + $0x1c] sm:$0xf] }
 0x2c6   :  { %2411 = vrot.lane.b32.xlu1 %v2392_v0, %s5809_s20  ;;  %v2732_v33 = vshll.u32 %v2707_v14, 16  ;;  %v2754_v36 = vrot.slane %v2749_v46, 4  ;;  %v2761_v30 = vor.u32 %v2759_v34, %v7475_v62  ;;  %v2711_v1 = vmul.bf16 %v2702_v48, %v6165_v60  ;;  %v2394_v55 = vld [vmem:[#allocation4 + $0x18] sm:$0xf]  ;;  %v3525_v51 = vld [vmem:[#allocation4 + $0x30] sm:$0xf] }
 0x2c7   :  { %v2722_v45 = vrot.slane %v2720_v20, 7  ;;  %v2731_v37 = vrot.slane %v2729_v41, 7  ;;  %v2740_v4 = vrot.slane %v2738_v12, 7  ;;  %v2712_v11 = vmul.bf16 %v2703_v17, %v6228_v23  ;;  %v3082_v41 = vld [vmem:[#allocation4 + $0xc] sm:$0xf] }
 0x2c8   :  { %v2752_v6 = vor.u32 %v2750_v13, %v2749_v46  ;;  %v7484_v0 = vsel %vm6039_vm11, %v2754_v36, %v2761_v30  ;;  %v2765_v14 = vshrl.u32 %v2711_v1, 16  ;;  %v2396_v17 = vld [vmem:[#allocation4 + $0x20] sm:$0xf]  ;;  %v8831_v46 = vrot.slane %v7200_v59, 11  ;;  %v3526_v30 = vld [vmem:[#allocation4 + $0x34] sm:$0xf] }
 0x2c9   :  { %v2725_v32 = vor.u32 %v2723_v3, %v2722_v45  ;;  %v2727_v35 = vrot.slane %v2722_v45, 4  ;;  %2417 = vrot.lane.b32.xlu0 %v2395_v8, %s5809_s20  ;;  %v2736_v34 = vrot.slane %v2731_v37, 4  ;;  %v2743_v48 = vor.u32 %v2741_v25, %v2740_v4  ;;  %v3529_v27 = vld [vmem:[#allocation4 + $0x40] sm:$0xf]  ;;  %v2838_v18 = vld [vmem:[#allocation4 + $0x8] sm:$0xf] }
 0x2ca   :  { %2415 = vrot.lane.b32.xlu1 %v2394_v55, %s5809_s20  ;;  %v2734_v20 = vor.u32 %v2732_v33, %v2731_v37  ;;  %v2774_v12 = vshrl.u32 %v2712_v11, 16  ;;  %v2767_v36 = vrot.slane %v2765_v14, 7  ;;  %v2777_v13 = vshll.u32 %v2712_v11, 16  ;;  %v5702_v55 = vld [vmem:[%s8739_s3 + $0x78] sm:$0xff]   ;;  %v2704_v11 = vld [vmem:[#allocation4 + $0x24] sm:$0xf] }
 0x2cb   :  { %v7492_v3 = vsel %vm6039_vm11, %v8831_v46, %v2725_v32  ;;  %v2745_v45 = vrot.slane %v2740_v4, 4  ;;  %v7499_v33 = vsel %vm6039_vm11, %v2736_v34, %v2743_v48  ;;  %v3534_v8 = vmul.bf16 %v3525_v51, %v6003_v31  ;;  %v3527_v37 = vld [vmem:[#allocation4 + $0x38] sm:$0xf]  ;;  %5464 = vmatprep.subr.bf16.mxu1 %v5702_v55  ;;  %v3130_v39 = vld [vmem:[#allocation4 + $0xc] sm:$0xf] }
 0x2cc   :  { %v7503_v25 = vsel %vm6039_vm11, %v2727_v35, %v2734_v20  ;;  %v7505_v59 = vrot.slane %v2774_v12, 7  ;;  %v5703_v4 = vld [vmem:[%s8739_s3 + $0xf8] sm:$0xff]   ;;  %v2772_v32 = vrot.slane %v2767_v36, 4  ;;  %v2763_v34 = vrot.slane %v7475_v62, 4 }
 0x2cd   :  { %v7513_v14 = vsel %vm6039_vm11, %v2745_v45, %v2752_v6  ;;  %v2768_v48 = vshll.u32 %v2711_v1, 16  ;;  %v3528_v35 = vld [vmem:[#allocation4 + $0x3c] sm:$0xf]  ;;  %3098 = vrot.lane.b32.xlu0 %v3082_v41, %s5809_s20  ;;  %v3548_v12 = vshrl.u32 %v3534_v8, 16  ;;  %v3551_v46 = vshll.u32 %v3534_v8, 16  ;;  %5528 = vmatprep.subr.bf16.mxu0 %v5703_v4 }
 0x2ce   :  { %v5704_v51 = vld [vmem:[%s8739_s3 + $0x38] sm:$0xff]   ;;  %2419 = vrot.lane.b32.xlu1 %v2396_v17, %s5809_s20  ;;  %v2779_v20 = vor.u32 %v2777_v13, %v7505_v59  ;;  %v3535_v6 = vmul.bf16 %v3526_v30, %v6013_v38  ;;  %v3536_v62 = vmul.bf16 %v3527_v37, %v6032_v63  ;;  %v2713_v1 = vmul.bf16 %v2704_v11, %v6221_v21  ;;  %v3084_v17 = vld [vmem:[#allocation4 + $0x14] sm:$0xf]  ;;  %v3083_v37 = vld [vmem:[#allocation4 + $0x10] sm:$0xf] }
 0x2cf   :  { %v2770_v45 = vor.u32 %v2768_v48, %v2767_v36  ;;  %v2781_v55 = vrot.slane %v7505_v59, 4  ;;  %5465 = vmatpush3.bf16.msra.mxu1 %v5704_v51  ;;  %v5705_v41 = vld [vmem:[%s8739_s3 + $0xb8] sm:$0xff]   ;;  %v3550_v30 = vrot.slane %v3548_v12, 7  ;;  %v7534_v8 = vmul.bf16 %v3528_v35, %v6056_v24  ;;  %v5706_v51 = vld [vmem:[%s8739_s3 + $0x70] sm:$0xff]  }
 0x2d0   :  { %v7531_v13 = vsel %vm6039_vm11, %v2772_v32, %v2779_v20  ;;  %v3557_v36 = vshrl.u32 %v3535_v6, 16  ;;  %v3566_v11 = vshrl.u32 %v3536_v62, 16  ;;  %v3569_v4 = vshll.u32 %v3536_v62, 16  ;;  %5529 = vmatpush3.bf16.msra.mxu0 %v5705_v41  ;;  %5466 = vmatprep.subr.bf16.mxu1 %v5706_v51  ;;  %v3959_v26 = vld [vmem:[#allocation4 + $0x38] sm:$0xf] }
 0x2d1   :  { %v7538_v59 = vsel %vm6039_vm11, %v2763_v34, %v2770_v45  ;;  %v2783_v48 = vshrl.u32 %v2713_v1, 16  ;;  %3102 = vrot.lane.b32.xlu0 %v3084_v17, %s5809_s20  ;;  %v3553_v32 = vor.u32 %v3551_v46, %v3550_v30  ;;  %v2786_v20 = vshll.u32 %v2713_v1, 16  ;;  %v2839_v34 = vld [vmem:[#allocation4 + $0xc] sm:$0xf]  ;;  %v3133_v31 = vld [vmem:[#allocation4 + $0x18] sm:$0xf] }
 0x2d2   :  { %3100 = vrot.lane.b32.xlu1 %v3083_v37, %s5809_s20  ;;  %v3559_v35 = vrot.slane %v3557_v36, 7  ;;  %v3538_v12 = vmul.bf16 %v3529_v27, %v6147_v49  ;;  %v7546_v45 = vrot.slane %v3566_v11, 7  ;;  %v3575_v41 = vshrl.u32 %v7534_v8, 16  ;;  %v5707_v27 = vld [vmem:[%s8739_s3 + $0x30] sm:$0xff]  }
 0x2d3   :  { %v2785_v62 = vrot.slane %v2783_v48, 7  ;;  %v3555_v50 = vrot.slane %v3550_v30, 4  ;;  %v7553_v17 = vsel %vm6039_vm11, %v8832_v9, %v3553_v32  ;;  %v3360_v37 = vld [vmem:[#allocation4 + $0x34] sm:$0xf]  ;;  %v3359_v11 = vld [vmem:[#allocation4 + $0x30] sm:$0xf]  ;;  %v2847_v9 = vmul.bf16 %v2838_v18, %v7227_v47  ;;  %5467 = vmatpush3.bf16.msra.mxu1 %v5707_v27 }
 0x2d4   :  { %v3564_v46 = vrot.slane %v3559_v35, 4  ;;  %v3584_v1 = vshrl.u32 %v3538_v12, 16  ;;  %v3587_v36 = vshll.u32 %v3538_v12, 16  ;;  %v3571_v48 = vor.u32 %v3569_v4, %v7546_v45  ;;  %v3131_v12 = vld [vmem:[#allocation4 + $0x10] sm:$0xf]  ;;  %v5708_v4 = vld [vmem:[%s8739_s3 + $0x68] sm:$0xff]  }
 0x2d5   :  { %v2788_v30 = vor.u32 %v2786_v20, %v2785_v62  ;;  %v7559_v52 = vrot.slane %v3575_v41, 7  ;;  %v3560_v51 = vshll.u32 %v3535_v6, 16  ;;  %3378 = vrot.lane.b32.xlu0 %v3360_v37, %s5809_s20  ;;  %v7567_v32 = vmul.bf16 %v2839_v34, %v7402_v58  ;;  %v3086_v20 = vld [vmem:[#allocation4 + $0x1c] sm:$0xf]  ;;  %v3085_v41 = vld [vmem:[#allocation4 + $0x18] sm:$0xf]  ;;  %5468 = vmatprep.subr.bf16.mxu1 %v5708_v4 }
 0x2d6   :  { %3376 = vrot.lane.b32.xlu1 %v3359_v11, %s5809_s20  ;;  %v7563_v7 = vrot.slane %v3584_v1, 7  ;;  %v3139_v44 = vmul.bf16 %v3130_v39, %v7227_v47  ;;  %v7575_v6 = vsel %vm6039_vm11, %v3564_v46, %v3571_v48  ;;  %v5709_v39 = vld [vmem:[%s8739_s3 + $0xf0] sm:$0xff]   ;;  %v2857_v37 = vshrl.u32 %v2847_v9, 16 }
 0x2d7   :  { %v7579_v62 = vsel %vm6039_vm11, %v2781_v55, %v2788_v30  ;;  %v3582_v18 = vrot.slane %v7559_v52, 4  ;;  %v3562_v34 = vor.u32 %v3560_v51, %v3559_v35  ;;  %v2860_v11 = vshll.u32 %v2847_v9, 16  ;;  %v5710_v55 = vld [vmem:[%s8739_s3 + $0x28] sm:$0xff]   ;;  %v3958_v51 = vld [vmem:[#allocation4 + $0x34] sm:$0xf]  ;;  %5530 = vmatprep.subr.bf16.mxu0 %v5709_v39 }
 0x2d8   :  { %v3589_v1 = vor.u32 %v3587_v36, %v7563_v7  ;;  %v2866_v46 = vshll.u32 %v7567_v32, 16  ;;  %v3140_v27 = vmul.bf16 %v3131_v12, %v7402_v58  ;;  %v3149_v48 = vshrl.u32 %v3139_v44, 16  ;;  %5469 = vmatpush3.bf16.msra.mxu1 %v5710_v55  ;;  %v5713_v55 = vld [vmem:[%s8739_s3 + $0x20] sm:$0xff]  }
 0x2d9   :  { %v7592_v35 = vsel %vm6039_vm11, %v3555_v50, %v3562_v34  ;;  %v3152_v30 = vshll.u32 %v3139_v44, 16  ;;  %3106 = vrot.lane.b32.xlu0 %v3086_v20, %s5809_s20  ;;  %v2859_v9 = vrot.slane %v2857_v37, 4  ;;  %v2862_v4 = vrot.slane %v2860_v11, 5  ;;  %v5711_v50 = vld [vmem:[%s8739_s3 + $0xb0] sm:$0xff]   ;;  %v3361_v20 = vld [vmem:[#allocation4 + $0x38] sm:$0xf] }
 0x2da   :  { %3104 = vrot.lane.b32.xlu1 %v3085_v41, %s5809_s20  ;;  %v7599_v36 = vsel %vm6039_vm11, %v3582_v18, %v3589_v1  ;;  %v7601_v19 = vrot.slane %v2866_v46, 5  ;;  %v3151_v44 = vrot.slane %v3149_v48, 4  ;;  %v3158_v34 = vshll.u32 %v3140_v27, 16  ;;  %5531 = vmatpush3.bf16.msra.mxu0 %v5711_v50  ;;  %v5712_v37 = vld [vmem:[%s8739_s3 + $0x60] sm:$0xff]  }
 0x2db   :  { %v3154_v12 = vrot.slane %v3152_v30, 5  ;;  %v3162_v39 = vshrl.u32 %v3140_v27, 16  ;;  %v2863_v16 = vor.u32 %v2862_v4, %v2859_v9  ;;  %v3967_v41 = vmul.bf16 %v3958_v51, %v7227_v47  ;;  %v3530_v27 = vld [vmem:[#allocation4 + $0x44] sm:$0xf]  ;;  %v2840_v4 = vld [vmem:[#allocation4 + $0x10] sm:$0xf]  ;;  %5470 = vmatprep.subr.bf16.mxu1 %v5712_v37 }
 0x2dc   :  { %v3968_v18 = vmul.bf16 %v3959_v26, %v7402_v58  ;;  %v3573_v1 = vrot.slane %v7546_v45, 4  ;;  %v3160_v46 = vrot.slane %v3158_v34, 5  ;;  %v3578_v30 = vshll.u32 %v7534_v8, 16  ;;  %v2841_v34 = vld [vmem:[#allocation4 + $0x14] sm:$0xf]  ;;  %5471 = vmatpush3.bf16.msra.mxu1 %v5713_v55 }
 0x2dd   :  { %v3155_v11 = vor.u32 %v3154_v12, %v3151_v44  ;;  %v3164_v48 = vrot.slane %v3162_v39, 4  ;;  %2790 = vrot.lane.b32.xlu0 %v7492_v3, %s5809_s20  ;;  %v7619_v26 = vrot.slane %v2863_v16, 4  ;;  %v3977_v45 = vshrl.u32 %v3967_v41, 16  ;;  %v3132_v39 = vld [vmem:[#allocation4 + $0x14] sm:$0xf] }
 0x2de   :  { %3380 = vrot.lane.b32.xlu1 %v3361_v20, %s5809_s20  ;;  %v3980_v51 = vshll.u32 %v3967_v41, 16  ;;  %v3986_v9 = vshll.u32 %v3968_v18, 16  ;;  %v3990_v12 = vshrl.u32 %v3968_v18, 16  ;;  %v3580_v8 = vor.u32 %v3578_v30, %v7559_v52  ;;  %v5714_v41 = vld [vmem:[%s8739_s3 + $0x58] sm:$0xff]  }
 0x2df   :  { %v3156_v50 = vrot.slane %v3155_v11, 4  ;;  %v3165_v44 = vor.u32 %v3164_v48, %v3160_v46  ;;  %v3979_v20 = vrot.slane %v3977_v45, 4  ;;  %v3362_v18 = vld [vmem:[#allocation4 + $0x3c] sm:$0xf]  ;;  %v3087_v11 = vld [vmem:[#allocation4 + $0x20] sm:$0xf]  ;;  %v3539_v45 = vmul.bf16 %v3530_v27, %v6165_v60  ;;  %5472 = vmatprep.subr.bf16.mxu1 %v5714_v41 }
 0x2e0   :  { %v3982_v16 = vrot.slane %v3980_v51, 5  ;;  %v3988_v28 = vrot.slane %v3986_v9, 5  ;;  %v3992_v48 = vrot.slane %v3990_v12, 4  ;;  %v7633_v30 = vsel %vm6039_vm11, %v3573_v1, %v3580_v8 }
 0x2e1   :  { %v3161_v52 = vsel %vm5977_vm8, %v3156_v50, %v3160_v46  ;;  %v3166_v37 = vrot.slane %v3165_v44, 4  ;;  %3382 = vrot.lane.b32.xlu0 %v3362_v18, %s5809_s20  ;;  %v3591_v51 = vrot.slane %v7563_v7, 4  ;;  %v2849_v9 = vmul.bf16 %v2840_v4, %v7409_v5  ;;  %v5715_v46 = vld [vmem:[%s8739_s3 + $0xe8] sm:$0xff]  }
 0x2e2   :  { %3108 = vrot.lane.b32.xlu1 %v3087_v11, %s5809_s20  ;;  %3240 = vst.msk [vmem:[#allocation3 + $0x10] sm:$0xf] %vm2200_vm3, %v3161_v52  ;;  %v3983_v55 = vor.u32 %v3982_v16, %v3979_v20  ;;  %v3993_v50 = vor.u32 %v3992_v48, %v3988_v28  ;;  %v7645_v1 = vmul.bf16 %v2841_v34, %v7431_v40  ;;  %v3593_v20 = vshrl.u32 %v3539_v45, 16  ;;  %v3960_v52 = vld [vmem:[#allocation4 + $0x3c] sm:$0xf] }
 0x2e3   :  { %v3141_v44 = vmul.bf16 %v3132_v39, %v7409_v5  ;;  %v3142_v12 = vmul.bf16 %v3133_v31, %v7431_v40  ;;  %v3596_v27 = vshll.u32 %v3539_v45, 16  ;;  %v2876_v16 = vshll.u32 %v2849_v9, 16  ;;  %5532 = vmatprep.subr.bf16.mxu0 %v5715_v46  ;;  %v3961_v48 = vld [vmem:[#allocation4 + $0x40] sm:$0xf] }
 0x2e4   :  { %v3984_v8 = vrot.slane %v3983_v55, 4  ;;  %v7649_v7 = vrot.slane %v3993_v50, 4  ;;  %v2880_v4 = vshrl.u32 %v2849_v9, 16  ;;  %v2886_v18 = vshll.u32 %v7645_v1, 16  ;;  %v5716_v55 = vld [vmem:[%s8739_s3 + $0x18] sm:$0xff]  }
 0x2e5   :  { %v3168_v11 = vshll.u32 %v3141_v44, 16  ;;  %2794 = vrot.lane.b32.xlu0 %v7499_v33, %s5809_s20  ;;  %v7658_v34 = vrot.slane %v3593_v20, 7  ;;  %v7660_v39 = vrot.slane %v2876_v16, 5  ;;  %v3172_v41 = vshrl.u32 %v3141_v44, 16  ;;  %5473 = vmatpush3.bf16.msra.mxu1 %v5716_v55  ;;  %v3363_v44 = vld [vmem:[#allocation4 + $0x40] sm:$0xf] }
 0x2e6   :  { %2792 = vrot.lane.b32.xlu1 %v7503_v25, %s5809_s20  ;;  %v3989_v31 = vsel %vm5977_vm8, %v3984_v8, %v3988_v28  ;;  %v2882_v45 = vrot.slane %v2880_v4, 4  ;;  %v7666_v33 = vrot.slane %v2886_v18, 5  ;;  %v3178_v25 = vshll.u32 %v3142_v12, 16  ;;  %v5717_v18 = vld [vmem:[%s8739_s3 + $0xa8] sm:$0xff]  }
 0x2e7   :  { %4068 = vst.msk [vmem:[#allocation3 + $0xb0] sm:$0xf] %vm2200_vm3, %v3989_v31  ;;  %v3170_v9 = vrot.slane %v3168_v11, 5  ;;  %v3598_v46 = vor.u32 %v3596_v27, %v7658_v34  ;;  %v3174_v28 = vrot.slane %v3172_v41, 4  ;;  %v3182_v50 = vshrl.u32 %v3142_v12, 16  ;;  %5533 = vmatpush3.bf16.msra.mxu0 %v5717_v18 }
 0x2e8   :  { %v3969_v8 = vmul.bf16 %v3960_v52, %v7409_v5  ;;  %v2883_v20 = vor.u32 %v2882_v45, %v7660_v39  ;;  %v3180_v3 = vrot.slane %v3178_v25, 5  ;;  %v3970_v4 = vmul.bf16 %v3961_v48, %v7431_v40  ;;  %v2842_v52 = vld [vmem:[#allocation4 + $0x18] sm:$0xf]  ;;  %v2843_v31 = vld [vmem:[#allocation4 + $0x1c] sm:$0xf] }
 0x2e9   :  { %v3171_v16 = vsel %vm5977_vm8, %v3166_v37, %v3170_v9  ;;  %2798 = vrot.lane.b32.xlu0 %v7484_v0, %s5809_s20  ;;  %v7682_v12 = vsel %vm6039_vm11, %v3591_v51, %v3598_v46  ;;  %v3175_v27 = vor.u32 %v3174_v28, %v3170_v9  ;;  %v3184_v11 = vrot.slane %v3182_v50, 4  ;;  %v3134_v25 = vld [vmem:[#allocation4 + $0x1c] sm:$0xf]  ;;  %v3135_v46 = vld [vmem:[#allocation4 + $0x20] sm:$0xf]  ;;  %v5718_v9 = vld [vmem:[%s8739_s3 + $0x50] sm:$0xff]  }
 0x2ea   :  { %3384 = vrot.lane.b32.xlu1 %v3363_v44, %s5809_s20  ;;  %3241 = vst.msk [vmem:[#allocation3 + $0x24] sm:$0xf] %vm2200_vm3, %v3171_v16  ;;  %v3996_v37 = vshll.u32 %v3969_v8, 16  ;;  %v7685_v41 = vrot.slane %v2883_v20, 4  ;;  %v4000_v48 = vshrl.u32 %v3969_v8, 16  ;;  %v4006_v55 = vshll.u32 %v3970_v4, 16  ;;  %5474 = vmatprep.subr.bf16.mxu1 %v5718_v9 }
 0x2eb   :  { %v4010_v45 = vshrl.u32 %v3970_v4, 16  ;;  %v3176_v0 = vrot.slane %v3175_v27, 4  ;;  %v3185_v44 = vor.u32 %v3184_v11, %v3180_v3  ;;  %v2870_v51 = vshrl.u32 %v7567_v32, 16  ;;  %v3962_v16 = vld [vmem:[#allocation4 + $0x44] sm:$0xf]  ;;  %v5719_v4 = vld [vmem:[%s8739_s3 + $0x10] sm:$0xff]  }
 0x2ec   :  { %v3998_v54 = vrot.slane %v3996_v37, 5  ;;  %v2889_v28 = vsel %vm5977_vm8, %v7685_v41, %v7666_v33  ;;  %v4002_v50 = vrot.slane %v4000_v48, 4  ;;  %v4008_v8 = vrot.slane %v4006_v55, 5  ;;  %5475 = vmatpush3.bf16.msra.mxu1 %v5719_v4  ;;  %v5723_v4 = vld [vmem:[%s8739_s3 + $0xa0] sm:$0xff]  }
 0x2ed   :  { %v4012_v20 = vrot.slane %v4010_v45, 4  ;;  %2802 = vrot.lane.b32.xlu0 %v7531_v13, %s5809_s20  ;;  %v3181_v32 = vsel %vm5977_vm8, %v3176_v0, %v3180_v3  ;;  %v3186_v18 = vrot.slane %v3185_v44, 4  ;;  %v2872_v11 = vrot.slane %v2870_v51, 4  ;;  %v2828_v41 = vld [vmem:[#allocation4 + $0x20] sm:$0xf] }
 0x2ee   :  { %2796 = vrot.lane.b32.xlu1 %v7513_v14, %s5809_s20  ;;  %v3999_v27 = vsel %vm5977_vm8, %v7649_v7, %v3998_v54  ;;  %3242 = vst.msk [vmem:[#allocation3 + $0x38] sm:$0xf] %vm2200_vm3, %v3181_v32  ;;  %v4003_v37 = vor.u32 %v4002_v50, %v3998_v54  ;;  %v2851_v13 = vmul.bf16 %v2842_v52, %v7437_v15  ;;  %v3963_v7 = vld [vmem:[#allocation4 + $0x48] sm:$0xf]  ;;  %2836 = vst.msk [vmem:[#allocation3 + $0x80] sm:$0xf] %vm2200_vm3, %v2828_v41 }
 0x2ef   :  { %v4013_v48 = vor.u32 %v4012_v20, %v4008_v8  ;;  %4069 = vst.msk [vmem:[#allocation3 + $0xc4] sm:$0xf] %vm2200_vm3, %v3999_v27  ;;  %v7711_v55 = vmul.bf16 %v2843_v31, %v7441_v56  ;;  %v2873_v14 = vor.u32 %v2872_v11, %v7601_v19  ;;  %v3143_v3 = vmul.bf16 %v3134_v25, %v7437_v15  ;;  %v5720_v52 = vld [vmem:[%s8739_s3 + $0x48] sm:$0xff]   ;;  %v5721_v31 = vld [vmem:[%s8739_s3 + $0xe0] sm:$0xff]  }
 0x2f0   :  { %v3144_v45 = vmul.bf16 %v3135_v46, %v7441_v56  ;;  %v3971_v0 = vmul.bf16 %v3962_v16, %v7437_v15  ;;  %v4004_v54 = vrot.slane %v4003_v37, 4  ;;  %v2896_v51 = vshll.u32 %v2851_v13, 16  ;;  %v5722_v16 = vld [vmem:[%s8739_s3 + $0x8] sm:$0xff]   ;;  %5476 = vmatprep.subr.bf16.mxu1 %v5720_v52  ;;  %5534 = vmatprep.subr.bf16.mxu0 %v5721_v31  ;;  %v5724_v11 = vld [vmem:[%s8739_s3 + $0x40] sm:$0xff]  }
 0x2f1   :  { %v7717_v44 = vrot.slane %v4013_v48, 4  ;;  %v2900_v50 = vshrl.u32 %v2851_v13, 16  ;;  %3618 = vrot.lane.b32.xlu0 %v7553_v17, %s5809_s20  ;;  %v7729_v25 = vrot.slane %v2873_v14, 4  ;;  %v2906_v46 = vshll.u32 %v7711_v55, 16  ;;  %5477 = vmatpush3.bf16.msra.mxu1 %v5722_v16  ;;  %v5725_v14 = vld [vmem:[%s8739_s3] sm:$0xff]  }
 0x2f2   :  { %2800 = vrot.lane.b32.xlu1 %v7538_v59, %s5809_s20  ;;  %v3188_v9 = vshll.u32 %v3143_v3, 16  ;;  %v3192_v20 = vshrl.u32 %v3143_v3, 16  ;;  %v4009_v17 = vsel %vm5977_vm8, %v4004_v54, %v4008_v8  ;;  %v7740_v32 = vrot.slane %v2896_v51, 5  ;;  %5535 = vmatpush3.bf16.msra.mxu0 %v5723_v4 }
 0x2f3   :  { %v2902_v59 = vrot.slane %v2900_v50, 4  ;;  %v3198_v27 = vshll.u32 %v3144_v45, 16  ;;  %4070 = vst.msk [vmem:[#allocation3 + $0xd8] sm:$0xf] %vm2200_vm3, %v4009_v17  ;;  %v2879_v37 = vsel %vm5977_vm8, %v7729_v25, %v7660_v39  ;;  %v7750_v48 = vrot.slane %v2906_v46, 5  ;;  %5478 = vmatprep.subr.bf16.mxu1 %v5724_v11 }
 0x2f4   :  { %v3190_v8 = vrot.slane %v3188_v9, 5  ;;  %v3194_v13 = vrot.slane %v3192_v20, 4  ;;  %v3202_v51 = vshrl.u32 %v3144_v45, 16  ;;  %v3972_v50 = vmul.bf16 %v3963_v7, %v7441_v56  ;;  %v5729_v20 = vld [vmem:[%s8739_s3 + $0xd8] sm:$0xff]   ;;  %v3531_v11 = vld [vmem:[#allocation4 + $0x48] sm:$0xf] }
 0x2f5   :  { %v2903_v3 = vor.u32 %v2902_v59, %v7740_v32  ;;  %v3200_v54 = vrot.slane %v3198_v27, 5  ;;  %3622 = vrot.lane.b32.xlu0 %v7575_v6, %s5809_s20  ;;  %v4016_v46 = vshll.u32 %v3971_v0, 16  ;;  %v4020_v9 = vshrl.u32 %v3971_v0, 16  ;;  %v5730_v45 = vld [vmem:[%s8739_s3 + $0x118] sm:$0xff]   ;;  %v5734_v0 = vld [vmem:[%s8739_s3 + $0xd0] sm:$0xff]   ;;  %5479 = vmatpush3.bf16.msra.mxu1 %v5725_v14 }
 0x2f6   :  { %2804 = vrot.lane.b32.xlu1 %v7579_v62, %s5809_s20  ;;  %v3191_v52 = vsel %vm5977_vm8, %v3186_v18, %v3190_v8  ;;  %v3195_v31 = vor.u32 %v3194_v13, %v3190_v8  ;;  %v3204_v6 = vrot.slane %v3202_v51, 4  ;;  %v4026_v62 = vshll.u32 %v3972_v50, 16  ;;  %v5731_v18 = vld [vmem:[%s8739_s3 + $0x98] sm:$0xff]   ;;  %5536 = vmatprep.subr.bf16.mxu0 %v5729_v20  ;;  %v5735_v20 = vld [vmem:[%s8739_s3 + $0x90] sm:$0xff]  }
 0x2f7   :  { %v7769_v7 = vrot.slane %v2903_v3, 4  ;;  %3243 = vst.msk [vmem:[#allocation3 + $0x4c] sm:$0xf] %vm2200_vm3, %v3191_v52  ;;  %v4030_v16 = vshrl.u32 %v3972_v50, 16  ;;  %v4018_v17 = vrot.slane %v4016_v46, 5  ;;  %v4022_v59 = vrot.slane %v4020_v9, 4  ;;  %5624 = vmatprep.subr.bf16.mxu1 %v5730_v45  ;;  %5537 = vmatpush3.bf16.msra.mxu0 %v5731_v18 }
 0x2f8   :  { %v3196_v4 = vrot.slane %v3195_v31, 4  ;;  %v2890_v27 = vshrl.u32 %v7645_v1, 16  ;;  %v3205_v13 = vor.u32 %v3204_v6, %v3200_v54  ;;  %v4028_v3 = vrot.slane %v4026_v62, 5  ;;  %v2844_v50 = vld [vmem:[#allocation4 + $0x20] sm:$0xf]  ;;  %5538 = vmatprep.subr.bf16.mxu0 %v5734_v0 }
 0x2f9   :  { %v2909_v8 = vsel %vm5977_vm8, %v7769_v7, %v7750_v48  ;;  %v4032_v51 = vrot.slane %v4030_v16, 4  ;;  %v2845_v52 = vld [vmem:[#allocation4 + $0x24] sm:$0xf]  ;;  %3626 = vrot.lane.b32.xlu0 %v7599_v36, %s5809_s20  ;;  %v4019_v14 = vsel %vm5977_vm8, %v7717_v44, %v4018_v17  ;;  %v4023_v31 = vor.u32 %v4022_v59, %v4018_v17  ;;  %v8833_v16 = vld [vmem:[#allocation11_spill] sm:$0xff]  ;;  %v5738_v17 = vld [vmem:[%s8739_s3 + $0xc8] sm:$0xff]  }
 0x2fa   :  { %3620 = vrot.lane.b32.xlu1 %v7592_v35, %s5809_s20  ;;  %v3201_v1 = vsel %vm5977_vm8, %v3196_v4, %v3200_v54  ;;  %v2892_v46 = vrot.slane %v2890_v27, 4  ;;  %v3136_v9 = vld [vmem:[#allocation4 + $0x24] sm:$0xf]  ;;  %v7795_v45 = vrot.slane %v3205_v13, 4  ;;  %4071 = vst.msk [vmem:[#allocation3 + $0xec] sm:$0xf] %vm2200_vm3, %v4019_v14  ;;  %v3540_v35 = vmul.bf16 %v3531_v11, %v6228_v23 }
 0x2fb   :  { %3244 = vst.msk [vmem:[#allocation3 + $0x60] sm:$0xf] %vm2200_vm3, %v3201_v1  ;;  %v4033_v36 = vor.u32 %v4032_v51, %v4028_v3  ;;  %v3600_v54 = vrot.slane %v7658_v34, 4  ;;  %v4024_v44 = vrot.slane %v4023_v31, 4  ;;  %v2853_v62 = vmul.bf16 %v2844_v50, %v7448_v42  ;;  %v2822_v4 = vld [vmem:[#allocation4 + $0x8] sm:$0xf]  ;;  %5539 = vmatpush3.bf16.msra.mxu0 %v5735_v20 }
 0x2fc   :  { %v2893_v6 = vor.u32 %v2892_v46, %v7666_v33  ;;  %v7804_v18 = vmul.bf16 %v2845_v52, %v8833_v16  ;;  %v3602_v27 = vshrl.u32 %v3540_v35, 16  ;;  %v3605_v11 = vshll.u32 %v3540_v35, 16  ;;  %v3964_v0 = vld [vmem:[#allocation4 + $0x4c] sm:$0xf]  ;;  %2830 = vst.msk [vmem:[#allocation3 + $0x8] sm:$0xf] %vm2200_vm3, %v2822_v4  ;;  %5540 = vmatprep.subr.bf16.mxu0 %v5738_v17 }
 0x2fd   :  { %v7809_v59 = vrot.slane %v4033_v36, 4  ;;  %v3145_v34 = vmul.bf16 %v3136_v9, %v7448_v42  ;;  %v5740_v13 = vld [vmem:[%s8739_s3 + $0x88] sm:$0xff]   ;;  %v8834_v51 = vsel %vm5977_vm8, %v7619_v26, %v7601_v19  ;;  %v4029_v50 = vsel %vm5977_vm8, %v4024_v44, %v4028_v3  ;;  %v5743_v31 = vld [vmem:[%s8739_s3 + $0xc0] sm:$0xff]  }
 0x2fe   :  { %2940 = vrot.lane.b32.xlu0 %v8834_v51, %s5809_s20  ;;  %3624 = vrot.lane.b32.xlu1 %v7633_v30, %s5809_s20  ;;  %v7826_v52 = vrot.slane %v2893_v6, 4  ;;  %v2916_v1 = vshll.u32 %v2853_v62, 16  ;;  %v2920_v14 = vshrl.u32 %v2853_v62, 16  ;;  %4072 = vst.msk [vmem:[#allocation3 + $0x100] sm:$0xf] %vm2200_vm3, %v4029_v50  ;;  %v7832_v46 = vrot.slane %v3602_v27, 7 }
 0x2ff   :  { %v2926_v19 = vshll.u32 %v7804_v18, 16  ;;  %v3208_v26 = vshll.u32 %v3145_v34, 16  ;;  %v3212_v9 = vshrl.u32 %v3145_v34, 16  ;;  %v2823_v30 = vld [vmem:[#allocation4 + $0xc] sm:$0xf]  ;;  %v3973_v35 = vmul.bf16 %v3964_v0, %v7448_v42  ;;  %5541 = vmatpush3.bf16.msra.mxu0 %v5740_v13  ;;  %v5744_v51 = vld [vmem:[%s8739_s3 + $0x80] sm:$0xff]  }
 0x300   :  { %v2899_v3 = vsel %vm5977_vm8, %v7826_v52, %v7740_v32  ;;  %v7839_v20 = vrot.slane %v2916_v1, 5  ;;  %v2922_v36 = vrot.slane %v2920_v14, 4  ;;  %v3532_v44 = vld [vmem:[#allocation4 + $0x4c] sm:$0xf]  ;;  %2831 = vst.msk [vmem:[#allocation3 + $0x1c] sm:$0xf] %vm2200_vm3, %v2823_v30  ;;  %v3607_v4 = vor.u32 %v3605_v11, %v7832_v46  ;;  %5542 = vmatprep.subr.bf16.mxu0 %v5743_v31 }
 0x301   :  { %v2824_v6 = vld [vmem:[#allocation4 + $0x10] sm:$0xf]  ;;  %v3088_v62 = vld [vmem:[#allocation4 + $0x24] sm:$0xf]  ;;  %v7844_v27 = vrot.slane %v2926_v19, 5  ;;  %v3210_v17 = vrot.slane %v3208_v26, 5 }
 0x302   :  { %v3214_v34 = vrot.slane %v3212_v9, 4  ;;  %2832 = vst.msk [vmem:[#allocation3 + $0x30] sm:$0xf] %vm2200_vm3, %v2824_v6  ;;  %3110 = vrot.lane.b32.xlu0 %v3088_v62, %s5809_s20  ;;  %3628 = vrot.lane.b32.xlu1 %v7682_v12, %s5809_s20  ;;  %v2923_v0 = vor.u32 %v2922_v36, %v7839_v20  ;;  %v4036_v50 = vshll.u32 %v3973_v35, 16  ;;  %v4040_v11 = vshrl.u32 %v3973_v35, 16 }
 0x303   :  { %v2910_v1 = vshrl.u32 %v7711_v55, 16  ;;  %v3666_v14 = vld [vmem:[#allocation4 + $0x30] sm:$0xf]  ;;  %v7857_v13 = vsel %vm6039_vm11, %v3600_v54, %v3607_v4  ;;  %v3211_v19 = vsel %vm5977_vm8, %v7795_v45, %v3210_v17  ;;  %v3541_v9 = vmul.bf16 %v3532_v44, %v6221_v21  ;;  %v3667_v30 = vld [vmem:[#allocation4 + $0x34] sm:$0xf]  ;;  %5543 = vmatpush3.bf16.msra.mxu0 %v5744_v51 }
 0x304   :  { %v3215_v26 = vor.u32 %v3214_v34, %v3210_v17  ;;  %v2825_v12 = vld [vmem:[#allocation4 + $0x14] sm:$0xf]  ;;  %v2826_v36 = vld [vmem:[#allocation4 + $0x18] sm:$0xf]  ;;  %v7863_v6 = vrot.slane %v2923_v0, 4  ;;  %v4038_v55 = vrot.slane %v4036_v50, 5  ;;  %v3675_v0 = vmul.bf16 %v3666_v14, %v7227_v47 }
 0x305   :  { %3245 = vst.msk [vmem:[#allocation3 + $0x74] sm:$0xf] %vm2200_vm3, %v3211_v19  ;;  %v4042_v35 = vrot.slane %v4040_v11, 4  ;;  %v2912_v62 = vrot.slane %v2910_v1, 4  ;;  %v3668_v54 = vld [vmem:[#allocation4 + $0x38] sm:$0xf] }
 0x306   :  { %2833 = vst.msk [vmem:[#allocation3 + $0x44] sm:$0xf] %vm2200_vm3, %v2825_v12  ;;  %2834 = vst.msk [vmem:[#allocation3 + $0x58] sm:$0xf] %vm2200_vm3, %v2826_v36  ;;  %v3216_v45 = vrot.slane %v3215_v26, 4  ;;  %v3609_v4 = vrot.slane %v7832_v46, 4  ;;  %2944 = vrot.lane.b32.xlu0 %v2889_v28, %s5809_s20  ;;  %2942 = vrot.lane.b32.xlu1 %v2879_v37, %s5809_s20  ;;  %v2929_v46 = vsel %vm5977_vm8, %v7863_v6, %v7844_v27 }
 0x307   :  { %v3611_v44 = vshrl.u32 %v3541_v9, 16  ;;  %v3614_v17 = vshll.u32 %v3541_v9, 16  ;;  %v2827_v31 = vld [vmem:[#allocation4 + $0x1c] sm:$0xf]  ;;  %v4039_v34 = vsel %vm5977_vm8, %v7809_v59, %v4038_v55  ;;  %v4043_v51 = vor.u32 %v4042_v35, %v4038_v55  ;;  %v3089_v28 = vld [vmem:[#allocation4 + $0x28] sm:$0xf] }
 0x308   :  { %v2930_v33 = vshrl.u32 %v7804_v18, 16  ;;  %2835 = vst.msk [vmem:[#allocation3 + $0x6c] sm:$0xf] %vm2200_vm3, %v2827_v31  ;;  %v3221_v39 = vsel %vm5977_vm8, %v3216_v45, %v7258_v43  ;;  %4073 = vst.msk [vmem:[#allocation3 + $0x114] sm:$0xf] %vm2200_vm3, %v4039_v34  ;;  %v2913_v25 = vor.u32 %v2912_v62, %v7750_v48  ;;  %v3676_v59 = vmul.bf16 %v3667_v30, %v7402_v58 }
 0x309   :  { %v3613_v37 = vrot.slane %v3611_v44, 7  ;;  %v3669_v50 = vld [vmem:[#allocation4 + $0x3c] sm:$0xf]  ;;  %3246 = vst.msk [vmem:[#allocation3 + $0x88] sm:$0xf] %vm2200_vm3, %v3221_v39  ;;  %v4044_v18 = vrot.slane %v4043_v51, 4  ;;  %v3677_v1 = vmul.bf16 %v3668_v54, %v7409_v5 }
 0x30a   :  { %v2932_v11 = vrot.slane %v2930_v33, 4  ;;  %v2829_v19 = vld [vmem:[#allocation4 + $0x24] sm:$0xf]  ;;  %v3650_v43 = vld [vmem:[#allocation4 + $0x30] sm:$0xf]  ;;  %v7900_v9 = vrot.slane %v2913_v25, 4  ;;  %3112 = vrot.lane.b32.xlu1 %v3089_v28, %s5809_s20  ;;  %v3678_v62 = vmul.bf16 %v3669_v50, %v7431_v40 }
 0x30b   :  { %v3364_v26 = vld [vmem:[#allocation4 + $0x44] sm:$0xf]  ;;  %v3616_v12 = vor.u32 %v3614_v17, %v3613_v37  ;;  %v3685_v36 = vshrl.u32 %v3675_v0, 16  ;;  %v3688_v55 = vshll.u32 %v3675_v0, 16  ;;  %2837 = vst.msk [vmem:[#allocation3 + $0x94] sm:$0xf] %vm2200_vm3, %v2829_v19  ;;  %v4049_v14 = vsel %vm5977_vm8, %v4044_v18, %v7393_v22 }
 0x30c   :  { %3658 = vst.msk [vmem:[#allocation3 + $0xa8] sm:$0xf] %vm2200_vm3, %v3650_v43  ;;  %3386 = vrot.lane.b32.xlu0 %v3364_v26, %s5809_s20  ;;  %v3694_v30 = vshll.u32 %v3676_v59, 16  ;;  %v2933_v35 = vor.u32 %v2932_v11, %v7844_v27  ;;  %v3670_v54 = vld [vmem:[#allocation4 + $0x40] sm:$0xf]  ;;  %v2919_v44 = vsel %vm5977_vm8, %v7900_v9, %v7839_v20  ;;  %v3704_v39 = vshll.u32 %v3677_v1, 16 }
 0x30d   :  { %v3651_v45 = vld [vmem:[#allocation4 + $0x34] sm:$0xf]  ;;  %4074 = vst.msk [vmem:[#allocation3 + $0x128] sm:$0xf] %vm2200_vm3, %v4049_v14  ;;  %v7918_v17 = vsel %vm6039_vm11, %v3609_v4, %v3616_v12  ;;  %v3687_v31 = vrot.slane %v3685_v36, 4  ;;  %v3690_v34 = vrot.slane %v3688_v55, 5  ;;  %v3679_v18 = vmul.bf16 %v3670_v54, %v7437_v15 }
 0x30e   :  { %v3671_v51 = vld [vmem:[#allocation4 + $0x44] sm:$0xf]  ;;  %3659 = vst.msk [vmem:[#allocation3 + $0xbc] sm:$0xf] %vm2200_vm3, %v3651_v45  ;;  %v3652_v33 = vld [vmem:[#allocation4 + $0x38] sm:$0xf]  ;;  %2946 = vrot.lane.b32.xlu1 %v2899_v3, %s5809_s20 }
 0x30f   :  { %v7921_v41 = vrot.slane %v3694_v30, 5  ;;  %v2934_v28 = vrot.slane %v2933_v35, 4  ;;  %v3708_v25 = vshrl.u32 %v3677_v1, 16  ;;  %3660 = vst.msk [vmem:[#allocation3 + $0xd0] sm:$0xf] %vm2200_vm3, %v3652_v33  ;;  %v3691_v37 = vor.u32 %v3690_v34, %v3687_v31 }
 0x310   :  { %v3714_v0 = vshll.u32 %v3678_v62, 16  ;;  %v3698_v50 = vshrl.u32 %v3676_v59, 16  ;;  %2948 = vrot.lane.b32.xlu0 %v2909_v8, %s5809_s20  ;;  %v8835_v4 = vrot.slane %v7411_v57, 5  ;;  %v7943_v11 = vrot.slane %v3704_v39, 5  ;;  %v3672_v48 = vld [vmem:[#allocation4 + $0x48] sm:$0xf] }
 0x311   :  { %v3710_v1 = vrot.slane %v3708_v25, 4  ;;  %v7946_v19 = vmul.bf16 %v3671_v51, %v7441_v56  ;;  %v3673_v7 = vld [vmem:[#allocation4 + $0x4c] sm:$0xf]  ;;  %v3653_v8 = vld [vmem:[#allocation4 + $0x3c] sm:$0xf]  ;;  %v7948_v26 = vrot.slane %v3691_v37, 4  ;;  %v3681_v25 = vmul.bf16 %v3672_v48, %v7448_v42 }
 0x312   :  { %v7941_v59 = vsel %vm5977_vm8, %v2934_v28, %v8835_v4  ;;  %v3365_v43 = vld [vmem:[#allocation4 + $0x48] sm:$0xf]  ;;  %v7950_v32 = vrot.slane %v3714_v0, 5  ;;  %v3700_v52 = vrot.slane %v3698_v50, 4  ;;  %v3724_v57 = vshll.u32 %v3679_v18, 16  ;;  %v3375_v4 = vpop.permute.xlu0 %3374 }
 0x313   :  { %3661 = vst.msk [vmem:[#allocation3 + $0xe4] sm:$0xf] %vm2200_vm3, %v3653_v8  ;;  %v3654_v3 = vld [vmem:[#allocation4 + $0x40] sm:$0xf]  ;;  %v3711_v12 = vor.u32 %v3710_v1, %v7943_v11  ;;  %v3728_v36 = vshrl.u32 %v3679_v18, 16  ;;  %v3734_v55 = vshll.u32 %v7946_v19, 16  ;;  %v3697_v35 = vsel %vm5977_vm8, %v7948_v26, %v7921_v41  ;;  %3388 = vrot.lane.b32.xlu1 %v3365_v43, %s5809_s20 }
 0x314   :  { %v3718_v14 = vshrl.u32 %v3678_v62, 16  ;;  %v2281_v30 = vld [vmem:[#allocation4 + $0x8] sm:$0xf]  ;;  %3662 = vst.msk [vmem:[#allocation3 + $0xf8] sm:$0xf] %vm2200_vm3, %v3654_v3  ;;  %v3701_v54 = vor.u32 %v3700_v52, %v7921_v41  ;;  %v7961_v45 = vrot.slane %v3724_v57, 5  ;;  %3630 = vrot.lane.b32.xlu0 %v7857_v13, %s5809_s20 }
 0x315   :  { %v5287_v31 = vrot.slane %v7462_v61, 11  ;;  %v7967_v62 = vrot.slane %v3711_v12, 4  ;;  %v3730_v34 = vrot.slane %v3728_v36, 4  ;;  %v7969_v51 = vrot.slane %v3734_v55, 5  ;;  %v2282_v13 = vld [vmem:[#allocation4 + $0xc] sm:$0xf] }
 0x316   :  { %v3720_v33 = vrot.slane %v3718_v14, 4  ;;  %v7971_v28 = vrot.slane %v3701_v54, 4  ;;  %v7978_v61 = vmul.bf16 %v3673_v7, %v8833_v16  ;;  %v3656_v37 = vld [vmem:[#allocation4 + $0x48] sm:$0xf]  ;;  %v2283_v1 = vld [vmem:[#allocation4 + $0x10] sm:$0xf] }
 0x317   :  { %v3278_v39 = vsel %vm6039_vm11, %v5287_v31, %v7465_v29  ;;  %v3717_v0 = vsel %vm5977_vm8, %v7967_v62, %v7950_v32  ;;  %v3731_v50 = vor.u32 %v3730_v34, %v7961_v45  ;;  %v2290_v29 = vmul.bf16 %v2281_v30, %v6013_v38  ;;  %3664 = vst.msk [vmem:[#allocation3 + $0x120] sm:$0xf] %vm2200_vm3, %v3656_v37  ;;  %v3655_v52 = vld [vmem:[#allocation4 + $0x44] sm:$0xf]  ;;  %v2284_v55 = vld [vmem:[#allocation4 + $0x14] sm:$0xf] }
 0x318   :  { %v3721_v18 = vor.u32 %v3720_v33, %v7950_v32  ;;  %3350 = vst.msk [vmem:[#allocation3 + $0xa0] sm:$0xf] %vm2200_vm3, %v3278_v39  ;;  %v3707_v48 = vsel %vm5977_vm8, %v7971_v28, %v7943_v11  ;;  %v3744_v7 = vshll.u32 %v3681_v25, 16  ;;  %v3748_v8 = vshrl.u32 %v3681_v25, 16  ;;  %2952 = vrot.lane.b32.xlu0 %v2929_v46, %s5809_s20  ;;  %2950 = vrot.lane.b32.xlu1 %v2919_v44, %s5809_s20  ;;  %v3657_v30 = vld [vmem:[#allocation4 + $0x4c] sm:$0xf] }
 0x319   :  { %3398 = vst.msk [vmem:[#allocation3 + $0xa0] sm:$0xf] %vm2429_vm14, %v3375_v4  ;;  %v3754_v43 = vshll.u32 %v7978_v61, 16  ;;  %v8007_v57 = vrot.slane %v3731_v50, 4  ;;  %v2312_v12 = vshrl.u32 %v2290_v29, 16  ;;  %v2315_v36 = vshll.u32 %v2290_v29, 16 }
 0x31a   :  { %v8009_v3 = vrot.slane %v3721_v18, 4  ;;  %3663 = vst.msk [vmem:[#allocation3 + $0x10c] sm:$0xf] %vm2200_vm3, %v3655_v52  ;;  %v8012_v14 = vrot.slane %v3744_v7, 5  ;;  %v3750_v27 = vrot.slane %v3748_v8, 4  ;;  %v2291_v46 = vmul.bf16 %v2282_v13, %v6032_v63 }
 0x31b   :  { %v8014_v6 = vrot.slane %v3754_v43, 5  ;;  %v3737_v20 = vsel %vm5977_vm8, %v8007_v57, %v7969_v51  ;;  %v2314_v44 = vrot.slane %v2312_v12, 7  ;;  %v3738_v54 = vshrl.u32 %v7946_v19, 16  ;;  %3665 = vst.msk [vmem:[#allocation3 + $0x134] sm:$0xf] %vm2200_vm3, %v3657_v30 }
 0x31c   :  { %v3727_v9 = vsel %vm5977_vm8, %v8009_v3, %v7961_v45  ;;  %v3910_v31 = vld [vmem:[#allocation4 + $0x34] sm:$0xf]  ;;  %v3751_v34 = vor.u32 %v3750_v27, %v8012_v14  ;;  %v2321_v33 = vshrl.u32 %v2291_v46, 16  ;;  %v2324_v39 = vshll.u32 %v2291_v46, 16  ;;  %3632 = vrot.lane.b32.xlu1 %v7918_v17, %s5809_s20  ;;  %v2285_v19 = vld [vmem:[#allocation4 + $0x18] sm:$0xf] }
 0x31d   :  { %v2292_v25 = vmul.bf16 %v2283_v1, %v6056_v24  ;;  %3926 = vrot.lane.b32.xlu0 %v3910_v31, %s5809_s20  ;;  %v2317_v13 = vor.u32 %v2315_v36, %v2314_v44  ;;  %v2319_v37 = vrot.slane %v2314_v44, 4  ;;  %v3740_v50 = vrot.slane %v3738_v54, 4  ;;  %v2286_v36 = vld [vmem:[#allocation4 + $0x1c] sm:$0xf]  ;;  %v2287_v26 = vld [vmem:[#allocation4 + $0x20] sm:$0xf] }
 0x31e   :  { %v2293_v18 = vmul.bf16 %v2284_v55, %v6147_v49  ;;  %v8033_v4 = vrot.slane %v3751_v34, 4  ;;  %v2323_v29 = vrot.slane %v2321_v33, 7  ;;  %v8836_v43 = vrot.slane %v7366_v53, 4  ;;  %v3912_v34 = vld [vmem:[#allocation4 + $0x3c] sm:$0xf] }
 0x31f   :  { %v2330_v7 = vshrl.u32 %v2292_v25, 16  ;;  %v2333_v8 = vshll.u32 %v2292_v25, 16  ;;  %v3741_v52 = vor.u32 %v3740_v50, %v7969_v51  ;;  %v3758_v54 = vshrl.u32 %v7978_v61, 16  ;;  %v3911_v33 = vld [vmem:[#allocation4 + $0x38] sm:$0xf] }
 0x320   :  { %v2318_v1 = vsel %vm6039_vm11, %v8836_v43, %v2317_v13  ;;  %v2339_v12 = vshrl.u32 %v2293_v18, 16  ;;  %v2342_v17 = vshll.u32 %v2293_v18, 16  ;;  %v3757_v55 = vsel %vm5977_vm8, %v8033_v4, %v8014_v6  ;;  %2954 = vrot.lane.b32.xlu1 %v7941_v59, %s5809_s20  ;;  %v2972_v18 = vld [vmem:[#allocation4 + $0x8] sm:$0x8]  ;;  %v2974_v43 = vld [vmem:[#allocation4 + $0x10] sm:$0xf] }
 0x321   :  { %2382 = vst.msk [vmem:[#allocation3 + $0x14] sm:$0xf] %vm2200_vm3, %v2318_v1  ;;  %v2326_v27 = vor.u32 %v2324_v39, %v2323_v29  ;;  %v2328_v46 = vrot.slane %v2323_v29, 4  ;;  %v2332_v30 = vrot.slane %v2330_v7, 7  ;;  %3768 = vrot.lane.b32.xlu0 %v3697_v35, %s5809_s20  ;;  %v8053_v53 = vrot.slane %v3741_v52, 4 }
 0x322   :  { %v2341_v44 = vrot.slane %v2339_v12, 7  ;;  %v2294_v31 = vmul.bf16 %v2285_v19, %v6165_v60  ;;  %v2295_v41 = vmul.bf16 %v2286_v36, %v6228_v23  ;;  %v3760_v61 = vrot.slane %v3758_v54, 4  ;;  %v2973_v19 = vld [vmem:[#allocation4 + $0xc] sm:$0xf]  ;;  %v2976_v11 = vld [vmem:[#allocation4 + $0x18] sm:$0xf] }
 0x323   :  { %v2327_v39 = vsel %vm6039_vm11, %v2319_v37, %v2326_v27  ;;  %v2335_v25 = vor.u32 %v2333_v8, %v2332_v30  ;;  %v2337_v13 = vrot.slane %v2332_v30, 4  ;;  %v3747_v59 = vsel %vm5977_vm8, %v8053_v53, %v8012_v14  ;;  %v2439_v45 = vld [vmem:[#allocation4 + $0x8] sm:$0xf] }
 0x324   :  { %2383 = vst.msk [vmem:[#allocation3 + $0x28] sm:$0xf] %vm2200_vm3, %v2327_v39  ;;  %v2344_v35 = vor.u32 %v2342_v17, %v2341_v44  ;;  %v2346_v50 = vrot.slane %v2341_v44, 4  ;;  %v2348_v29 = vshrl.u32 %v2294_v31, 16  ;;  %v2351_v7 = vshll.u32 %v2294_v31, 16  ;;  %3928 = vrot.lane.b32.xlu1 %v3911_v33, %s5809_s20  ;;  %v8838_v44 = vld [vmem:[#allocation10_spill] sm:$0xff] }
 0x325   :  { %v2336_v37 = vsel %vm6039_vm11, %v2328_v46, %v2335_v25  ;;  %v2357_v8 = vshrl.u32 %v2295_v41, 16  ;;  %3930 = vrot.lane.b32.xlu0 %v3912_v34, %s5809_s20  ;;  %v3761_v52 = vor.u32 %v3760_v61, %v8014_v6  ;;  %v2360_v12 = vshll.u32 %v2295_v41, 16  ;;  %v8837_v46 = vld [vmem:[#allocation9_spill] sm:$0xff]  ;;  %v2975_v41 = vld [vmem:[#allocation4 + $0x14] sm:$0xf] }
 0x326   :  { %2384 = vst.msk [vmem:[#allocation3 + $0x3c] sm:$0xf] %vm2200_vm3, %v2336_v37  ;;  %v2345_v1 = vsel %vm6039_vm11, %v2337_v13, %v2344_v35  ;;  %v2296_v17 = vmul.bf16 %v2287_v26, %v6221_v21  ;;  %v2350_v36 = vrot.slane %v2348_v29, 7  ;;  %v2981_v30 = vmul.bf16 %v2972_v18, %v8837_v46  ;;  %v3250_v37 = vld [vmem:[#allocation4 + $0x30] sm:$0xf]  ;;  %v8839_v26 = vld [vmem:[#allocation33_spill] sm:$0xff] }
 0x327   :  { %2385 = vst.msk [vmem:[#allocation3 + $0x50] sm:$0xf] %vm2200_vm3, %v2345_v1  ;;  %v2359_v27 = vrot.slane %v2357_v8, 7  ;;  %v2982_v54 = vmul.bf16 %v2973_v19, %v8838_v44  ;;  %v3762_v31 = vrot.slane %v3761_v52, 4  ;;  %v2983_v39 = vmul.bf16 %v2974_v43, %v6013_v38  ;;  %v3251_v43 = vld [vmem:[#allocation4 + $0x34] sm:$0xf] }
 0x328   :  { %v2366_v34 = vshrl.u32 %v2296_v17, 16  ;;  %v2369_v33 = vshll.u32 %v2296_v17, 16  ;;  %v2353_v25 = vor.u32 %v2351_v7, %v2350_v36  ;;  %v2355_v13 = vrot.slane %v2350_v36, 4  ;;  %3770 = vrot.lane.b32.xlu1 %v3707_v48, %s5809_s20  ;;  %v3914_v17 = vld [vmem:[#allocation4 + $0x44] sm:$0xf] }
 0x329   :  { %v2362_v35 = vor.u32 %v2360_v12, %v2359_v27  ;;  %v2364_v61 = vrot.slane %v2359_v27, 4  ;;  %3772 = vrot.lane.b32.xlu0 %v3717_v0, %s5809_s20  ;;  %v8840_v18 = vrot.slane %v8839_v26, 5  ;;  %v2991_v7 = vshrl.u32 %v2981_v30, 16  ;;  %v3913_v36 = vld [vmem:[#allocation4 + $0x40] sm:$0xf] }
 0x32a   :  { %v2368_v29 = vrot.slane %v2366_v34, 7  ;;  %v2996_v8 = vshrl.u32 %v2982_v54, 16  ;;  %v2354_v32 = vsel %vm6039_vm11, %v2346_v50, %v2353_v25  ;;  %v2999_v0 = vshll.u32 %v2982_v54, 16  ;;  %v3915_v3 = vld [vmem:[#allocation4 + $0x48] sm:$0xf] }
 0x32b   :  { %v8094_v19 = vsel %vm5977_vm8, %v3762_v31, %v8840_v18  ;;  %v2363_v62 = vsel %vm6039_vm11, %v2355_v13, %v2362_v35  ;;  %v3005_v1 = vshrl.u32 %v2983_v39, 16  ;;  %2386 = vst.msk [vmem:[#allocation3 + $0x64] sm:$0xf] %vm2200_vm3, %v2354_v32  ;;  %v5286_v48 = vrot.slane %v2991_v7, 11 }
 0x32c   :  { %2387 = vst.msk [vmem:[#allocation3 + $0x78] sm:$0xf] %vm2200_vm3, %v2363_v62  ;;  %v2371_v28 = vor.u32 %v2369_v33, %v2368_v29  ;;  %v2998_v52 = vrot.slane %v2996_v8, 7  ;;  %v3008_v12 = vshll.u32 %v2983_v39, 16  ;;  %v2984_v30 = vmul.bf16 %v2975_v41, %v6032_v63  ;;  %3932 = vrot.lane.b32.xlu1 %v3913_v36, %s5809_s20  ;;  %v3252_v8 = vld [vmem:[#allocation4 + $0x38] sm:$0xf] }
 0x32d   :  { %v3007_v27 = vrot.slane %v3005_v1, 7  ;;  %v3259_v50 = vmul.bf16 %v3250_v37, %v6013_v38  ;;  %v3260_v31 = vmul.bf16 %v3251_v43, %v6032_v63  ;;  %3934 = vrot.lane.b32.xlu0 %v3914_v17, %s5809_s20  ;;  %v2985_v39 = vmul.bf16 %v2976_v11, %v6056_v24  ;;  %v2977_v37 = vld [vmem:[#allocation4 + $0x1c] sm:$0xf] }
 0x32e   :  { %v2372_v54 = vsel %vm6039_vm11, %v2364_v61, %v2371_v28  ;;  %v3001_v34 = vor.u32 %v2999_v0, %v2998_v52  ;;  %v3003_v33 = vrot.slane %v2998_v52, 4  ;;  %v3014_v35 = vshrl.u32 %v2984_v30, 16 }
 0x32f   :  { %2388 = vst.msk [vmem:[#allocation3 + $0x8c] sm:$0xf] %vm2200_vm3, %v2372_v54  ;;  %v3010_v25 = vor.u32 %v3008_v12, %v3007_v27  ;;  %v3012_v13 = vrot.slane %v3007_v27, 4  ;;  %v3017_v41 = vshll.u32 %v2984_v30, 16  ;;  %v3281_v18 = vshrl.u32 %v3259_v50, 16  ;;  %v8841_v54 = vld [vmem:[#allocation32_spill] sm:$0xff] }
 0x330   :  { %v3002_v26 = vsel %vm6039_vm11, %v5286_v48, %v3001_v34  ;;  %v3284_v29 = vshll.u32 %v3259_v50, 16  ;;  %v3290_v7 = vshrl.u32 %v3260_v31, 16  ;;  %v3016_v43 = vrot.slane %v3014_v35, 7  ;;  %3774 = vrot.lane.b32.xlu1 %v3727_v9, %s5809_s20  ;;  %v3253_v35 = vld [vmem:[#allocation4 + $0x3c] sm:$0xf] }
 0x331   :  { %3074 = vst.msk [vmem:[#allocation3 + $0xc] sm:$0xf] %vm2200_vm3, %v3002_v26  ;;  %v3011_v61 = vsel %vm6039_vm11, %v3003_v33, %v3010_v25  ;;  %v3293_v32 = vshll.u32 %v3260_v31, 16  ;;  %v3023_v62 = vshrl.u32 %v2985_v39, 16  ;;  %3776 = vrot.lane.b32.xlu0 %v3737_v20, %s5809_s20  ;;  %v3283_v0 = vrot.slane %v3281_v18, 7 }
 0x332   :  { %3075 = vst.msk [vmem:[#allocation3 + $0x20] sm:$0xf] %vm2200_vm3, %v3011_v61  ;;  %v8129_v1 = vrot.slane %v3290_v7, 7  ;;  %v3026_v11 = vshll.u32 %v2985_v39, 16  ;;  %v2986_v28 = vmul.bf16 %v2977_v37, %v6147_v49  ;;  %v3019_v48 = vor.u32 %v3017_v41, %v3016_v43  ;;  %v2978_v31 = vld [vmem:[#allocation4 + $0x20] sm:$0xf] }
 0x333   :  { %v3021_v52 = vrot.slane %v3016_v43, 4  ;;  %v3025_v12 = vrot.slane %v3023_v62, 7  ;;  %v3261_v51 = vmul.bf16 %v3252_v8, %v6056_v24  ;;  %v3286_v57 = vor.u32 %v3284_v29, %v3283_v0  ;;  %v2410_v26 = vpop.permute.xlu0 %2409  ;;  %v3916_v18 = vld [vmem:[#allocation4 + $0x4c] sm:$0xf]  ;;  %v8843_v7 = vld [vmem:[#allocation35_spill] sm:$0xff] }
 0x334   :  { %v3288_v20 = vrot.slane %v3283_v0, 4  ;;  %v3295_v17 = vor.u32 %v3293_v32, %v8129_v1  ;;  %v3032_v36 = vshrl.u32 %v2986_v28, 16  ;;  %v3020_v9 = vsel %vm6039_vm11, %v3012_v13, %v3019_v48  ;;  %3936 = vrot.lane.b32.xlu1 %v3915_v3, %s5809_s20  ;;  %v2408_v37 = vpop.permute.xlu1 %2407  ;;  %2432 = vst.msk [vmem:[#allocation3 + $0x28] sm:$0xf] %vm2429_vm14, %v2410_v26 }
 0x335   :  { %v3028_v27 = vor.u32 %v3026_v11, %v3025_v12  ;;  %v3030_v30 = vrot.slane %v3025_v12, 4  ;;  %v3035_v50 = vshll.u32 %v2986_v28, 16  ;;  %3780 = vrot.lane.b32.xlu0 %v3757_v55, %s5809_s20  ;;  %3076 = vst.msk [vmem:[#allocation3 + $0x34] sm:$0xf] %vm2200_vm3, %v3020_v9  ;;  %v8842_v34 = vrot.slane %v8841_v54, 4 }
 0x336   :  { %v3296_v39 = vsel %vm6039_vm11, %v3288_v20, %v3295_v17  ;;  %v8150_v25 = vrot.slane %v3032_v36, 7  ;;  %v3297_v13 = vrot.slane %v8129_v1, 4  ;;  %v3299_v4 = vshrl.u32 %v3261_v51, 16  ;;  %2431 = vst.msk [vmem:[#allocation3 + $0x14] sm:$0xf] %vm2429_vm14, %v2408_v37 }
 0x337   :  { %v3287_v33 = vsel %vm6039_vm11, %v8842_v34, %v3286_v57  ;;  %3352 = vst.msk [vmem:[#allocation3 + $0xc8] sm:$0xf] %vm2200_vm3, %v3296_v39  ;;  %v3029_v6 = vsel %vm6039_vm11, %v3021_v52, %v3028_v27  ;;  %v3302_v55 = vshll.u32 %v3261_v51, 16  ;;  %v2588_v41 = vmul.bf16 %v7402_v58, %v2439_v45  ;;  %v2440_v11 = vld [vmem:[#allocation4 + $0xc] sm:$0xf]  ;;  %v2414_v9 = vpop.permute.xlu0 %2413  ;;  %v8844_v34 = vld [vmem:[#allocation13_spill] sm:$0xff] }
 0x338   :  { %3351 = vst.msk [vmem:[#allocation3 + $0xb4] sm:$0xf] %vm2200_vm3, %v3287_v33  ;;  %3077 = vst.msk [vmem:[#allocation3 + $0x48] sm:$0xf] %vm2200_vm3, %v3029_v6  ;;  %v3037_v29 = vor.u32 %v3035_v50, %v8150_v25  ;;  %v2597_v8 = vshrl.u32 %v8843_v7, 16  ;;  %v2600_v61 = vshll.u32 %v8843_v7, 16  ;;  %v2987_v43 = vmul.bf16 %v2978_v31, %v6165_v60  ;;  %3778 = vrot.lane.b32.xlu1 %v3747_v59, %s5809_s20  ;;  %v2412_v3 = vpop.permute.xlu1 %2411 }
 0x339   :  { %v8165_v32 = vrot.slane %v3299_v4, 7  ;;  %v2606_v62 = vshll.u32 %v2588_v41, 16  ;;  %v3039_v0 = vrot.slane %v8150_v25, 4  ;;  %v3262_v1 = vmul.bf16 %v3253_v35, %v6147_v49  ;;  %3938 = vrot.lane.b32.xlu0 %v3916_v18, %s5809_s20  ;;  %v2441_v51 = vld [vmem:[#allocation4 + $0x10] sm:$0xf] }
 0x33a   :  { %v3038_v28 = vsel %vm6039_vm11, %v3030_v30, %v3037_v29  ;;  %v2599_v48 = vrot.slane %v2597_v8, 4  ;;  %v2602_v52 = vrot.slane %v2600_v61, 5  ;;  %v3041_v12 = vshrl.u32 %v2987_v43, 16  ;;  %v3254_v45 = vld [vmem:[#allocation4 + $0x40] sm:$0xf] }
 0x33b   :  { %3078 = vst.msk [vmem:[#allocation3 + $0x5c] sm:$0xf] %vm2200_vm3, %v3038_v28  ;;  %v3304_v57 = vor.u32 %v3302_v55, %v8165_v32  ;;  %v2608_v20 = vrot.slane %v2606_v62, 5  ;;  %v3044_v17 = vshll.u32 %v2987_v43, 16  ;;  %v3306_v36 = vrot.slane %v8165_v32, 4  ;;  %v2418_v18 = vpop.permute.xlu0 %2417 }
 0x33c   :  { %v2603_v14 = vor.u32 %v2602_v52, %v2599_v48  ;;  %v8181_v53 = vrot.slane %v3041_v12, 7  ;;  %v3308_v59 = vshrl.u32 %v3262_v1, 16  ;;  %v3311_v27 = vshll.u32 %v3262_v1, 16  ;;  %2433 = vst.msk [vmem:[#allocation3 + $0x3c] sm:$0xf] %vm2429_vm14, %v2412_v3  ;;  %3782 = vrot.lane.b32.xlu1 %v8094_v19, %s5809_s20  ;;  %v2416_v26 = vpop.permute.xlu1 %2415 }
 0x33d   :  { %2434 = vst.msk [vmem:[#allocation3 + $0x50] sm:$0xf] %vm2429_vm14, %v2414_v9  ;;  %v3305_v30 = vsel %vm6039_vm11, %v3297_v13, %v3304_v57  ;;  %v2589_v50 = vmul.bf16 %v7409_v5, %v2440_v11  ;;  %v2610_v31 = vshrl.u32 %v2588_v41, 16  ;;  %v2590_v54 = vmul.bf16 %v7431_v40, %v2441_v51  ;;  %5100 = vrot.lane.b32.xlu0 %v8844_v34, %s5809_s20  ;;  %v3917_v33 = vld [vmem:[#allocation4 + $0x50] sm:$0xf] }
 0x33e   :  { %3353 = vst.msk [vmem:[#allocation3 + $0xdc] sm:$0xf] %vm2200_vm3, %v3305_v30  ;;  %v2604_v39 = vrot.slane %v2603_v14, 4  ;;  %v3046_v25 = vor.u32 %v3044_v17, %v8181_v53  ;;  %v8195_v35 = vrot.slane %v3308_v59, 7  ;;  %v3263_v13 = vmul.bf16 %v3254_v45, %v6165_v60  ;;  %v2442_v37 = vld [vmem:[#allocation4 + $0x14] sm:$0xf] }
 0x33f   :  { %v2612_v6 = vrot.slane %v2610_v31, 4  ;;  %v2616_v4 = vshll.u32 %v2589_v50, 16  ;;  %v2620_v55 = vshrl.u32 %v2589_v50, 16  ;;  %v2626_v41 = vshll.u32 %v2590_v54, 16  ;;  %v2443_v61 = vld [vmem:[#allocation4 + $0x18] sm:$0xf]  ;;  %v3099_v9 = vpop.permute.xlu0 %3098 }
 0x340   :  { %v2609_v19 = vsel %vm5977_vm8, %v2604_v39, %v2608_v20  ;;  %v3047_v29 = vsel %vm6039_vm11, %v3039_v0, %v3046_v25  ;;  %v3313_v7 = vor.u32 %v3311_v27, %v8195_v35  ;;  %v3315_v8 = vrot.slane %v8195_v35, 4  ;;  %2435 = vst.msk [vmem:[#allocation3 + $0x64] sm:$0xf] %vm2429_vm14, %v2416_v26  ;;  %2436 = vst.msk [vmem:[#allocation3 + $0x78] sm:$0xf] %vm2429_vm14, %v2418_v18  ;;  %v8845_v0 = vld [vmem:[#allocation15_spill] sm:$0xff]  ;;  %v2420_v3 = vpop.permute.xlu1 %2419 }
 0x341   :  { %2688 = vst.msk [vmem:[#allocation3 + $0x4] sm:$0xf] %vm2200_vm3, %v2609_v19  ;;  %3079 = vst.msk [vmem:[#allocation3 + $0x70] sm:$0xf] %vm2200_vm3, %v3047_v29  ;;  %v2613_v43 = vor.u32 %v2612_v6, %v2608_v20  ;;  %v2618_v32 = vrot.slane %v2616_v4, 5  ;;  %v2622_v62 = vrot.slane %v2620_v55, 4  ;;  %5104 = vrot.lane.b32.xlu0 %v8845_v0, %s5809_s20  ;;  %3940 = vrot.lane.b32.xlu1 %v3917_v33, %s5809_s20 }
 0x342   :  { %v2628_v1 = vrot.slane %v2626_v41, 5  ;;  %v2444_v11 = vld [vmem:[#allocation4 + $0x1c] sm:$0xf]  ;;  %v3314_v28 = vsel %vm6039_vm11, %v3306_v36, %v3313_v7  ;;  %v3317_v48 = vshrl.u32 %v3263_v13, 16  ;;  %v3320_v52 = vshll.u32 %v3263_v13, 16  ;;  %v8847_v33 = vld [vmem:[#allocation14_spill] sm:$0xff] }
 0x343   :  { %v2591_v12 = vmul.bf16 %v7437_v15, %v2442_v37  ;;  %3354 = vst.msk [vmem:[#allocation3 + $0xf0] sm:$0xf] %vm2200_vm3, %v3314_v28  ;;  %v2614_v51 = vrot.slane %v2613_v43, 4  ;;  %v2623_v57 = vor.u32 %v2622_v62, %v2618_v32  ;;  %v2592_v20 = vmul.bf16 %v7441_v56, %v2443_v61  ;;  %v2445_v45 = vld [vmem:[#allocation4 + $0x20] sm:$0xf]  ;;  %v3103_v19 = vpop.permute.xlu0 %3102  ;;  %v8848_v28 = vld [vmem:[#allocation19_spill] sm:$0xff] }
 0x344   :  { %v2630_v17 = vshrl.u32 %v2590_v54, 16  ;;  %v8216_v14 = vrot.slane %v3317_v48, 7  ;;  %v2593_v36 = vmul.bf16 %v7448_v42, %v2444_v11  ;;  %2437 = vst.msk [vmem:[#allocation3 + $0x8c] sm:$0xf] %vm2429_vm14, %v2420_v3  ;;  %3122 = vst.msk [vmem:[#allocation3 + $0xc] sm:$0xf] %vm2429_vm14, %v3099_v9  ;;  %v2594_v13 = vmul.bf16 %v8833_v16, %v2445_v45  ;;  %v3101_v18 = vpop.permute.xlu1 %3100 }
 0x345   :  { %v2636_v59 = vshll.u32 %v2591_v12, 16  ;;  %v2640_v27 = vshrl.u32 %v2591_v12, 16  ;;  %v2619_v30 = vsel %vm5977_vm8, %v2614_v51, %v2618_v32  ;;  %v2624_v50 = vrot.slane %v2623_v57, 4  ;;  %v8846_v54 = vld [vmem:[#allocation17_spill] sm:$0xff]  ;;  %5102 = vrot.lane.b32.xlu1 %v8847_v33, %s5809_s20  ;;  %v3406_v6 = vld [vmem:[#allocation4 + $0x2c] sm:$0xf] }
 0x346   :  { %v2646_v31 = vshll.u32 %v2592_v20, 16  ;;  %v2632_v34 = vrot.slane %v2630_v17, 4  ;;  %5108 = vrot.lane.b32.xlu0 %v8846_v54, %s5809_s20  ;;  %2689 = vst.msk [vmem:[#allocation3 + $0x18] sm:$0xf] %vm2200_vm3, %v2619_v30  ;;  %v3322_v39 = vor.u32 %v3320_v52, %v8216_v14  ;;  %v2656_v37 = vshll.u32 %v2593_v36, 16  ;;  %v8850_v30 = vld [vmem:[#allocation12_spill] sm:$0xff] }
 0x347   :  { %v2638_v25 = vrot.slane %v2636_v59, 5  ;;  %v2642_v35 = vrot.slane %v2640_v27, 4  ;;  %v2629_v4 = vsel %vm5977_vm8, %v2624_v50, %v2628_v1  ;;  %v3407_v26 = vld [vmem:[#allocation4 + $0x30] sm:$0xf]  ;;  %v2660_v61 = vshrl.u32 %v2593_v36, 16  ;;  %v3379_v9 = vpop.permute.xlu0 %3378 }
 0x348   :  { %v2648_v55 = vrot.slane %v2646_v31, 5  ;;  %v2633_v41 = vor.u32 %v2632_v34, %v2628_v1  ;;  %2690 = vst.msk [vmem:[#allocation3 + $0x2c] sm:$0xf] %vm2200_vm3, %v2629_v4  ;;  %v3323_v29 = vsel %vm6039_vm11, %v3315_v8, %v3322_v39  ;;  %v2666_v43 = vshll.u32 %v2594_v13, 16  ;;  %v2446_v0 = vld [vmem:[#allocation4 + $0x24] sm:$0x1] }
 0x349   :  { %v2643_v7 = vor.u32 %v2642_v35, %v2638_v25  ;;  %3123 = vst.msk [vmem:[#allocation3 + $0x20] sm:$0xf] %vm2429_vm14, %v3101_v18  ;;  %3124 = vst.msk [vmem:[#allocation3 + $0x34] sm:$0xf] %vm2429_vm14, %v3103_v19  ;;  %v2658_v62 = vrot.slane %v2656_v37, 5  ;;  %v2650_v1 = vshrl.u32 %v2592_v20, 16  ;;  %v3415_v11 = vmul.bf16 %v3406_v6, %v7227_v47  ;;  %v3377_v47 = vpop.permute.xlu1 %3376 }
 0x34a   :  { %3355 = vst.msk [vmem:[#allocation3 + $0x104] sm:$0xf] %vm2200_vm3, %v3323_v29  ;;  %v2634_v32 = vrot.slane %v2633_v41, 4  ;;  %5112 = vrot.lane.b32.xlu0 %v8848_v28, %s5809_s20  ;;  %v8849_v8 = vld [vmem:[#allocation16_spill] sm:$0xff]  ;;  %v2662_v52 = vrot.slane %v2660_v61, 4  ;;  %v2668_v12 = vrot.slane %v2666_v43, 5  ;;  %v3416_v51 = vmul.bf16 %v3407_v26, %v7402_v58 }
 0x34b   :  { %5106 = vrot.lane.b32.xlu1 %v8849_v8, %s5809_s20  ;;  %v2644_v48 = vrot.slane %v2643_v7, 4  ;;  %v2652_v17 = vrot.slane %v2650_v1, 4  ;;  %v3425_v45 = vshrl.u32 %v3415_v11, 16  ;;  %v3428_v20 = vshll.u32 %v3415_v11, 16  ;;  %v3408_v3 = vld [vmem:[#allocation4 + $0x34] sm:$0xf] }
 0x34c   :  { %v2639_v57 = vsel %vm5977_vm8, %v2634_v32, %v2638_v25  ;;  %v2663_v27 = vor.u32 %v2662_v52, %v2658_v62  ;;  %v3434_v36 = vshll.u32 %v3416_v51, 16  ;;  %v2595_v50 = vmul.bf16 %v8850_v30, %v2446_v0  ;;  %v3409_v31 = vld [vmem:[#allocation4 + $0x38] sm:$0xf]  ;;  %3399 = vst.msk [vmem:[#allocation3 + $0xb4] sm:$0xf] %vm2429_vm14, %v3377_v47  ;;  %v8851_v39 = vld [vmem:[#allocation21_spill] sm:$0xff] }
 0x34d   :  { %v2649_v59 = vsel %vm5977_vm8, %v2644_v48, %v2648_v55  ;;  %2691 = vst.msk [vmem:[#allocation3 + $0x40] sm:$0xf] %vm2200_vm3, %v2639_v57  ;;  %v2653_v58 = vor.u32 %v2652_v17, %v2648_v55  ;;  %v3427_v34 = vrot.slane %v3425_v45, 4  ;;  %v3430_v54 = vrot.slane %v3428_v20, 5  ;;  %v8852_v25 = vld [vmem:[#allocation18_spill] sm:$0xff]  ;;  %v3105_v29 = vpop.permute.xlu1 %3104  ;;  %v8853_v28 = vld [vmem:[#allocation23_spill] sm:$0xff] }
 0x34e   :  { %3400 = vst.msk [vmem:[#allocation3 + $0xc8] sm:$0xf] %vm2429_vm14, %v3379_v9  ;;  %v2670_v33 = vshrl.u32 %v2594_v13, 16  ;;  %5116 = vrot.lane.b32.xlu0 %v8851_v39, %s5809_s20  ;;  %v2664_v35 = vrot.slane %v2663_v27, 4  ;;  %v8257_v6 = vrot.slane %v3434_v36, 5  ;;  %v2676_v4 = vshll.u32 %v2595_v50, 16  ;;  %v3107_v13 = vpop.permute.xlu0 %3106 }
 0x34f   :  { %2692 = vst.msk [vmem:[#allocation3 + $0x54] sm:$0xf] %vm2200_vm3, %v2649_v59  ;;  %5110 = vrot.lane.b32.xlu1 %v8852_v25, %s5809_s20  ;;  %v3417_v41 = vmul.bf16 %v3408_v3, %v7409_v5  ;;  %v2654_v37 = vrot.slane %v2653_v58, 4  ;;  %v3431_v26 = vor.u32 %v3430_v54, %v3427_v34  ;;  %v3418_v55 = vmul.bf16 %v3409_v31, %v7431_v40  ;;  %v3410_v19 = vld [vmem:[#allocation4 + $0x3c] sm:$0xf]  ;;  %v8855_v34 = vld [vmem:[#allocation25_spill] sm:$0xff] }
 0x350   :  { %v2672_v18 = vrot.slane %v2670_v33, 4  ;;  %v2669_v7 = vsel %vm5977_vm8, %v2664_v35, %v2668_v12  ;;  %v2678_v61 = vrot.slane %v2676_v4, 5  ;;  %v3411_v1 = vld [vmem:[#allocation4 + $0x40] sm:$0xf]  ;;  %3125 = vst.msk [vmem:[#allocation3 + $0x48] sm:$0xf] %vm2429_vm14, %v3105_v29  ;;  %v3419_v17 = vmul.bf16 %v3410_v19, %v7437_v15 }
 0x351   :  { %v3444_v43 = vshll.u32 %v3417_v41, 16  ;;  %v3448_v32 = vshrl.u32 %v3417_v41, 16  ;;  %3126 = vst.msk [vmem:[#allocation3 + $0x5c] sm:$0xf] %vm2429_vm14, %v3107_v13  ;;  %v2659_v5 = vsel %vm5977_vm8, %v2654_v37, %v2658_v62  ;;  %v3432_v40 = vrot.slane %v3431_v26, 4  ;;  %v8854_v8 = vld [vmem:[#allocation20_spill] sm:$0xff]  ;;  %v3381_v47 = vpop.permute.xlu1 %3380 }
 0x352   :  { %2694 = vst.msk [vmem:[#allocation3 + $0x7c] sm:$0xf] %vm2200_vm3, %v2669_v7  ;;  %v2673_v11 = vor.u32 %v2672_v18, %v2668_v12  ;;  %v3454_v0 = vshll.u32 %v3418_v55, 16  ;;  %5120 = vrot.lane.b32.xlu0 %v8853_v28, %s5809_s20  ;;  %2693 = vst.msk [vmem:[#allocation3 + $0x68] sm:$0xf] %vm2200_vm3, %v2659_v5  ;;  %v3438_v57 = vshrl.u32 %v3416_v51, 16  ;;  %v3420_v3 = vmul.bf16 %v3411_v1, %v7441_v56  ;;  %v2791_v9 = vpop.permute.xlu0 %2790 }
 0x353   :  { %5114 = vrot.lane.b32.xlu1 %v8854_v8, %s5809_s20  ;;  %v3446_v48 = vrot.slane %v3444_v43, 5  ;;  %v3450_v52 = vrot.slane %v3448_v32, 4  ;;  %v3412_v45 = vld [vmem:[#allocation4 + $0x44] sm:$0xf]  ;;  %v3437_v62 = vsel %vm5977_vm8, %v3432_v40, %v8257_v6  ;;  %v3464_v36 = vshll.u32 %v3419_v17, 16  ;;  %v8856_v54 = vld [vmem:[#allocation22_spill] sm:$0xff] }
 0x354   :  { %v2674_v12 = vrot.slane %v2673_v11, 4  ;;  %v3456_v20 = vrot.slane %v3454_v0, 5  ;;  %3516 = vst.msk [vmem:[#allocation3 + $0xa4] sm:$0xf] %vm2200_vm3, %v3437_v62  ;;  %v3440_v27 = vrot.slane %v3438_v57, 4  ;;  %v3468_v50 = vshrl.u32 %v3419_v17, 16 }
 0x355   :  { %v3451_v59 = vor.u32 %v3450_v52, %v3446_v48  ;;  %3401 = vst.msk [vmem:[#allocation3 + $0xdc] sm:$0xf] %vm2429_vm14, %v3381_v47  ;;  %2814 = vst.msk [vmem:[#allocation3 + $0x4] sm:$0xf] %vm2429_vm14, %v2791_v9  ;;  %v3474_v51 = vshll.u32 %v3420_v3, 16  ;;  %v3458_v31 = vshrl.u32 %v3418_v55, 16  ;;  %v8284_v58 = vmul.bf16 %v3412_v45, %v7448_v42  ;;  %v3109_v26 = vpop.permute.xlu1 %3108 }
 0x356   :  { %v2679_v15 = vsel %vm5977_vm8, %v2674_v12, %v2678_v61  ;;  %v2979_v56 = vld [vmem:[#allocation4 + $0x24] sm:$0xf]  ;;  %5124 = vrot.lane.b32.xlu0 %v8855_v34, %s5809_s20  ;;  %v3441_v39 = vor.u32 %v3440_v27, %v8257_v6  ;;  %v3466_v25 = vrot.slane %v3464_v36, 5  ;;  %v3470_v35 = vrot.slane %v3468_v50, 4  ;;  %v3383_v18 = vpop.permute.xlu0 %3382  ;;  %v2980_v7 = vld [vmem:[#allocation4 + $0x28] sm:$0xf] }
 0x357   :  { %5118 = vrot.lane.b32.xlu1 %v8856_v54, %s5809_s20  ;;  %2695 = vst.msk [vmem:[#allocation3 + $0x90] sm:$0xf] %vm2200_vm3, %v2679_v15  ;;  %v3452_v33 = vrot.slane %v3451_v59, 4  ;;  %v3476_v4 = vrot.slane %v3474_v51, 5  ;;  %v3460_v41 = vrot.slane %v3458_v31, 4  ;;  %v3478_v37 = vshrl.u32 %v3420_v3, 16 }
 0x358   :  { %v3484_v42 = vshll.u32 %v8284_v58, 16  ;;  %v3442_v19 = vrot.slane %v3441_v39, 4  ;;  %v3471_v29 = vor.u32 %v3470_v35, %v3466_v25  ;;  %v2988_v13 = vmul.bf16 %v2979_v56, %v6228_v23  ;;  %v3255_v61 = vld [vmem:[#allocation4 + $0x44] sm:$0xf]  ;;  %3127 = vst.msk [vmem:[#allocation3 + $0x70] sm:$0xf] %vm2429_vm14, %v3109_v26 }
 0x359   :  { %v3457_v55 = vsel %vm5977_vm8, %v3452_v33, %v3456_v20  ;;  %3402 = vst.msk [vmem:[#allocation3 + $0xf0] sm:$0xf] %vm2429_vm14, %v3383_v18  ;;  %v3461_v6 = vor.u32 %v3460_v41, %v3456_v20  ;;  %v3480_v43 = vrot.slane %v3478_v37, 4  ;;  %v3048_v1 = vrot.slane %v8181_v53, 4  ;;  %v3256_v5 = vld [vmem:[#allocation4 + $0x48] sm:$0xf]  ;;  %v2793_v62 = vpop.permute.xlu1 %2792 }
 0x35a   :  { %3518 = vst.msk [vmem:[#allocation3 + $0xcc] sm:$0xf] %vm2200_vm3, %v3457_v55  ;;  %v8299_v32 = vrot.slane %v3484_v42, 5  ;;  %v8857_v40 = vld [vmem:[#allocation27_spill] sm:$0xff]  ;;  %v8858_v11 = vld [vmem:[#allocation24_spill] sm:$0xff]  ;;  %v3447_v0 = vsel %vm5977_vm8, %v3442_v19, %v3446_v48  ;;  %v3472_v28 = vrot.slane %v3471_v29, 4  ;;  %v2989_v45 = vmul.bf16 %v2980_v7, %v6221_v21  ;;  %v2795_v12 = vpop.permute.xlu0 %2794 }
 0x35b   :  { %5128 = vrot.lane.b32.xlu0 %v8857_v40, %s5809_s20  ;;  %5122 = vrot.lane.b32.xlu1 %v8858_v11, %s5809_s20  ;;  %v3050_v8 = vshrl.u32 %v2988_v13, 16  ;;  %v3053_v52 = vshll.u32 %v2988_v13, 16  ;;  %3517 = vst.msk [vmem:[#allocation3 + $0xb8] sm:$0xf] %vm2200_vm3, %v3447_v0  ;;  %v3462_v57 = vrot.slane %v3461_v6, 4  ;;  %v3481_v17 = vor.u32 %v3480_v43, %v3476_v4  ;;  %v8859_v51 = vld [vmem:[#allocation26_spill] sm:$0xff] }
 0x35c   :  { %v3264_v53 = vmul.bf16 %v3255_v61, %v6228_v23  ;;  %v3477_v20 = vsel %vm5977_vm8, %v3472_v28, %v3476_v4  ;;  %v3324_v47 = vrot.slane %v8216_v14, 4  ;;  %v3265_v48 = vmul.bf16 %v3256_v5, %v6221_v21  ;;  %v3413_v9 = vld [vmem:[#allocation4 + $0x48] sm:$0xf]  ;;  %2815 = vst.msk [vmem:[#allocation3 + $0x18] sm:$0xf] %vm2429_vm14, %v2793_v62  ;;  %v8860_v61 = vld [vmem:[#allocation28_spill] sm:$0xff] }
 0x35d   :  { %v3052_v3 = vrot.slane %v3050_v8, 7  ;;  %2816 = vst.msk [vmem:[#allocation3 + $0x2c] sm:$0xf] %vm2429_vm14, %v2795_v12  ;;  %v3467_v59 = vsel %vm5977_vm8, %v3462_v57, %v3466_v25  ;;  %v3482_v27 = vrot.slane %v3481_v17, 4  ;;  %v3059_v36 = vshrl.u32 %v2989_v45, 16  ;;  %v3385_v4 = vpop.permute.xlu1 %3384 }
 0x35e   :  { %3520 = vst.msk [vmem:[#allocation3 + $0xf4] sm:$0xf] %vm2200_vm3, %v3477_v20  ;;  %v3062_v50 = vshll.u32 %v2989_v45, 16  ;;  %v3414_v15 = vld [vmem:[#allocation4 + $0x4c] sm:$0x1]  ;;  %v3326_v56 = vshrl.u32 %v3264_v53, 16  ;;  %v2799_v41 = vpop.permute.xlu0 %2798  ;;  %v3422_v26 = vmul.bf16 %v3413_v9, %v8833_v16 }
 0x35f   :  { %5126 = vrot.lane.b32.xlu1 %v8859_v51, %s5809_s20  ;;  %3519 = vst.msk [vmem:[#allocation3 + $0xe0] sm:$0xf] %vm2200_vm3, %v3467_v59  ;;  %v3055_v14 = vor.u32 %v3053_v52, %v3052_v3  ;;  %v3057_v31 = vrot.slane %v3052_v3, 4  ;;  %v3329_v34 = vshll.u32 %v3264_v53, 16  ;;  %v3800_v54 = vld [vmem:[#allocation4 + $0x30] sm:$0x8]  ;;  %v3487_v33 = vsel %vm5977_vm8, %v3482_v27, %v8299_v32 }
 0x360   :  { %v3061_v39 = vrot.slane %v3059_v36, 7  ;;  %v3335_v25 = vshrl.u32 %v3265_v48, 16  ;;  %v3338_v35 = vshll.u32 %v3265_v48, 16  ;;  %3521 = vst.msk [vmem:[#allocation3 + $0x108] sm:$0xf] %vm2200_vm3, %v3487_v33  ;;  %v3328_v42 = vrot.slane %v3326_v56, 7 }
 0x361   :  { %v3056_v37 = vsel %vm6039_vm11, %v3048_v1, %v3055_v14  ;;  %v3488_v18 = vshrl.u32 %v8284_v58, 16  ;;  %3403 = vst.msk [vmem:[#allocation3 + $0x104] sm:$0xf] %vm2429_vm14, %v3385_v4  ;;  %2818 = vst.msk [vmem:[#allocation3 + $0x54] sm:$0xf] %vm2429_vm14, %v2799_v41  ;;  %v3423_v29 = vmul.bf16 %v3414_v15, %v8850_v30  ;;  %v3809_v7 = vmul.bf16 %v3800_v54, %v8837_v46  ;;  %v2797_v52 = vpop.permute.xlu1 %2796  ;;  %v5739_v20 = vld [vmem:[%s8739_s3 + $0x110] sm:$0xff]  }
 0x362   :  { %3080 = vst.msk [vmem:[#allocation3 + $0x84] sm:$0xf] %vm2200_vm3, %v3056_v37  ;;  %v3064_v55 = vor.u32 %v3062_v50, %v3061_v39  ;;  %v3337_v19 = vrot.slane %v3335_v25, 7  ;;  %v3801_v13 = vld [vmem:[#allocation4 + $0x34] sm:$0xf]  ;;  %v3331_v6 = vor.u32 %v3329_v34, %v3328_v42  ;;  %v3333_v16 = vrot.slane %v3328_v42, 4  ;;  %v2803_v57 = vpop.permute.xlu0 %2802 }
 0x363   :  { %5130 = vrot.lane.b32.xlu1 %v8860_v61, %s5809_s20  ;;  %v3490_v43 = vrot.slane %v3488_v18, 4  ;;  %v3494_v58 = vshll.u32 %v3422_v26, 16  ;;  %v3802_v1 = vld [vmem:[#allocation4 + $0x38] sm:$0xf]  ;;  %v3498_v11 = vshrl.u32 %v3422_v26, 16  ;;  %v3504_v0 = vshll.u32 %v3423_v29, 16 }
 0x364   :  { %v3065_v5 = vsel %vm6039_vm11, %v3057_v31, %v3064_v55  ;;  %v3340_v40 = vor.u32 %v3338_v35, %v3337_v19  ;;  %v3803_v28 = vld [vmem:[#allocation4 + $0x3c] sm:$0xf]  ;;  %v3804_v8 = vld [vmem:[#allocation4 + $0x40] sm:$0xf]  ;;  %v5728_v46 = vld [vmem:[#allocation3 + $0x4] ss:$20 sps:$4 sm:$0xff]   ;;  %v3332_v45 = vsel %vm6039_vm11, %v3324_v47, %v3331_v6  ;;  %v3810_v12 = vmul.bf16 %v3801_v13, %v8838_v44 }
 0x365   :  { %v5726_v17 = vld [vmem:[#allocation3] ss:$20 sps:$4 sm:$0xff]   ;;  %3081 = vst.msk [vmem:[#allocation3 + $0x98] sm:$0xf] %vm2200_vm3, %v3065_v5  ;;  %v3491_v53 = vor.u32 %v3490_v43, %v8299_v32  ;;  %v3496_v62 = vrot.slane %v3494_v58, 5  ;;  %v3500_v48 = vrot.slane %v3498_v11, 4  ;;  %4674 = vmatprep.mubr.bf16.mxu1 %v5728_v46  ;;  %v3811_v27 = vmul.bf16 %v3802_v1, %v6013_v38  ;;  %v2801_v14 = vpop.permute.xlu1 %2800 }
 0x366   :  { %2817 = vst.msk [vmem:[#allocation3 + $0x40] sm:$0xf] %vm2429_vm14, %v2797_v52  ;;  %2820 = vst.msk [vmem:[#allocation3 + $0x7c] sm:$0xf] %vm2429_vm14, %v2803_v57  ;;  %v3341_v3 = vsel %vm6039_vm11, %v3333_v16, %v3340_v40  ;;  %v3506_v47 = vrot.slane %v3504_v0, 5  ;;  %v3819_v9 = vshrl.u32 %v3809_v7, 16  ;;  %4675 = vmatmul.mubr.bf16.vlgmr.msra.gmra.mxu1 %v5726_v17  ;;  %v3812_v15 = vmul.bf16 %v3803_v28, %v6032_v63  ;;  %v3619_v56 = vpop.permute.xlu0 %3618 }
 0x367   :  { %3356 = vst.msk [vmem:[#allocation3 + $0x118] sm:$0xf] %vm2200_vm3, %v3332_v45  ;;  %3357 = vst.msk [vmem:[#allocation3 + $0x12c] sm:$0xf] %vm2200_vm3, %v3341_v3  ;;  %v3492_v44 = vrot.slane %v3491_v53, 4  ;;  %v3824_v32 = vshrl.u32 %v3810_v12, 16  ;;  %v3501_v36 = vor.u32 %v3500_v48, %v3496_v62  ;;  %v3813_v51 = vmul.bf16 %v3804_v8, %v6056_v24 }
 0x368   :  { %v3827_v59 = vshll.u32 %v3810_v12, 16  ;;  %v5289_v50 = vrot.slane %v3819_v9, 11  ;;  %v5786_v31 = vld [vmem:[%s8739_s3 + $0x118] sm:$0xff]   ;;  %v3833_v33 = vshrl.u32 %v3811_v27, 16  ;;  %v3836_v38 = vshll.u32 %v3811_v27, 16  ;;  %v5750_v63 = vld [vmem:[%s8739_s3 + $0x108] sm:$0xff]  }
 0x369   :  { %5625 = vmatpush3.bf16.msra.mxu1 %v5786_v31  ;;  %v3497_v34 = vsel %vm5977_vm8, %v3492_v44, %v3496_v62  ;;  %v3826_v54 = vrot.slane %v3824_v32, 7  ;;  %v3805_v39 = vld [vmem:[#allocation4 + $0x44] sm:$0xf]  ;;  %2819 = vst.msk [vmem:[#allocation3 + $0x68] sm:$0xf] %vm2429_vm14, %v2801_v14  ;;  %v3502_v24 = vrot.slane %v3501_v36, 4  ;;  %v2805_v43 = vpop.permute.xlu1 %2804 }
 0x36a   :  { %3642 = vst.msk [vmem:[#allocation3 + $0xa4] sm:$0xf] %vm2429_vm14, %v3619_v56  ;;  %5626 = vmatprep.subr.bf16.mxu1 %v5739_v20  ;;  %v3842_v25 = vshrl.u32 %v3812_v15, 16  ;;  %v3845_v35 = vshll.u32 %v3812_v15, 16  ;;  %v3851_v4 = vshrl.u32 %v3813_v51, 16  ;;  %v3835_v42 = vrot.slane %v3833_v33, 7  ;;  %v3623_v58 = vpop.permute.xlu0 %3622 }
 0x36b   :  { %3522 = vst.msk [vmem:[#allocation3 + $0x11c] sm:$0xf] %vm2200_vm3, %v3497_v34  ;;  %v3829_v41 = vor.u32 %v3827_v59, %v3826_v54  ;;  %v3831_v37 = vrot.slane %v3826_v54, 4  ;;  %v3854_v26 = vshll.u32 %v3813_v51, 16  ;;  %v3507_v18 = vsel %vm5977_vm8, %v3502_v24, %v3506_v47  ;;  %v3806_v13 = vld [vmem:[#allocation4 + $0x48] sm:$0xf] }
 0x36c   :  { %v3844_v55 = vrot.slane %v3842_v25, 7  ;;  %v8370_v19 = vrot.slane %v3851_v4, 7  ;;  %v3814_v29 = vmul.bf16 %v3805_v39, %v6147_v49  ;;  %v3807_v7 = vld [vmem:[#allocation4 + $0x4c] sm:$0xf]  ;;  %3523 = vst.msk [vmem:[#allocation3 + $0x130] sm:$0xf] %vm2200_vm3, %v3507_v18  ;;  %v3838_v0 = vor.u32 %v3836_v38, %v3835_v42 }
 0x36d   :  { %v8861_v61 = vld [vmem:[#allocation30_spill] sm:$0xff]  ;;  %v4086_v5 = vld [vmem:[#allocation3 + $0x3c] sm:$0xff]  ;;  %5627 = vmatpush3.bf16.msra.mxu1 %v5739_v20  ;;  %v3830_v11 = vsel %vm6039_vm11, %v5289_v50, %v3829_v41  ;;  %v3840_v28 = vrot.slane %v3835_v42, 4  ;;  %2821 = vst.msk [vmem:[#allocation3 + $0x90] sm:$0xf] %vm2429_vm14, %v2805_v43  ;;  %v8863_v45 = vld [vmem:[#allocation31_spill] sm:$0xff]  ;;  %v3815_v9 = vmul.bf16 %v3806_v13, %v6165_v60  ;;  %v3621_v44 = vpop.permute.xlu1 %3620 }
 0x36e   :  { %v8862_v6 = vmul.bf16 %v8861_v61, %v8850_v30  ;;  %v4083_v1 = vld [vmem:[#allocation3 + $0x28] sm:$0xff]  ;;  %3644 = vst.msk [vmem:[#allocation3 + $0xcc] sm:$0xf] %vm2429_vm14, %v3623_v58  ;;  %5628 = vmatprep.subr.bf16.mxu1 %v5750_v63  ;;  %v5759_v8 = vld [vmem:[%s8739_s3 + $0x100] sm:$0xff]   ;;  %v3847_v52 = vor.u32 %v3845_v35, %v3844_v55  ;;  %v3849_v57 = vrot.slane %v3844_v55, 4  ;;  %v3856_v17 = vor.u32 %v3854_v26, %v8370_v19  ;;  %v3627_v32 = vpop.permute.xlu0 %3626  ;;  %v4089_v25 = vld [vmem:[#allocation3 + $0x50] sm:$0xff] }
 0x36f   :  { %v5732_v40 = vld [vmem:[#allocation3 + $0x2c] ss:$20 sps:$4 sm:$0xff]   ;;  %v5295_v49 = vcombine.low %v4083_v1, %v4086_v5  ;;  %3902 = vst.msk [vmem:[#allocation3 + $0xac] sm:$0xf] %vm2200_vm3, %v3830_v11  ;;  %v3808_v46 = vld [vmem:[#allocation4 + $0x50] sm:$0xf]  ;;  %v8864_v53 = vmul.bf16 %v8863_v45, %v8850_v30  ;;  %v3839_v12 = vsel %vm6039_vm11, %v3831_v37, %v3838_v0  ;;  %v3816_v30 = vmul.bf16 %v3807_v7, %v6228_v23 }
 0x370   :  { %v3228_v16 = vshll.u32 %v8862_v6, 16  ;;  %4682 = vmatprep.mubr.bf16.mxu1 %v5732_v40  ;;  %v3858_v20 = vrot.slane %v8370_v19, 4  ;;  %v3860_v3 = vshrl.u32 %v3814_v29, 16  ;;  %3903 = vst.msk [vmem:[#allocation3 + $0xc0] sm:$0xf] %vm2200_vm3, %v3839_v12  ;;  %v3848_v48 = vsel %vm6039_vm11, %v3840_v28, %v3847_v52  ;;  %v8865_v51 = vld [vmem:[#allocation29_spill] sm:$0xff] }
 0x371   :  { %v4056_v62 = vshll.u32 %v8864_v53, 16  ;;  %4683 = vmatmul.mubr.bf16.gmra.mxu1 %v5295_v49  ;;  %v3857_v47 = vsel %vm6039_vm11, %v3849_v57, %v3856_v17  ;;  %v5736_v59 = vld [vmem:[#allocation3 + $0x54] ss:$20 sps:$4 sm:$0xff]   ;;  %3904 = vst.msk [vmem:[#allocation3 + $0xd4] sm:$0xf] %vm2200_vm3, %v3848_v48  ;;  %v3863_v36 = vshll.u32 %v3814_v29, 16  ;;  %v3817_v15 = vmul.bf16 %v3808_v46, %v6221_v21  ;;  %v3625_v35 = vpop.permute.xlu1 %3624 }
 0x372   :  { %5629 = vmatpush3.bf16.msra.mxu1 %v5750_v63  ;;  %3905 = vst.msk [vmem:[#allocation3 + $0xe8] sm:$0xf] %vm2200_vm3, %v3857_v47  ;;  %v3862_v27 = vrot.slane %v3860_v3, 7  ;;  %v3230_v50 = vrot.slane %v3228_v16, 5  ;;  %v8866_v14 = vor.u32 %v8865_v51, %v7393_v22  ;;  %v3869_v60 = vshrl.u32 %v3815_v9, 16  ;;  %v4092_v56 = vld [vmem:[#allocation3 + $0x64] sm:$0xff]  ;;  %4690 = vmatprep.mubr.bf16.mxu1 %v5736_v59  ;;  %v2941_v4 = vpop.permute.xlu0 %2940 }
 0x373   :  { %3643 = vst.msk [vmem:[#allocation3 + $0xb8] sm:$0xf] %vm2429_vm14, %v3621_v44  ;;  %3646 = vst.msk [vmem:[#allocation3 + $0xf4] sm:$0xf] %vm2429_vm14, %v3627_v32  ;;  %5630 = vmatprep.subr.bf16.mxu1 %v5759_v8  ;;  %v3878_v23 = vshrl.u32 %v3816_v30, 16  ;;  %v3872_v33 = vshll.u32 %v3815_v9, 16  ;;  %v5300_v26 = vcombine.low %v4089_v25, %v4092_v56 }
 0x374   :  { %v4054_v31 = vrot.slane %v8866_v14, 4  ;;  %v3865_v34 = vor.u32 %v3863_v36, %v3862_v27  ;;  %v3867_v54 = vrot.slane %v3862_v27, 4  ;;  %v8867_v38 = vld [vmem:[#allocation34_spill] sm:$0xff]  ;;  %v3871_v39 = vrot.slane %v3869_v60, 7  ;;  %3645 = vst.msk [vmem:[#allocation3 + $0xe0] sm:$0xf] %vm2429_vm14, %v3625_v35 }
 0x375   :  { %v3231_v21 = vsel %vm5977_vm8, %v8867_v38, %v3230_v50  ;;  %v3880_v63 = vrot.slane %v3878_v23, 7  ;;  %v3881_v22 = vshll.u32 %v3816_v30, 16  ;;  %v3887_v24 = vshrl.u32 %v3817_v15, 16  ;;  %2964 = vst.msk [vmem:[#allocation3 + $0x8] sm:$0xf] %vm2429_vm14, %v2941_v4  ;;  %v3629_v43 = vpop.permute.xlu1 %3628  ;;  %v4098_v10 = vld [vmem:[#allocation3 + $0x8c] sm:$0xff] }
 0x376   :  { %3247 = vst.msk [vmem:[#allocation3 + $0x9c] sm:$0xf] %vm2200_vm3, %v3231_v21  ;;  %5631 = vmatpush3.bf16.msra.mxu1 %v5759_v8  ;;  %v3866_v41 = vsel %vm6039_vm11, %v3858_v20, %v3865_v34  ;;  %v3890_v37 = vshll.u32 %v3817_v15, 16  ;;  %v4058_v42 = vrot.slane %v4056_v62, 5  ;;  %v3874_v18 = vor.u32 %v3872_v33, %v3871_v39  ;;  %v5741_v29 = vld [vmem:[#allocation3 + $0x7c] ss:$20 sps:$4 sm:$0xff]   ;;  %v3111_v58 = vpop.permute.xlu0 %3110 }
 0x377   :  { %3906 = vst.msk [vmem:[#allocation3 + $0xfc] sm:$0xf] %vm2200_vm3, %v3866_v41  ;;  %v3876_v55 = vrot.slane %v3871_v39, 4  ;;  %v3883_v19 = vor.u32 %v3881_v22, %v3880_v63  ;;  %v3885_v13 = vrot.slane %v3880_v63, 4  ;;  %v3889_v7 = vrot.slane %v3887_v24, 7  ;;  %v4095_v40 = vld [vmem:[#allocation3 + $0x78] sm:$0xff] }
 0x378   :  { %v4059_v61 = vsel %vm5977_vm8, %v4054_v31, %v4058_v42  ;;  %v3875_v6 = vsel %vm6039_vm11, %v3867_v54, %v3874_v18  ;;  %3647 = vst.msk [vmem:[#allocation3 + $0x108] sm:$0xf] %vm2429_vm14, %v3629_v43  ;;  %3128 = vst.msk [vmem:[#allocation3 + $0x84] sm:$0xf] %vm2429_vm14, %v3111_v58  ;;  %v5305_v28 = vcombine.low %v4095_v40, %v4098_v10  ;;  %v4101_v57 = vld [vmem:[#allocation3 + $0xa0] sm:$0xff]  ;;  %v4107_v47 = vld [vmem:[#allocation3 + $0xc8] sm:$0xff] }
 0x379   :  { %4691 = vmatmul.mubr.bf16.gmra.mxu1 %v5300_v26  ;;  %v3884_v16 = vsel %vm6039_vm11, %v3876_v55, %v3883_v19  ;;  %4075 = vst.msk [vmem:[#allocation3 + $0x13c] sm:$0xf] %vm2200_vm3, %v4059_v61  ;;  %3907 = vst.msk [vmem:[#allocation3 + $0x110] sm:$0xf] %vm2200_vm3, %v3875_v6  ;;  %v3892_v1 = vor.u32 %v3890_v37, %v3889_v7  ;;  %v2943_v11 = vpop.permute.xlu1 %2942  ;;  %v5749_v53 = vld [vmem:[#allocation3 + $0xc] ss:$20 sps:$4 sm:$0xff]  }
 0x37a   :  { %4698 = vmatprep.mubr.bf16.mxu1 %v5741_v29  ;;  %3908 = vst.msk [vmem:[#allocation3 + $0x124] sm:$0xf] %vm2200_vm3, %v3884_v16  ;;  %v2945_v0 = vpop.permute.xlu0 %2944  ;;  %v5745_v49 = vld [vmem:[#allocation3 + $0xa4] ss:$20 sps:$4 sm:$0xff]   ;;  %4771 = vmatprep.mubr.bf16.mxu0 %v5749_v53  ;;  %v5753_v59 = vld [vmem:[#allocation3 + $0x34] ss:$20 sps:$4 sm:$0xff]  }
 0x37b   :  { %v3893_v5 = vsel %vm6039_vm11, %v3885_v13, %v3892_v1  ;;  %2965 = vst.msk [vmem:[#allocation3 + $0x1c] sm:$0xf] %vm2429_vm14, %v2943_v11  ;;  %2966 = vst.msk [vmem:[#allocation3 + $0x30] sm:$0xf] %vm2429_vm14, %v2945_v0  ;;  %v4104_v2 = vld [vmem:[#allocation3 + $0xb4] sm:$0xff]  ;;  %v4110_v48 = vld [vmem:[#allocation3 + $0xdc] sm:$0xff] }
 0x37c   :  { %3909 = vst.msk [vmem:[#allocation3 + $0x138] sm:$0xf] %vm2200_vm3, %v3893_v5  ;;  %v5310_v62 = vcombine.low %v4101_v57, %v4104_v2  ;;  %v5751_v12 = vld [vmem:[#allocation3 + $0xcc] ss:$20 sps:$4 sm:$0xff]   ;;  %v5315_v27 = vcombine.low %v4107_v47, %v4110_v48  ;;  %v4113_v31 = vld [vmem:[#allocation3 + $0xf0] sm:$0xff]  ;;  %vm4617_vm8 = vcmask 523264  }
 0x37d   :  { %v3113_v8 = vpop.permute.xlu1 %3112  ;;  %v5757_v54 = vld [vmem:[#allocation3 + $0x5c] ss:$20 sps:$4 sm:$0xff]   ;;  %v5767_v43 = vld [vmem:[#allocation3 + $0x38] ss:$20 sps:$4 sm:$0xff]   ;;  %v5768_v58 = vld [vmem:[#allocation3 + $0x60] ss:$20 sps:$4 sm:$0xff]  }
 0x37e   :  { %v3387_v52 = vpop.permute.xlu0 %3386  ;;  %3129 = vst.msk [vmem:[#allocation3 + $0x98] sm:$0xf] %vm2429_vm14, %v3113_v8  ;;  %v5764_v18 = vld [vmem:[#allocation3 + $0x10] ss:$20 sps:$4 sm:$0xff]   ;;  %v5771_v8 = vld [vmem:[#allocation3 + $0x88] ss:$20 sps:$4 sm:$0xff]  }
 0x37f   :  { %3404 = vst.msk [vmem:[#allocation3 + $0x118] sm:$0xf] %vm2429_vm14, %v3387_v52  ;;  %v5755_v50 = vld [vmem:[#allocation3 + $0xf4] ss:$20 sps:$4 sm:$0xff]   ;;  %v5772_v52 = vld [vmem:[#allocation3 + $0xb0] ss:$20 sps:$4 sm:$0xff]  }
 0x380   :  { %v4116_v14 = vld [vmem:[#allocation3 + $0x104] sm:$0xff]  ;;  %v5777_v53 = vld [vmem:[#allocation3 + $0x100] ss:$20 sps:$4 sm:$0xff]  }
 0x381   :  { %4699 = vmatmul.mubr.bf16.gmra.mxu1 %v5305_v28  ;;  %v2947_v17 = vpop.permute.xlu1 %2946  ;;  %v5320_v33 = vcombine.low %v4113_v31, %v4116_v14 }
 0x382   :  { %4706 = vmatprep.mubr.bf16.mxu1 %v5745_v49  ;;  %v2949_v46 = vpop.permute.xlu0 %2948  ;;  %v5747_v45 = vld [vmem:[#allocation3 + $0x8] ss:$20 sps:$4 sm:$0xff]   ;;  %2967 = vst.msk [vmem:[#allocation3 + $0x44] sm:$0xf] %vm2429_vm14, %v2947_v17  ;;  %v4084_v44 = vld [vmem:[#allocation3 + $0x30] sm:$0xff] }
 0x383   :  { %2968 = vst.msk [vmem:[#allocation3 + $0x58] sm:$0xf] %vm2429_vm14, %v2949_v46  ;;  %4772 = vmatmul.mubr.bf16.vlgmr.msra.gmra.mxu0 %v5747_v45  ;;  %v5776_v45 = vld [vmem:[#allocation3 + $0xd8] ss:$20 sps:$4 sm:$0xff]  }
 0x384   :  { %4779 = vmatprep.mubr.bf16.mxu0 %v5753_v59 }
 0x385   :  { %v3389_v20 = vpop.permute.xlu1 %3388  ;;  %v5762_v37 = vld [vmem:[#allocation3 + $0x84] ss:$20 sps:$4 sm:$0xff]  }
 0x386   :  { %v3631_v3 = vpop.permute.xlu0 %3630  ;;  %3405 = vst.msk [vmem:[#allocation3 + $0x12c] sm:$0xf] %vm2429_vm14, %v3389_v20  ;;  %v5781_v20 = vld [vmem:[#allocation3 + $0x128] ss:$20 sps:$4 sm:$0xff]  }
 0x387   :  { %3648 = vst.msk [vmem:[#allocation3 + $0x11c] sm:$0xf] %vm2429_vm14, %v3631_v3 }
 0x389   :  { %4707 = vmatmul.mubr.bf16.gmra.mxu1 %v5310_v62  ;;  %v4087_v32 = vld [vmem:[#allocation3 + $0x44] sm:$0xff] }
 0x38a   :  { %4714 = vmatprep.mubr.bf16.mxu1 %v5751_v12  ;;  %v2951_v9 = vpop.permute.xlu1 %2950  ;;  %v2953_v30 = vpop.permute.xlu0 %2952  ;;  %v5297_v36 = vcombine.low %v4084_v44, %v4087_v32  ;;  %v4090_v56 = vld [vmem:[#allocation3 + $0x58] sm:$0xff] }
 0x38b   :  { %2969 = vst.msk [vmem:[#allocation3 + $0x6c] sm:$0xf] %vm2429_vm14, %v2951_v9  ;;  %2970 = vst.msk [vmem:[#allocation3 + $0x80] sm:$0xf] %vm2429_vm14, %v2953_v30 }
 0x38c   :  { %4780 = vmatmul.mubr.bf16.gmra.mxu0 %v5297_v36 }
 0x38d   :  { %4787 = vmatprep.mubr.bf16.mxu0 %v5757_v54 }
 0x38e   :  { %v3633_v15 = vpop.permute.xlu1 %3632  ;;  %v4119_v24 = vld [vmem:[#allocation3 + $0x118] sm:$0xff] }
 0x38f   :  { %v3927_v51 = vpop.permute.xlu0 %3926  ;;  %3649 = vst.msk [vmem:[#allocation3 + $0x130] sm:$0xf] %vm2429_vm14, %v3633_v15 }
 0x390   :  { %3950 = vst.msk [vmem:[#allocation3 + $0xac] sm:$0xf] %vm2429_vm14, %v3927_v51 }
 0x391   :  { %4715 = vmatmul.mubr.bf16.gmra.mxu1 %v5315_v27 }
 0x392   :  { %4722 = vmatprep.mubr.bf16.mxu1 %v5755_v50  ;;  %v2955_v60 = vpop.permute.xlu1 %2954  ;;  %v4093_v34 = vld [vmem:[#allocation3 + $0x6c] sm:$0xff]  ;;  %v4096_v4 = vld [vmem:[#allocation3 + $0x80] sm:$0xff] }
 0x393   :  { %v3769_v23 = vpop.permute.xlu0 %3768  ;;  %2971 = vst.msk [vmem:[#allocation3 + $0x94] sm:$0xf] %vm2429_vm14, %v2955_v60  ;;  %v5302_v38 = vcombine.low %v4090_v56, %v4093_v34 }
 0x394   :  { %3792 = vst.msk [vmem:[#allocation3 + $0xa8] sm:$0xf] %vm2429_vm14, %v3769_v23 }
 0x395   :  { %4788 = vmatmul.mubr.bf16.gmra.mxu0 %v5302_v38 }
 0x396   :  { %v3929_v21 = vpop.permute.xlu1 %3928  ;;  %v5760_v63 = vld [vmem:[#allocation3 + $0x11c] ss:$20 sps:$4 sm:$0xff]   ;;  %4795 = vmatprep.mubr.bf16.mxu0 %v5762_v37 }
 0x397   :  { %v3931_v39 = vpop.permute.xlu0 %3930  ;;  %3951 = vst.msk [vmem:[#allocation3 + $0xc0] sm:$0xf] %vm2429_vm14, %v3929_v21  ;;  %v4122_v22 = vld [vmem:[#allocation3 + $0x12c] sm:$0xff] }
 0x398   :  { %3952 = vst.msk [vmem:[#allocation3 + $0xd4] sm:$0xf] %vm2429_vm14, %v3931_v39  ;;  %v5325_v42 = vcombine.low %v4119_v24, %v4122_v22 }
 0x399   :  { %4723 = vmatmul.mubr.bf16.gmra.mxu1 %v5320_v33 }
 0x39a   :  { %4730 = vmatprep.mubr.bf16.mxu1 %v5760_v63  ;;  %v3771_v25 = vpop.permute.xlu1 %3770  ;;  %v4099_v41 = vld [vmem:[#allocation3 + $0x94] sm:$0xff] }
 0x39b   :  { %v3773_v35 = vpop.permute.xlu0 %3772  ;;  %3793 = vst.msk [vmem:[#allocation3 + $0xbc] sm:$0xf] %vm2429_vm14, %v3771_v25  ;;  %v5307_v26 = vcombine.low %v4096_v4, %v4099_v41  ;;  %v4102_v7 = vld [vmem:[#allocation3 + $0xa8] sm:$0xff] }
 0x39c   :  { %3794 = vst.msk [vmem:[#allocation3 + $0xd0] sm:$0xf] %vm2429_vm14, %v3773_v35 }
 0x39d   :  { %4796 = vmatmul.mubr.bf16.gmra.mxu0 %v5307_v26 }
 0x39e   :  { %v3933_v55 = vpop.permute.xlu1 %3932  ;;  %v5765_v6 = vld [vmem:[#allocation3 + $0xac] ss:$20 sps:$4 sm:$0xff]  }
 0x39f   :  { %v3935_v19 = vpop.permute.xlu0 %3934  ;;  %3953 = vst.msk [vmem:[#allocation3 + $0xe8] sm:$0xf] %vm2429_vm14, %v3933_v55  ;;  %4803 = vmatprep.mubr.bf16.mxu0 %v5765_v6 }
 0x3a0   :  { %3954 = vst.msk [vmem:[#allocation3 + $0xfc] sm:$0xf] %vm2429_vm14, %v3935_v19 }
 0x3a1   :  { %4731 = vmatmul.mubr.bf16.gmra.mxu1 %v5325_v42 }
 0x3a2   :  { %5632 = vmatprep.mubr.msk.bf16.mxu1 %vm4617_vm8, %v5764_v18  ;;  %v3775_v29 = vpop.permute.xlu1 %3774  ;;  %v4105_v61 = vld [vmem:[#allocation3 + $0xbc] sm:$0xff] }
 0x3a3   :  { %v3777_v13 = vpop.permute.xlu0 %3776  ;;  %3795 = vst.msk [vmem:[#allocation3 + $0xe4] sm:$0xf] %vm2429_vm14, %v3775_v29  ;;  %v5312_v16 = vcombine.low %v4102_v7, %v4105_v61  ;;  %v4108_v5 = vld [vmem:[#allocation3 + $0xd0] sm:$0xff] }
 0x3a4   :  { %3796 = vst.msk [vmem:[#allocation3 + $0xf8] sm:$0xf] %vm2429_vm14, %v3777_v13 }
 0x3a5   :  { %4804 = vmatmul.mubr.bf16.gmra.mxu0 %v5312_v16  ;;  %v8507_v16 = vld [vmem:[%s8740_s4] sm:$0x7]  ;;  %s5816_s4 = smov [#allocation5]  }
 0x3a6   :  { %v3937_v1 = vpop.permute.xlu1 %3936  ;;  %v5769_v28 = vld [vmem:[#allocation3 + $0xd4] ss:$20 sps:$4 sm:$0xff]   ;;  %8868 = vst [vmem:[#allocation11_spill] sm:$0xff] %v8507_v16  ;;  %s5201_s10 = sshll.u32 %s5816_s4, 4  ;;  %s5202_s10 = int_to_ptr.vmem [resolvable:$true] %s5201_s10 }
 0x3a7   :  { %v3781_v10 = vpop.permute.xlu0 %3780  ;;  %3955 = vst.msk [vmem:[#allocation3 + $0x110] sm:$0xf] %vm2429_vm14, %v3937_v1  ;;  %4811 = vmatprep.mubr.bf16.mxu0 %v5769_v28  ;;  %s5787_s11 = scalar_lea.vmem %s5202_s10, 2048  ;;  %p5792_p1 = scmp.lt.s32.totalorder %s5202_s10, %s5202_s10 }
 0x3a8   :  { %3798 = vst.msk [vmem:[#allocation3 + $0x120] sm:$0xf] %vm2429_vm14, %v3781_v10  ;;  %p5788_p0 = scmp.ne.s32.totalorder %s5202_s10, %s5787_s11  ;;  %p5793_p2 = scmp.lt.s32.totalorder %s5787_s11, %s5787_s11 }
 0x3a9   :  { %5633 = vmatmul.mubr.msk.bf16.vlgmr.msra.gmra.mxu1 %vm4617_vm8, %v5767_v43 }
 0x3aa   :  { %5636 = vmatprep.mubr.msk.bf16.mxu1 %vm4617_vm8, %v5768_v58  ;;  %v3779_v40 = vpop.permute.xlu1 %3778  ;;  %v4111_v0 = vld [vmem:[#allocation3 + $0xe4] sm:$0xff]  ;;  %p5794_p3 = por %p5793_p2, %p5792_p1 }
 0x3ab   :  { %v3939_v11 = vpop.permute.xlu0 %3938  ;;  %3797 = vst.msk [vmem:[#allocation3 + $0x10c] sm:$0xf] %vm2429_vm14, %v3779_v40  ;;  %v5317_v49 = vcombine.low %v4108_v5, %v4111_v0  ;;  %v8869_v5 = vld [vmem:[#allocation8_spill] sm:$0xff] }
 0x3ac   :  { %3956 = vst.msk [vmem:[#allocation3 + $0x124] sm:$0xf] %vm2429_vm14, %v3939_v11  ;;  %v8870_v40 = vsub.s32 0, %v8869_v5  ;;  %p5795_p4 = pnand %p5794_p3, %p5788_p0 }
 0x3ad   :  { %4812 = vmatmul.mubr.bf16.gmra.mxu0 %v5317_v49 }
 0x3ae   :  { %v3783_v2 = vpop.permute.xlu1 %3782  ;;  %v5773_v17 = vld [vmem:[#allocation3 + $0xfc] ss:$20 sps:$4 sm:$0xff]   ;;  %v8516_v11 = vrot.slane %v8507_v16, %v8870_v40 }
 0x3af   :  { %3799 = vst.msk [vmem:[#allocation3 + $0x134] sm:$0xf] %vm2429_vm14, %v3783_v2  ;;  %4819 = vmatprep.mubr.bf16.mxu0 %v5773_v17 }
 0x3b1   :  { %5637 = vmatmul.mubr.msk.bf16.gmra.mxu1 %vm4617_vm8, %v5771_v8 }
 0x3b2   :  { %5640 = vmatprep.mubr.msk.bf16.mxu1 %vm4617_vm8, %v5772_v52  ;;  %v5775_v46 = vld [vmem:[#allocation3 + $0xf8] ss:$20 sps:$4 sm:$0xff]  }
 0x3b3   :  { %v3941_v57 = vpop.permute.xlu1 %3940 }
 0x3b4   :  { %3957 = vst.msk [vmem:[#allocation3 + $0x138] sm:$0xf] %vm2429_vm14, %v3941_v57 }
 0x3b5   :  { %4820 = vmatmul.mubr.bf16.gmra.mxu0 %v5775_v46 }
 0x3b6   :  { %v5780_v12 = vld [vmem:[#allocation3 + $0x120] ss:$20 sps:$4 sm:$0xff]  }
 0x3b9   :  { %5641 = vmatmul.mubr.msk.bf16.gmra.mxu1 %vm4617_vm8, %v5776_v45 }
 0x3ba   :  { %5644 = vmatprep.mubr.msk.bf16.mxu1 %vm4617_vm8, %v5777_v53 }
 0x3bb   :  { %v5778_v62 = vld [vmem:[#allocation3 + $0x124] ss:$20 sps:$4 sm:$0xff]  }
 0x3bc   :  { %4827 = vmatprep.mubr.bf16.mxu0 %v5778_v62 }
 0x3bd   :  { %4828 = vmatmul.mubr.bf16.gmra.mxu0 %v5780_v12 }
 0x3c1   :  { %5645 = vmatmul.mubr.msk.bf16.gmra.mxu1 %vm4617_vm8, %v5781_v20 }
 0x426   :  { %v5480_v3 = vpop.f32.mrf.mxu1 }
 0x428   :  { %v5481_v48 = vpop.f32.mrf.mxu1 }
 0x429   :  { %v5482_v0 = vadd.f32 %v5481_v48, %v5480_v3 }
 0x42a   :  { %v5483_v47 = vpop.f32.mrf.mxu1 }
 0x42b   :  { %v4677_v46 = vadd.f32 %v5482_v0, %v8516_v11 }
 0x42c   :  { %v5484_v9 = vpop.f32.mrf.mxu1 }
 0x42d   :  { %v5485_v8 = vadd.f32 %v5484_v9, %v5483_v47 }
 0x42f   :  { %v4680_v40 = vadd.f32 %v5485_v8, %v8516_v11 }
 0x431   :  { %v5486_v30 = vpop.f32.mrf.mxu1 }
 0x433   :  { %v5487_v44 = vpop.f32.mrf.mxu1 }
 0x434   :  { %v5488_v52 = vadd.f32 %v5487_v44, %v5486_v30 }
 0x435   :  { %v5489_v32 = vpop.f32.mrf.mxu1 }
 0x436   :  { %v4685_v3 = vadd.f32 %v5488_v52, %v8516_v11 }
 0x437   :  { %v5490_v59 = vpop.f32.mrf.mxu1 }
 0x438   :  { %v5491_v45 = vadd.f32 %v5490_v59, %v5489_v32 }
 0x439   :  { %v5492_v27 = vpop.f32.mrf.mxu1 }
 0x43a   :  { %v4688_v30 = vadd.f32 %v5491_v45, %v8516_v11 }
 0x43b   :  { %v5493_v36 = vpop.f32.mrf.mxu1 }
 0x43c   :  { %v5494_v12 = vadd.f32 %v5493_v36, %v5492_v27 }
 0x43d   :  { %v8466_v50 = vpop.f32.mrf.mxu1 }
 0x43e   :  { %v4693_v59 = vadd.f32 %v5494_v12, %v8516_v11 }
 0x43f   :  { %v8468_v15 = vpop.f32.mrf.mxu1 }
 0x440   :  { %v5497_v27 = vadd.f32 %v8468_v15, %v8466_v50 }
 0x441   :  { %v8470_v51 = vpop.f32.mrf.mxu1 }
 0x443   :  { %v8472_v14 = vpop.f32.mrf.mxu1  ;;  %v5544_v56 = vpop.f32.mrf.mxu0 }
 0x445   :  { %v8474_v31 = vpop.f32.mrf.mxu1  ;;  %v5545_v54 = vpop.f32.mrf.mxu0 }
 0x446   :  { %v5546_v2 = vadd.f32 %v5545_v54, %v5544_v56 }
 0x447   :  { %v8476_v60 = vpop.f32.mrf.mxu1  ;;  %v5547_v38 = vpop.f32.mrf.mxu0 }
 0x448   :  { %v4774_v16 = vadd.f32 %v5546_v2, %v4677_v46 }
 0x449   :  { %v8478_v23 = vpop.f32.mrf.mxu1  ;;  %v5548_v39 = vpop.f32.mrf.mxu0 }
 0x44a   :  { %v5549_v53 = vadd.f32 %v5548_v39, %v5547_v38  ;;  %v5500_v38 = vadd.f32 %v8472_v14, %v8470_v51  ;;  %v4696_v14 = vadd.f32 %v5497_v27, %v8516_v11 }
 0x44b   :  { %v8480_v34 = vpop.f32.mrf.mxu1 }
 0x44c   :  { %v5550_v22 = vpop.f32.mrf.mxu0  ;;  %v4777_v32 = vadd.f32 %v5549_v53, %v4680_v40  ;;  %v5506_v0 = vadd.f32 %v8480_v34, %v8478_v23 }
 0x44d   :  { %v8482_v33 = vpop.f32.mrf.mxu1 }
 0x44e   :  { %v5551_v25 = vpop.f32.mrf.mxu0  ;;  %v4709_v53 = vadd.f32 %v5506_v0, %v8516_v11 }
 0x44f   :  { %v8484_v21 = vpop.f32.mrf.mxu1  ;;  %v5552_v62 = vadd.f32 %v5551_v25, %v5550_v22 }
 0x450   :  { %v5553_v4 = vpop.f32.mrf.mxu0 }
 0x451   :  { %v8486_v63 = vpop.f32.mrf.mxu1  ;;  %v4782_v44 = vadd.f32 %v5552_v62, %v4685_v3 }
 0x452   :  { %v5554_v37 = vpop.f32.mrf.mxu0 }
 0x453   :  { %v8488_v24 = vpop.f32.mrf.mxu1  ;;  %v5555_v48 = vadd.f32 %v5554_v37, %v5553_v4  ;;  %v5503_v4 = vadd.f32 %v8476_v60, %v8474_v31 }
 0x455   :  { %v8490_v35 = vpop.f32.mrf.mxu1  ;;  %v5556_v26 = vpop.f32.mrf.mxu0  ;;  %v4785_v22 = vadd.f32 %v5555_v48, %v4688_v30  ;;  %v4704_v46 = vadd.f32 %v5503_v4, %v8516_v11 }
 0x457   :  { %v8492_v41 = vpop.f32.mrf.mxu1  ;;  %v5557_v55 = vpop.f32.mrf.mxu0 }
 0x459   :  { %v8494_v42 = vpop.f32.mrf.mxu1  ;;  %v5559_v29 = vpop.f32.mrf.mxu0 }
 0x45b   :  { %v8496_v18 = vpop.f32.mrf.mxu1  ;;  %v5560_v7 = vpop.f32.mrf.mxu0 }
 0x45c   :  { %v5561_v37 = vadd.f32 %v5560_v7, %v5559_v29  ;;  %v4701_v29 = vadd.f32 %v5500_v38, %v8516_v11 }
 0x45d   :  { %v8498_v19 = vpop.f32.mrf.mxu1  ;;  %v5562_v6 = vpop.f32.mrf.mxu0 }
 0x45e   :  { %v4793_v45 = vadd.f32 %v5561_v37, %v4696_v14 }
 0x45f   :  { %v8500_v13 = vpop.f32.mrf.mxu1  ;;  %v5563_v58 = vpop.f32.mrf.mxu0 }
 0x460   :  { %v5521_v14 = vadd.f32 %v8500_v13, %v8498_v19 }
 0x461   :  { %v8502_v61 = vpop.f32.mrf.mxu1  ;;  %v5565_v10 = vpop.f32.mrf.mxu0 }
 0x463   :  { %v8509_v43 = vpop.f32.mrf.mxu1  ;;  %v5566_v49 = vpop.f32.mrf.mxu0 }
 0x464   :  { %v5567_v7 = vadd.f32 %v5566_v49, %v5565_v10  ;;  %v5509_v10 = vadd.f32 %v8484_v21, %v8482_v33  ;;  %v5512_v49 = vadd.f32 %v8488_v24, %v8486_v63  ;;  %v5524_v0 = vadd.f32 %v8509_v43, %v8502_v61 }
 0x465   :  { %v8511_v1 = vpop.f32.mrf.mxu1  ;;  %v5568_v57 = vpop.f32.mrf.mxu0  ;;  %v4728_v43 = vadd.f32 %v5521_v14, %v8516_v11 }
 0x466   :  { %v4801_v3 = vadd.f32 %v5567_v7, %v4704_v46  ;;  %v4712_v27 = vadd.f32 %v5509_v10, %v8516_v11 }
 0x467   :  { %v8518_v28 = vpop.f32.mrf.mxu1  ;;  %v5569_v20 = vpop.f32.mrf.mxu0 }
 0x468   :  { %8871 = vst [vmem:[#allocation9_spill] sm:$0xff] %v8518_v28  ;;  %v5558_v28 = vadd.f32 %v5557_v55, %v5556_v26 }
 0x469   :  { %v5634_v17 = vpop.f32.mrf.mxu1  ;;  %v5571_v47 = vpop.f32.mrf.mxu0 }
 0x46a   :  { %v8531_v39 = vadd.f32 %v5634_v17, %v4782_v44 }
 0x46b   :  { %v4870_v5 = vpop.f32.mrf.mxu1  ;;  %v5572_v36 = vpop.f32.mrf.mxu0 }
 0x46c   :  { %v8524_v56 = vadd.f32 %v4870_v5, %v4774_v16  ;;  %v4790_v16 = vadd.f32 %v5558_v28, %v4693_v59  ;;  %v5564_v5 = vadd.f32 %v5563_v58, %v5562_v6  ;;  %v4936_v6 = vsel %vm4617_vm8, %v8531_v39, 0.0 }
 0x46d   :  { %v5635_v9 = vpop.f32.mrf.mxu1  ;;  %v5574_v26 = vpop.f32.mrf.mxu0  ;;  %v5570_v28 = vadd.f32 %v5569_v20, %v5568_v57 }
 0x46e   :  { %v4933_v50 = vsel %vm4617_vm8, %v8524_v56, 0.0  ;;  %v8539_v15 = vadd.f32 %v5635_v9, %v4785_v22  ;;  %v4798_v34 = vadd.f32 %v5564_v5, %v4701_v29  ;;  %v5515_v9 = vadd.f32 %v8492_v41, %v8490_v35 }
 0x46f   :  { %v4873_v54 = vpop.f32.mrf.mxu1  ;;  %v5575_v31 = vpop.f32.mrf.mxu0  ;;  %v4806_v21 = vadd.f32 %v5570_v28, %v4709_v53  ;;  %v4717_v35 = vadd.f32 %v5512_v49, %v8516_v11  ;;  %v4733_v49 = vadd.f32 %v5524_v0, %v8516_v11 }
 0x470   :  { %v8533_v25 = vadd.f32 %v4873_v54, %v4777_v32  ;;  %v4938_v23 = vsel %vm4617_vm8, %v8539_v15, 0.0  ;;  %v5573_v32 = vadd.f32 %v5572_v36, %v5571_v47  ;;  %v5576_v63 = vadd.f32 %v5575_v31, %v5574_v26 }
 0x471   :  { %v5638_v55 = vpop.f32.mrf.mxu1  ;;  %v5577_v2 = vpop.f32.mrf.mxu0  ;;  %v5518_v54 = vadd.f32 %v8496_v18, %v8494_v42  ;;  %v4720_v37 = vadd.f32 %v5515_v9, %v8516_v11 }
 0x472   :  { %v4934_v51 = vsel %vm4617_vm8, %v8533_v25, 0.0  ;;  %v8559_v20 = vadd.f32 %v5638_v55, %v4798_v34  ;;  %v4814_v42 = vadd.f32 %v5576_v63, %v4717_v35 }
 0x473   :  { %v4935_v8 = vadd.f32 %v4934_v51, %v4933_v50  ;;  %v4886_v60 = vpop.f32.mrf.mxu1  ;;  %v5578_v57 = vpop.f32.mrf.mxu0  ;;  %v4809_v50 = vadd.f32 %v5573_v32, %v4712_v27  ;;  %v4725_v51 = vadd.f32 %v5518_v54, %v8516_v11 }
 0x474   :  { %v8549_v58 = vadd.f32 %v4886_v60, %v4790_v16  ;;  %v4944_v41 = vsel %vm4617_vm8, %v8559_v20, 0.0  ;;  %v5579_v47 = vadd.f32 %v5578_v57, %v5577_v2 }
 0x475   :  { %v4937_v52 = vadd.f32 %v4936_v6, %v4935_v8  ;;  %v5639_v17 = vpop.f32.mrf.mxu1  ;;  %v5580_v44 = vpop.f32.mrf.mxu0 }
 0x476   :  { %v4940_v40 = vsel %vm4617_vm8, %v8549_v58, 0.0  ;;  %v8567_v24 = vadd.f32 %v5639_v17, %v4801_v3  ;;  %v4817_v6 = vadd.f32 %v5579_v47, %v4720_v37 }
 0x477   :  { %v4939_v62 = vadd.f32 %v4938_v23, %v4937_v52  ;;  %v4889_v12 = vpop.f32.mrf.mxu1  ;;  %v5581_v22 = vpop.f32.mrf.mxu0  ;;  %v8872_v23 = vld [vmem:[#allocation9_spill] sm:$0xff] }
 0x478   :  { %v8563_v48 = vadd.f32 %v4889_v12, %v4793_v45  ;;  %v4946_v5 = vsel %vm4617_vm8, %v8567_v24, 0.0  ;;  %v5582_v18 = vadd.f32 %v5581_v22, %v5580_v44  ;;  %v5527_v34 = vadd.f32 %v8872_v23, %v8511_v1 }
 0x479   :  { %v4941_v30 = vadd.f32 %v4940_v40, %v4939_v62  ;;  %v5642_v33 = vpop.f32.mrf.mxu1  ;;  %v5583_v55 = vpop.f32.mrf.mxu0 }
 0x47a   :  { %v4942_v59 = vsel %vm4617_vm8, %v8563_v48, 0.0  ;;  %v8587_v29 = vadd.f32 %v5642_v33, %v4814_v42  ;;  %v4822_v61 = vadd.f32 %v5582_v18, %v4725_v51  ;;  %v4736_v1 = vadd.f32 %v5527_v34, %v8516_v11 }
 0x47b   :  { %v4943_v38 = vadd.f32 %v4942_v59, %v4941_v30  ;;  %v4902_v4 = vpop.f32.mrf.mxu1  ;;  %v5584_v31 = vpop.f32.mrf.mxu0 }
 0x47c   :  { %v8577_v36 = vadd.f32 %v4902_v4, %v4806_v21  ;;  %v5585_v19 = vadd.f32 %v5584_v31, %v5583_v55  ;;  %v4952_v62 = vsel %vm4617_vm8, %v8587_v29, 0.0 }
 0x47d   :  { %v4945_v26 = vadd.f32 %v4944_v41, %v4943_v38  ;;  %v5643_v16 = vpop.f32.mrf.mxu1  ;;  %v5586_v2 = vpop.f32.mrf.mxu0 }
 0x47e   :  { %v4948_v7 = vsel %vm4617_vm8, %v8577_v36, 0.0  ;;  %v8593_v46 = vadd.f32 %v5643_v16, %v4817_v6  ;;  %v4825_v33 = vadd.f32 %v5585_v19, %v4728_v43 }
 0x47f   :  { %v4947_v8 = vadd.f32 %v4946_v5, %v4945_v26  ;;  %v4905_v60 = vpop.f32.mrf.mxu1  ;;  %v5587_v53 = vpop.f32.mrf.mxu0 }
 0x480   :  { %v8591_v28 = vadd.f32 %v4905_v60, %v4809_v50  ;;  %v5588_v57 = vadd.f32 %v5587_v53, %v5586_v2  ;;  %v4954_v30 = vsel %vm4617_vm8, %v8593_v46, 0.0 }
 0x481   :  { %v4949_v52 = vadd.f32 %v4948_v7, %v4947_v8  ;;  %v5646_v17 = vpop.f32.mrf.mxu1  ;;  %v5589_v3 = vpop.f32.mrf.mxu0 }
 0x482   :  { %v4950_v13 = vsel %vm4617_vm8, %v8591_v28, 0.0  ;;  %v4830_v44 = vadd.f32 %v5588_v57, %v4733_v49 }
 0x483   :  { %v4951_v45 = vadd.f32 %v4950_v13, %v4949_v52  ;;  %v4918_v10 = vpop.f32.mrf.mxu1  ;;  %v5590_v32 = vpop.f32.mrf.mxu0 }
 0x484   :  { %v8603_v12 = vadd.f32 %v4918_v10, %v4822_v61  ;;  %v8608_v59 = vadd.f32 %v5646_v17, %v4830_v44  ;;  %v5591_v54 = vadd.f32 %v5590_v32, %v5589_v3 }
 0x485   :  { %v4953_v40 = vadd.f32 %v4952_v62, %v4951_v45  ;;  %v5647_v9 = vpop.f32.mrf.mxu1 }
 0x486   :  { %v4956_v27 = vsel %vm4617_vm8, %v8603_v12, 0.0  ;;  %v4833_v4 = vadd.f32 %v5591_v54, %v4736_v1  ;;  %v4960_v37 = vsel %vm4617_vm8, %v8608_v59, 0.0 }
 0x487   :  { %v4955_v21 = vadd.f32 %v4954_v30, %v4953_v40  ;;  %v4921_v63 = vpop.f32.mrf.mxu1 }
 0x488   :  { %v4922_v38 = vadd.f32 %v4921_v63, %v4825_v33  ;;  %v4930_v47 = vadd.f32 %v5647_v9, %v4833_v4 }
 0x489   :  { %v4957_v22 = vadd.f32 %v4956_v27, %v4955_v21 }
 0x48a   :  { %v4958_v35 = vsel %vm4617_vm8, %v4922_v38, 0.0  ;;  %v4962_v26 = vsel %vm4617_vm8, %v4930_v47, 0.0 }
 0x48b   :  { %v4959_v41 = vadd.f32 %v4958_v35, %v4957_v22 }
 0x48d   :  { %v4961_v11 = vadd.f32 %v4960_v37, %v4959_v41 }
 0x48f   :  { %v4963_v55 = vadd.f32 %v4962_v26, %v4961_v11 }
 0x491   :  { %v4964_v16 = vrot.slane %v4963_v55, 4 }
 0x493   :  { %v4965_v5 = vadd.f32 %v4964_v16, %v4963_v55 }
 0x495   :  { %v4966_v42 = vrot.slane %v4965_v5, 2 }
 0x497   :  { %v4967_v18 = vadd.f32 %v4966_v42, %v4965_v5 }
 0x499   :  { %v4968_v50 = vrot.slane %v4967_v18, 1 }
 0x49b   :  { %v4969_v51 = vadd.f32 %v4968_v50, %v4967_v18 }
 0x49d   :  { %v4970_v14 = vmul.f32 0.0078125, %v4969_v51 }
 0x49f   :  { %v8617_v0 = vsub.f32 %v8524_v56, %v4970_v14  ;;  %v8620_v8 = vsub.f32 %v8533_v25, %v4970_v14  ;;  %v8623_v31 = vsub.f32 %v8531_v39, %v4970_v14  ;;  %v8626_v60 = vsub.f32 %v8539_v15, %v4970_v14 }
 0x4a0   :  { %v8633_v52 = vsub.f32 %v8549_v58, %v4970_v14  ;;  %v8638_v25 = vsub.f32 %v8563_v48, %v4970_v14  ;;  %v8645_v19 = vsub.f32 %v8559_v20, %v4970_v14  ;;  %v8651_v48 = vsub.f32 %v8567_v24, %v4970_v14 }
 0x4a1   :  { %v4987_v7 = vmul.f32 %v8617_v0, %v8617_v0  ;;  %v4988_v6 = vmul.f32 %v8620_v8, %v8620_v8  ;;  %v4989_v56 = vmul.f32 %v8623_v31, %v8623_v31  ;;  %v4990_v39 = vmul.f32 %v8626_v60, %v8626_v60 }
 0x4a2   :  { %v4991_v58 = vmul.f32 %v8633_v52, %v8633_v52  ;;  %v4992_v43 = vmul.f32 %v8638_v25, %v8638_v25  ;;  %v8657_v45 = vsub.f32 %v8577_v36, %v4970_v14  ;;  %v4993_v20 = vmul.f32 %v8645_v19, %v8645_v19 }
 0x4a3   :  { %v5003_v15 = vsel %vm4617_vm8, %v4987_v7, 0.0  ;;  %v5004_v2 = vsel %vm4617_vm8, %v4988_v6, 0.0  ;;  %v5006_v13 = vsel %vm4617_vm8, %v4989_v56, 0.0  ;;  %v5008_v23 = vsel %vm4617_vm8, %v4990_v39, 0.0 }
 0x4a4   :  { %v5005_v17 = vadd.f32 %v5004_v2, %v5003_v15  ;;  %v5010_v53 = vsel %vm4617_vm8, %v4991_v58, 0.0  ;;  %v8663_v49 = vsub.f32 %v8591_v28, %v4970_v14  ;;  %v4994_v24 = vmul.f32 %v8651_v48, %v8651_v48 }
 0x4a5   :  { %v5012_v62 = vsel %vm4617_vm8, %v4992_v43, 0.0  ;;  %v8669_v40 = vsub.f32 %v8587_v29, %v4970_v14  ;;  %v4995_v36 = vmul.f32 %v8657_v45, %v8657_v45  ;;  %v5014_v3 = vsel %vm4617_vm8, %v4993_v20, 0.0 }
 0x4a6   :  { %v5007_v61 = vadd.f32 %v5006_v13, %v5005_v17  ;;  %v8675_v30 = vsub.f32 %v8593_v46, %v4970_v14  ;;  %v4996_v28 = vmul.f32 %v8663_v49, %v8663_v49  ;;  %v5016_v44 = vsel %vm4617_vm8, %v4994_v24, 0.0 }
 0x4a7   :  { %v8681_v1 = vsub.f32 %v8603_v12, %v4970_v14  ;;  %v4997_v29 = vmul.f32 %v8669_v40, %v8669_v40  ;;  %v5018_v21 = vsel %vm4617_vm8, %v4995_v36, 0.0  ;;  %v4984_v63 = vsub.f32 %v4922_v38, %v4970_v14 }
 0x4a8   :  { %v5009_v34 = vadd.f32 %v5008_v23, %v5007_v61  ;;  %v4998_v46 = vmul.f32 %v8675_v30, %v8675_v30  ;;  %v5020_v27 = vsel %vm4617_vm8, %v4996_v28, 0.0  ;;  %v4985_v22 = vsub.f32 %v8608_v59, %v4970_v14  ;;  %v8874_v28 = vld [vmem:[#allocation8_spill] sm:$0xff] }
 0x4a9   :  { %v4999_v4 = vmul.f32 %v8681_v1, %v8681_v1  ;;  %v5022_v12 = vsel %vm4617_vm8, %v4997_v29, 0.0  ;;  %v4986_v41 = vsub.f32 %v4930_v47, %v4970_v14  ;;  %v5000_v37 = vmul.f32 %v4984_v63, %v4984_v63  ;;  %v5101_v47 = vpop.permute.xlu0 %5100  ;;  %v5103_v14 = vpop.permute.xlu1 %5102 }
 0x4aa   :  { %v5011_v10 = vadd.f32 %v5010_v53, %v5009_v34  ;;  %v5024_v11 = vsel %vm4617_vm8, %v4998_v46, 0.0  ;;  %v5001_v38 = vmul.f32 %v4985_v22, %v4985_v22  ;;  %v8876_v29 = vsub.s32 2, %v8874_v28 }
 0x4ab   :  { %v5026_v55 = vsel %vm4617_vm8, %v4999_v4, 0.0  ;;  %v5002_v5 = vmul.f32 %v4986_v41, %v4986_v41  ;;  %v5028_v42 = vsel %vm4617_vm8, %v5000_v37, 0.0 }
 0x4ac   :  { %v5013_v57 = vadd.f32 %v5012_v62, %v5011_v10  ;;  %v5030_v59 = vsel %vm4617_vm8, %v5001_v38, 0.0 }
 0x4ad   :  { %v5032_v51 = vsel %vm4617_vm8, %v5002_v5, 0.0  ;;  %v5105_v2 = vpop.permute.xlu0 %5104  ;;  %v5107_v17 = vpop.permute.xlu1 %5106 }
 0x4ae   :  { %v5015_v9 = vadd.f32 %v5014_v3, %v5013_v57  ;;  %v8873_v57 = vld [vmem:[#allocation11_spill] sm:$0xff] }
 0x4b0   :  { %v5017_v33 = vadd.f32 %v5016_v44, %v5015_v9  ;;  %v8875_v44 = vsub.s32 1, %v8874_v28 }
 0x4b1   :  { %v5109_v43 = vpop.permute.xlu0 %5108  ;;  %v5111_v23 = vpop.permute.xlu1 %5110 }
 0x4b2   :  { %v5019_v32 = vadd.f32 %v5018_v21, %v5017_v33  ;;  %v5067_v21 = vrot.slane %v8873_v57, %v8876_v29 }
 0x4b4   :  { %v5021_v54 = vadd.f32 %v5020_v27, %v5019_v32 }
 0x4b5   :  { %v5113_v20 = vpop.permute.xlu0 %5112  ;;  %v5115_v53 = vpop.permute.xlu1 %5114 }
 0x4b6   :  { %v5023_v35 = vadd.f32 %v5022_v12, %v5021_v54 }
 0x4b8   :  { %v5025_v26 = vadd.f32 %v5024_v11, %v5023_v35 }
 0x4b9   :  { %v5117_v10 = vpop.permute.xlu0 %5116  ;;  %v5119_v24 = vpop.permute.xlu1 %5118 }
 0x4ba   :  { %v5027_v16 = vadd.f32 %v5026_v55, %v5025_v26 }
 0x4bc   :  { %v5029_v18 = vadd.f32 %v5028_v42, %v5027_v16 }
 0x4bd   :  { %v5121_v3 = vpop.permute.xlu0 %5120  ;;  %v5123_v9 = vpop.permute.xlu1 %5122 }
 0x4be   :  { %v5031_v50 = vadd.f32 %v5030_v59, %v5029_v18 }
 0x4c0   :  { %v5033_v7 = vadd.f32 %v5032_v51, %v5031_v50 }
 0x4c1   :  { %v5127_v16 = vpop.permute.xlu1 %5126 }
 0x4c2   :  { %v5034_v6 = vrot.slane %v5033_v7, 4 }
 0x4c4   :  { %v5035_v56 = vadd.f32 %v5034_v6, %v5033_v7 }
 0x4c6   :  { %v5036_v39 = vrot.slane %v5035_v56, 2 }
 0x4c8   :  { %v5037_v15 = vadd.f32 %v5036_v39, %v5035_v56 }
 0x4ca   :  { %v5038_v58 = vrot.slane %v5037_v15, 1 }
 0x4cc   :  { %v5039_v13 = vadd.f32 %v5038_v58, %v5037_v15 }
 0x4ce   :  { %v5040_v61 = vmul.f32 0.0078125, %v5039_v13 }
 0x4d0   :  { %v5041_v34 = vadd.f32 1e-05, %v5040_v61 }
 0x4d2   :  { %5784 = vrsqrt.f32 %v5041_v34  ;;  %v5131_v34 = vpop.permute.xlu1 %5130 }
 0x4df   :  { %v5785_v62 = vpop.eup %5784 }
 0x4e0   :  { %v5043_v36 = vmul.f32 %v5785_v62, %v8873_v57 }
 0x4e2   :  { %v5047_v33 = vrot.slane %v5043_v36, %v8875_v44 }
 0x4e4   :  { %v5048_v32 = vmul.f32 %v5047_v33, %v8617_v0  ;;  %v5049_v46 = vmul.f32 %v5047_v33, %v8620_v8  ;;  %v5050_v27 = vmul.f32 %v5047_v33, %v8623_v31  ;;  %v5051_v54 = vmul.f32 %v5047_v33, %v8626_v60 }
 0x4e5   :  { %v5052_v4 = vmul.f32 %v5047_v33, %v8633_v52  ;;  %v5053_v12 = vmul.f32 %v5047_v33, %v8638_v25  ;;  %v5054_v35 = vmul.f32 %v5047_v33, %v8645_v19  ;;  %v5055_v37 = vmul.f32 %v5047_v33, %v8651_v48  ;;  %v5125_v52 = vpop.permute.xlu0 %5124 }
 0x4e6   :  { %v5056_v11 = vmul.f32 %v5047_v33, %v8657_v45  ;;  %v5057_v26 = vmul.f32 %v5047_v33, %v8663_v49  ;;  %v5058_v0 = vmul.f32 %v5047_v33, %v8669_v40  ;;  %v5059_v8 = vmul.f32 %v5047_v33, %v8675_v30 }
 0x4e7   :  { %v5060_v31 = vmul.f32 %v5047_v33, %v8681_v1  ;;  %v5061_v38 = vmul.f32 %v5047_v33, %v4984_v63  ;;  %v5062_v60 = vmul.f32 %v5047_v33, %v4985_v22  ;;  %v5063_v55 = vmul.f32 %v5047_v33, %v4986_v41 }
 0x4e8   :  { %v5068_v25 = vadd.f32 %v5067_v21, %v5048_v32  ;;  %v5069_v5 = vadd.f32 %v5067_v21, %v5049_v46  ;;  %v5070_v19 = vadd.f32 %v5067_v21, %v5050_v27  ;;  %v5071_v42 = vadd.f32 %v5067_v21, %v5051_v54 }
 0x4e9   :  { %v5072_v48 = vadd.f32 %v5067_v21, %v5052_v4  ;;  %v5073_v18 = vadd.f32 %v5067_v21, %v5053_v12  ;;  %v5074_v45 = vadd.f32 %v5067_v21, %v5054_v35  ;;  %v5075_v59 = vadd.f32 %v5067_v21, %v5055_v37  ;;  %v5129_v61 = vpop.permute.xlu0 %5128 }
 0x4ea   :  { %v5076_v49 = vadd.f32 %v5067_v21, %v5056_v11  ;;  %v5077_v50 = vadd.f32 %v5067_v21, %v5057_v26  ;;  %v5078_v40 = vadd.f32 %v5067_v21, %v5058_v0  ;;  %v5079_v51 = vadd.f32 %v5067_v21, %v5059_v8 }
 0x4eb   :  { %v5080_v30 = vadd.f32 %v5067_v21, %v5060_v31  ;;  %v5081_v7 = vadd.f32 %v5067_v21, %v5061_v38  ;;  %v5082_v1 = vadd.f32 %v5067_v21, %v5062_v60  ;;  %v5083_v63 = vadd.f32 %v5067_v21, %v5063_v55 }
 0x4ec   :  { %v5148_v22 = vadd.f32 %v5101_v47, %v5068_v25  ;;  %v5149_v41 = vadd.f32 %v5103_v14, %v5069_v5  ;;  %v5150_v6 = vadd.f32 %v5105_v2, %v5070_v19  ;;  %v5151_v56 = vadd.f32 %v5107_v17, %v5071_v42 }
 0x4ed   :  { %v5152_v39 = vadd.f32 %v5109_v43, %v5072_v48  ;;  %v5153_v15 = vadd.f32 %v5111_v23, %v5073_v18  ;;  %v5154_v58 = vadd.f32 %v5113_v20, %v5074_v45  ;;  %v5155_v13 = vadd.f32 %v5115_v53, %v5075_v59 }
 0x4ee   :  { %v5156_v62 = vadd.f32 %v5117_v10, %v5076_v49  ;;  %v5157_v57 = vadd.f32 %v5119_v24, %v5077_v50  ;;  %v5158_v36 = vadd.f32 %v5121_v3, %v5078_v40  ;;  %v5159_v28 = vadd.f32 %v5123_v9, %v5079_v51 }
 0x4ef   :  { %v5160_v44 = vadd.f32 %v5125_v52, %v5080_v30  ;;  %v5161_v33 = vadd.f32 %v5127_v16, %v5081_v7  ;;  %v5162_v29 = vadd.f32 %v5129_v61, %v5082_v1  ;;  %v5163_v32 = vadd.f32 %v5131_v34, %v5083_v63 }
 0x4f0   :  { %v5164_v46 = vmax.f32 %v5148_v22, 0.0  ;;  %v5165_v21 = vmax.f32 %v5149_v41, 0.0  ;;  %v5166_v47 = vmax.f32 %v5150_v6, 0.0  ;;  %v5167_v14 = vmax.f32 %v5151_v56, 0.0 }
 0x4f1   :  { %v5168_v2 = vmax.f32 %v5152_v39, 0.0  ;;  %v5169_v17 = vmax.f32 %v5153_v15, 0.0  ;;  %v5170_v43 = vmax.f32 %v5154_v58, 0.0  ;;  %v5171_v23 = vmax.f32 %v5155_v13, 0.0 }
 0x4f2   :  { %v5172_v20 = vmax.f32 %v5156_v62, 0.0  ;;  %v5173_v53 = vmax.f32 %v5157_v57, 0.0  ;;  %v5174_v10 = vmax.f32 %v5158_v36, 0.0  ;;  %v5175_v24 = vmax.f32 %v5159_v28, 0.0  ;;  %5180 = vst.msk [vmem:[#allocation5] sm:$0xff] %vm4617_vm8, %v5164_v46  ;;  %5181 = vst.msk [vmem:[#allocation5 + $0x8] sm:$0xff] %vm4617_vm8, %v5165_v21 }
 0x4f3   :  { %5182 = vst.msk [vmem:[#allocation5 + $0x10] sm:$0xff] %vm4617_vm8, %v5166_v47  ;;  %5183 = vst.msk [vmem:[#allocation5 + $0x18] sm:$0xff] %vm4617_vm8, %v5167_v14  ;;  %v5176_v3 = vmax.f32 %v5160_v44, 0.0  ;;  %v5177_v9 = vmax.f32 %v5161_v33, 0.0  ;;  %v5178_v27 = vmax.f32 %v5162_v29, 0.0  ;;  %v5179_v54 = vmax.f32 %v5163_v32, 0.0 }
 0x4f4   :  { %5184 = vst.msk [vmem:[#allocation5 + $0x20] sm:$0xff] %vm4617_vm8, %v5168_v2  ;;  %5185 = vst.msk [vmem:[#allocation5 + $0x28] sm:$0xff] %vm4617_vm8, %v5169_v17 }
 0x4f5   :  { %5186 = vst.msk [vmem:[#allocation5 + $0x30] sm:$0xff] %vm4617_vm8, %v5170_v43  ;;  %5187 = vst.msk [vmem:[#allocation5 + $0x38] sm:$0xff] %vm4617_vm8, %v5171_v23 }
 0x4f6   :  { %5188 = vst.msk [vmem:[#allocation5 + $0x40] sm:$0xff] %vm4617_vm8, %v5172_v20  ;;  %5189 = vst.msk [vmem:[#allocation5 + $0x48] sm:$0xff] %vm4617_vm8, %v5173_v53 }
 0x4f7   :  { %5190 = vst.msk [vmem:[#allocation5 + $0x50] sm:$0xff] %vm4617_vm8, %v5174_v10  ;;  %5191 = vst.msk [vmem:[#allocation5 + $0x58] sm:$0xff] %vm4617_vm8, %v5175_v24 }
 0x4f8   :  { %5192 = vst.msk [vmem:[#allocation5 + $0x60] sm:$0xff] %vm4617_vm8, %v5176_v3  ;;  %5193 = vst.msk [vmem:[#allocation5 + $0x68] sm:$0xff] %vm4617_vm8, %v5177_v9 }
 0x4f9   :  { %5194 = vst.msk [vmem:[#allocation5 + $0x70] sm:$0xff] %vm4617_vm8, %v5178_v27  ;;  %5195 = vst.msk [vmem:[#allocation5 + $0x78] sm:$0xff] %vm4617_vm8, %v5179_v54 }
 0x4fa   :  { %5798 = shalt.err (!%p5795_p4)
}
 0x4fb   :  { %s5817_s12 = smov 128   ;;  %s5818_s13 = smov 8  }
 0x4fc   :  { %5207 = dma.vmem_to_hbm [thread:$0]  %s5202_s10, 2048, %s8741_s5, [#allocation6], %s5817_s12, %s5817_s12, %s5818_s13  }
 0x4fd   :  { %5807 = dma.done.wait [#allocation6], 2048  }
 0x4fe   :  { %5808 = vsyncadd [#allocation6], 4294965248 }
 0x4ff   :  { %5211 = vsyncpa [#allocation6], 1 }

</bundles_post_ra>
